<compile_context>
chip_gen: v5e
topology: v5e:2x2
jax: 0.10.0
libtpu: 0.0.40
codegen_flags: <defaults>
</compile_context>

<pallas_src>
import numpy as np
import jax
import jax.numpy as jnp
from jax.experimental import pallas as pl
from jax.experimental.pallas import tpu as pltpu


_CONV_CFG = (("c1", 4, 2), ("c2", 2, 1), ("c3", 1, 1))   # (name, stride, pad)
_LANE = 128


def _round_up(n, m):
    return ((n + m - 1) // m) * m


# ----------------------------------------------------------------------------
# Fused forward kernel: 6 dense matmuls, weights sliced from one VMEM slab.
# ----------------------------------------------------------------------------
def _make_qnet_kernel(layout):
    """layout: static tuple of (row_offset, rows, cols, relu) per layer."""
    def kernel(act_ref, w_ref, b_ref, out_ref):
        act = act_ref[...]                                 # [B, in0] bf16
        acc = None
        for i, (r0, rows, cols, relu) in enumerate(layout):
            w = w_ref[r0:r0 + rows, :cols]                 # static, tile-aligned
            acc = jnp.dot(act, w, preferred_element_type=jnp.float32)
            acc = acc + b_ref[i:i + 1, :cols]
            if relu:
                acc = jnp.maximum(acc, 0.0)
            act = acc.astype(jnp.bfloat16)                 # unused after last layer
        # TODO(synk): Dropout(0.2) layers are identity here (eval-mode semantics).
        out_ref[...] = acc                                 # fc3, N padded to 128
    return kernel


# ----------------------------------------------------------------------------
# Parameter packing (torch-layout params -> one weight slab + one bias slab).
# ----------------------------------------------------------------------------
def pack_params(params, input_shape, num_actions):
    c, h, w = input_shape
    mats, biases = [], []

    # Convs folded into dense [ic*h*w, oc*oh*ow] matrices (torch flatten order
    # on both sides, so conv->conv->fc1 chaining needs no permutation).
    for name, stride, pad in _CONV_CFG:
        wt = np.asarray(params[name + "_w"], np.float32)    # [OC, IC, KH, KW]
        bs = np.asarray(params[name + "_b"], np.float32)    # [OC]
        oc, ic, kh, kw = wt.shape
        assert ic == c
        oh = (h + 2 * pad - kh) // stride + 1
        ow = (w + 2 * pad - kw) // stride + 1
        m = np.zeros((ic * h * w, oc * oh * ow), np.float32)
        ic_idx = np.arange(ic)
        oc_idx = np.arange(oc)
        for oy in range(oh):
            for ox in range(ow):
                out_cols = oc_idx * (oh * ow) + oy * ow + ox
                for ky in range(kh):
                    y = stride * oy + ky - pad
                    if not (0 <= y < h):
                        continue
                    for kx in range(kw):
                        x = stride * ox + kx - pad
                        if not (0 <= x < w):
                            continue
                        in_rows = ic_idx * (h * w) + y * w + x
                        m[np.ix_(in_rows, out_cols)] = wt[:, :, ky, kx].T
        mats.append(m)
        biases.append(np.repeat(bs, oh * ow))
        c, h, w = oc, oh, ow

    # Fully-connected layers (stored as [in, out]; torch flatten order matches).
    f1 = np.asarray(params["f1_w"], np.float32)
    assert f1.shape[0] == c * h * w
    mats.append(f1)
    biases.append(np.asarray(params["f1_b"], np.float32))
    mats.append(np.asarray(params["f2_w"], np.float32))
    biases.append(np.asarray(params["f2_b"], np.float32))

    # fc3: pad N up to a lane-dense multiple of 128 with zero weights/bias.
    f3 = np.asarray(params["f3_w"], np.float32)              # [256, A]
    n_pad = _round_up(num_actions, _LANE)
    f3p = np.zeros((f3.shape[0], n_pad), np.float32)
    f3p[:, :num_actions] = f3
    b3p = np.zeros((n_pad,), np.float32)
    b3p[:num_actions] = np.asarray(params["f3_b"], np.float32)
    mats.append(f3p)
    biases.append(b3p)

    # Pack everything into one bf16 weight slab and one f32 bias slab.
    max_cols = _round_up(max(m.shape[1] for m in mats), _LANE)
    total_rows = sum(_round_up(m.shape[0], 8) for m in mats)
    w_slab = np.zeros((total_rows, max_cols), np.float32)
    b_slab = np.zeros((len(mats), max_cols), np.float32)
    layout = []
    r0 = 0
    for i, (m, b) in enumerate(zip(mats, biases)):
        rows, cols = m.shape
        w_slab[r0:r0 + rows, :cols] = m
        b_slab[i, :cols] = b
        layout.append((r0, rows, cols, i < len(mats) - 1))   # last layer: no ReLU
        r0 += _round_up(rows, 8)
    return (jnp.asarray(w_slab, jnp.bfloat16),
            jnp.asarray(b_slab, jnp.float32),
            tuple(layout))


# ----------------------------------------------------------------------------
# Forward pass (single fused pallas_call, 3 input DMAs)
# ----------------------------------------------------------------------------
def qnetwork_forward(w_slab, b_slab, layout, x, num_actions):
    """x: [B, C, H, W] float32 (PyTorch NCHW) -> [B, num_actions] float32."""
    B = x.shape[0]
    act0 = x.reshape(B, -1).astype(jnp.bfloat16)   # torch (c, h, w) flatten order
    n_pad = layout[-1][2]
    out = pl.pallas_call(
        _make_qnet_kernel(layout),
        out_shape=jax.ShapeDtypeStruct((B, n_pad), jnp.float32),
        in_specs=[pl.BlockSpec(memory_space=pltpu.MemorySpace.VMEM)] * 3,
        out_specs=pl.BlockSpec(memory_space=pltpu.MemorySpace.VMEM),
    )(act0, w_slab, b_slab)
    return out[:, :num_actions]


# ----------------------------------------------------------------------------
# Parameter init (PyTorch-default-style uniform(+-1/sqrt(fan_in)))
# ----------------------------------------------------------------------------
def _uniform(key, shape, bound):
    return jax.random.uniform(key, shape, jnp.float32, -bound, bound)


def init_params(key, input_shape, num_actions):
    c, h, w = input_shape
    keys = jax.random.split(key, 12)
    params = {}

    def conv_init(kw_, kb_, oc, ic, kh, kwid):
        bound = 1.0 / jnp.sqrt(ic * kh * kwid)
        return (_uniform(kw_, (oc, ic, kh, kwid), bound),
                _uniform(kb_, (oc,), bound))

    def lin_init(kw_, kb_, in_f, out_f):
        bound = 1.0 / jnp.sqrt(in_f)
        # stored as [in_f, out_f] (transposed w.r.t. torch.nn.Linear.weight)
        return (_uniform(kw_, (in_f, out_f), bound),
                _uniform(kb_, (out_f,), bound))

    params["c1_w"], params["c1_b"] = conv_init(keys[0], keys[1], 32, c, 8, 8)
    params["c2_w"], params["c2_b"] = conv_init(keys[2], keys[3], 64, 32, 4, 4)
    params["c3_w"], params["c3_b"] = conv_init(keys[4], keys[5], 64, 64, 3, 3)

    def osz(s, k, st, p):
        return (s + 2 * p - k) // st + 1

    h1, w1 = osz(h, 8, 4, 2), osz(w, 8, 4, 2)
    h2, w2 = osz(h1, 4, 2, 1), osz(w1, 4, 2, 1)
    h3, w3 = osz(h2, 3, 1, 1), osz(w2, 3, 1, 1)
    lin_in = 64 * h3 * w3

    params["f1_w"], params["f1_b"] = lin_init(keys[6], keys[7], lin_in, 512)
    params["f2_w"], params["f2_b"] = lin_init(keys[8], keys[9], 512, 256)
    params["f3_w"], params["f3_b"] = lin_init(keys[10], keys[11], 256, num_actions)
    return params


# ----------------------------------------------------------------------------
# Pure-JAX reference (same bf16 operand / f32 accumulation policy as the kernel)
# ----------------------------------------------------------------------------
def qnetwork_reference(params, x):
    bf16, f32 = jnp.bfloat16, jnp.float32

    def conv(h, w, b, stride, pad):
        y = jax.lax.conv_general_dilated(
            h.astype(bf16), w.astype(bf16),
            window_strides=(stride, stride),
            padding=[(pad, pad), (pad, pad)],
            dimension_numbers=("NCHW", "OIHW", "NCHW"),
            preferred_element_type=f32)
        return jax.nn.relu(y + b.reshape(1, -1, 1, 1).astype(f32))

    def fc(h, w, b, relu):
        y = jnp.dot(h.astype(bf16), w.astype(bf16),
                    preferred_element_type=f32) + b
        return jax.nn.relu(y) if relu else y

    h = conv(x, params["c1_w"], params["c1_b"], 4, 2)
    h = conv(h, params["c2_w"], params["c2_b"], 2, 1)
    h = conv(h, params["c3_w"], params["c3_b"], 1, 1)
    h = h.reshape(h.shape[0], -1)                    # torch (c, h, w) flatten
    h = fc(h, params["f1_w"], params["f1_b"], True)
    h = fc(h, params["f2_w"], params["f2_b"], True)
    return fc(h, params["f3_w"], params["f3_b"], False)


if __name__ == "__main__":
    key = jax.random.PRNGKey(0)
    kp, kx = jax.random.split(key)

    input_shape = (4, 16, 16)     # (c, h, w)
    num_actions = 6
    batch = 2

    params = init_params(kp, input_shape, num_actions)
    x = jax.random.normal(kx, (batch,) + input_shape, jnp.float32)

    w_slab, b_slab, layout = pack_params(params, input_shape, num_actions)
    fwd = jax.jit(lambda ws, bs, xx: qnetwork_forward(ws, bs, layout, xx,
                                                      num_actions))
    out = jax.block_until_ready(fwd(w_slab, b_slab, x))

    ref = jax.block_until_ready(qnetwork_reference(params, x))
    assert out.shape == (batch, num_actions), out.shape
    assert jnp.allclose(out, ref, atol=5e-3, rtol=5e-3), \
        float(jnp.max(jnp.abs(out - ref)))
    print("KERNEL_OK")
</pallas_src>

<mosaic_0001>
module attributes {stable_mosaic.version = 11 : i64} {
  func.func @kernel(%arg0: memref<2x1024xbf16, #tpu.memory_space<vmem>>, %arg1: memref<2816x512xbf16, #tpu.memory_space<vmem>>, %arg2: memref<6x512xf32, #tpu.memory_space<vmem>>, %arg3: memref<2x128xf32, #tpu.memory_space<vmem>>) attributes {dimension_semantics = [], scalar_prefetch = 0 : i64, scratch_operands = 0 : i64, tpu.core_type = #tpu.core_type<tc>} {
    %c0 = arith.constant 0 : index
    %c0_0 = arith.constant 0 : index
    %0 = vector.load %arg0[%c0, %c0_0] : memref<2x1024xbf16, #tpu.memory_space<vmem>>, vector<2x1024xbf16>
    %c0_1 = arith.constant 0 : index
    %c0_2 = arith.constant 0 : index
    %1 = vector.load %arg1[%c0_1, %c0_2] : memref<2816x512xbf16, #tpu.memory_space<vmem>>, vector<1024x512xbf16>
    %cst = arith.constant dense<0.000000e+00> : vector<2x512xf32>
    %2 = tpu.matmul %0, %1, %cst {dimension_numbers = #tpu.dot_dimension_numbers<[1], [0], [0], [1], [0, 0, 1, 1], [], []>} : vector<2x1024xbf16>, vector<1024x512xbf16>, vector<2x512xf32> -> vector<2x512xf32>
    %c0_3 = arith.constant 0 : index
    %c0_4 = arith.constant 0 : index
    %3 = vector.load %arg2[%c0_3, %c0_4] : memref<6x512xf32, #tpu.memory_space<vmem>>, vector<1x512xf32>
    %4 = vector.broadcast %3 : vector<1x512xf32> to vector<2x512xf32>
    %5 = arith.addf %2, %4 : vector<2x512xf32>
    %cst_5 = arith.constant 0.000000e+00 : f32
    %6 = vector.broadcast %cst_5 : f32 to vector<2x512xf32>
    %7 = arith.maximumf %5, %6 : vector<2x512xf32>
    %8 = arith.truncf %7 : vector<2x512xf32> to vector<2x512xbf16>
    %c1024 = arith.constant 1024 : index
    %c0_6 = arith.constant 0 : index
    %9 = vector.load %arg1[%c1024, %c0_6] : memref<2816x512xbf16, #tpu.memory_space<vmem>>, vector<512x256xbf16>
    %cst_7 = arith.constant dense<0.000000e+00> : vector<2x256xf32>
    %10 = tpu.matmul %8, %9, %cst_7 {dimension_numbers = #tpu.dot_dimension_numbers<[1], [0], [0], [1], [0, 0, 1, 1], [], []>} : vector<2x512xbf16>, vector<512x256xbf16>, vector<2x256xf32> -> vector<2x256xf32>
    %c1 = arith.constant 1 : index
    %c0_8 = arith.constant 0 : index
    %11 = vector.load %arg2[%c1, %c0_8] : memref<6x512xf32, #tpu.memory_space<vmem>>, vector<1x256xf32>
    %12 = vector.broadcast %11 : vector<1x256xf32> to vector<2x256xf32>
    %13 = arith.addf %10, %12 : vector<2x256xf32>
    %cst_9 = arith.constant 0.000000e+00 : f32
    %14 = vector.broadcast %cst_9 : f32 to vector<2x256xf32>
    %15 = arith.maximumf %13, %14 : vector<2x256xf32>
    %16 = arith.truncf %15 : vector<2x256xf32> to vector<2x256xbf16>
    %c1536 = arith.constant 1536 : index
    %c0_10 = arith.constant 0 : index
    %17 = vector.load %arg1[%c1536, %c0_10] : memref<2816x512xbf16, #tpu.memory_space<vmem>>, vector<256x256xbf16>
    %cst_11 = arith.constant dense<0.000000e+00> : vector<2x256xf32>
    %18 = tpu.matmul %16, %17, %cst_11 {dimension_numbers = #tpu.dot_dimension_numbers<[1], [0], [0], [1], [0, 0, 1, 1], [], []>} : vector<2x256xbf16>, vector<256x256xbf16>, vector<2x256xf32> -> vector<2x256xf32>
    %c2 = arith.constant 2 : index
    %c0_12 = arith.constant 0 : index
    %19 = vector.load %arg2[%c2, %c0_12] : memref<6x512xf32, #tpu.memory_space<vmem>>, vector<1x256xf32>
    %20 = vector.broadcast %19 : vector<1x256xf32> to vector<2x256xf32>
    %21 = arith.addf %18, %20 : vector<2x256xf32>
    %cst_13 = arith.constant 0.000000e+00 : f32
    %22 = vector.broadcast %cst_13 : f32 to vector<2x256xf32>
    %23 = arith.maximumf %21, %22 : vector<2x256xf32>
    %24 = arith.truncf %23 : vector<2x256xf32> to vector<2x256xbf16>
    %c1792 = arith.constant 1792 : index
    %c0_14 = arith.constant 0 : index
    %25 = vector.load %arg1[%c1792, %c0_14] : memref<2816x512xbf16, #tpu.memory_space<vmem>>, vector<256x512xbf16>
    %cst_15 = arith.constant dense<0.000000e+00> : vector<2x512xf32>
    %26 = tpu.matmul %24, %25, %cst_15 {dimension_numbers = #tpu.dot_dimension_numbers<[1], [0], [0], [1], [0, 0, 1, 1], [], []>} : vector<2x256xbf16>, vector<256x512xbf16>, vector<2x512xf32> -> vector<2x512xf32>
    %c3 = arith.constant 3 : index
    %c0_16 = arith.constant 0 : index
    %27 = vector.load %arg2[%c3, %c0_16] : memref<6x512xf32, #tpu.memory_space<vmem>>, vector<1x512xf32>
    %28 = vector.broadcast %27 : vector<1x512xf32> to vector<2x512xf32>
    %29 = arith.addf %26, %28 : vector<2x512xf32>
    %cst_17 = arith.constant 0.000000e+00 : f32
    %30 = vector.broadcast %cst_17 : f32 to vector<2x512xf32>
    %31 = arith.maximumf %29, %30 : vector<2x512xf32>
    %32 = arith.truncf %31 : vector<2x512xf32> to vector<2x512xbf16>
    %c2048 = arith.constant 2048 : index
    %c0_18 = arith.constant 0 : index
    %33 = vector.load %arg1[%c2048, %c0_18] : memref<2816x512xbf16, #tpu.memory_space<vmem>>, vector<512x256xbf16>
    %cst_19 = arith.constant dense<0.000000e+00> : vector<2x256xf32>
    %34 = tpu.matmul %32, %33, %cst_19 {dimension_numbers = #tpu.dot_dimension_numbers<[1], [0], [0], [1], [0, 0, 1, 1], [], []>} : vector<2x512xbf16>, vector<512x256xbf16>, vector<2x256xf32> -> vector<2x256xf32>
    %c4 = arith.constant 4 : index
    %c0_20 = arith.constant 0 : index
    %35 = vector.load %arg2[%c4, %c0_20] : memref<6x512xf32, #tpu.memory_space<vmem>>, vector<1x256xf32>
    %36 = vector.broadcast %35 : vector<1x256xf32> to vector<2x256xf32>
    %37 = arith.addf %34, %36 : vector<2x256xf32>
    %cst_21 = arith.constant 0.000000e+00 : f32
    %38 = vector.broadcast %cst_21 : f32 to vector<2x256xf32>
    %39 = arith.maximumf %37, %38 : vector<2x256xf32>
    %40 = arith.truncf %39 : vector<2x256xf32> to vector<2x256xbf16>
    %c2560 = arith.constant 2560 : index
    %c0_22 = arith.constant 0 : index
    %41 = vector.load %arg1[%c2560, %c0_22] : memref<2816x512xbf16, #tpu.memory_space<vmem>>, vector<256x128xbf16>
    %cst_23 = arith.constant dense<0.000000e+00> : vector<2x128xf32>
    %42 = tpu.matmul %40, %41, %cst_23 {dimension_numbers = #tpu.dot_dimension_numbers<[1], [0], [0], [1], [0, 0, 1, 1], [], []>} : vector<2x256xbf16>, vector<256x128xbf16>, vector<2x128xf32> -> vector<2x128xf32>
    %c5 = arith.constant 5 : index
    %c0_24 = arith.constant 0 : index
    %43 = vector.load %arg2[%c5, %c0_24] : memref<6x512xf32, #tpu.memory_space<vmem>>, vector<1x128xf32>
    %44 = vector.broadcast %43 : vector<1x128xf32> to vector<2x128xf32>
    %45 = arith.addf %42, %44 : vector<2x128xf32>
    %c0_25 = arith.constant 0 : index
    %c0_26 = arith.constant 0 : index
    %46 = vector.load %arg3[%c0_25, %c0_26] : memref<2x128xf32, #tpu.memory_space<vmem>>, vector<2x128xf32>
    tpu.vector_store %arg3[%c0_25, %c0_26], %45 {strides = array<i32>} : memref<2x128xf32, #tpu.memory_space<vmem>>, vector<2x128xf32>,
    return
  }
}

</mosaic_0001>

<bundles_post_ra>
// kernel: _lambda_.1
= control target key start
LH: loop header
LB: loop body
LE: loop exit
PB: predicated region body
PF: predicated region fallthrough
CT: control target
= control target key end

     0   :  { %8 = vsyncpa [#allocation3], 0  ;;  %s6687_s0 = inlined_call_operand.vmem [shape: bf16[2,1024], index: 0, kind: input, shape index: {}]   ;;  %s6688_s1 = inlined_call_operand.hbm [shape: bf16[2816,512], index: 1, kind: input, shape index: {}]   ;;  %s6689_s2 = inlined_call_operand.hbm [shape: f32[6,512], index: 2, kind: input, shape index: {}]   ;;  %s6690_s3 = inlined_call_operand.hbm [shape: f32[2,128], index: 3, kind: output, shape index: {}]  }
   0x1   :  { %9 = vsyncpa [#allocation6], 0 }
   0x2   :  { %10 = vsyncpa [#allocation4], 0  ;;  %s17_s14 = sshll.u32 %s6688_s1, 4  ;;  %s6540_s15 = smov [#allocation2]   ;;  %s18_s14 = int_to_ptr.hbm [resolvable:$true] %s17_s14 }
   0x3   :  { %s19_s16 = sshll.u32 %s6540_s15, 4  ;;  %s31_s19 = sshll.u32 %s6689_s2, 4  ;;  %s20_s16 = int_to_ptr.vmem [resolvable:$true] %s19_s16  ;;  %s32_s19 = int_to_ptr.hbm [resolvable:$true] %s31_s19 }
   0x4   :  { %s6541_s20 = smov 256   ;;  %s6542_s21 = smov 16  }
   0x5   :  { %25 = dma.hbm_to_vmem [thread:$0]  %s18_s14, 90112, %s20_s16, [#allocation3], %s6541_s20, %s6541_s20, %s6542_s21  }
   0x6   :  { %s6543_s22 = smov [#allocation5]  }
   0x7   :  { %s33_s23 = sshll.u32 %s6543_s22, 4  ;;  %s34_s23 = int_to_ptr.vmem [resolvable:$true] %s33_s23 }
   0x8   :  { %36 = dma.hbm_to_vmem [thread:$0]  %s32_s19, 512, %s34_s23, [#allocation6]  }
   0x9   :  { %6534 = dma.done.wait [#allocation3], 90112  }
   0xa   :  { %6535 = vsyncadd [#allocation3], 4294877184 }
   0xb   :  { %6536 = dma.done.wait [#allocation6], 512  }
   0xc   :  { %6537 = vsyncadd [#allocation6], 4294966784  ;;  %v4082_v0 = vld [vmem:[#allocation2 + $0xe0] sm:$0xf]  ;;  %v5982_v1 = vld [vmem:[#allocation2 + $0xec] sm:$0xf0] }
   0xd   :  { %v4210_v2 = vld [vmem:[#allocation2 + $0x1e0] sm:$0xf]  ;;  %v4083_v3 = vor.u32 %v5982_v1, %v4082_v0  ;;  %v6014_v4 = vld [vmem:[#allocation2 + $0x1ec] sm:$0xf0]  ;;  %s3957_s27 = sshll.u32 %s6690_s3, 4  ;;  %s3958_s27 = int_to_ptr.hbm [resolvable:$true] %s3957_s27 }
   0xe   :  { %v4338_v5 = vld [vmem:[#allocation2 + $0x2e0] sm:$0xf]  ;;  %v6046_v6 = vld [vmem:[#allocation2 + $0x2ec] sm:$0xf0]  ;;  %v4211_v7 = vor.u32 %v6014_v4, %v4210_v2 }
   0xf   :  { %v4339_v8 = vor.u32 %v6046_v6, %v4338_v5  ;;  %v4466_v9 = vld [vmem:[#allocation2 + $0x3e0] sm:$0xf]  ;;  %v6078_v10 = vld [vmem:[#allocation2 + $0x3ec] sm:$0xf0]  ;;  %1610 = vmatpush.bf16.msra.mxu0 %v4083_v3 }
  0x10   :  { %v4066_v11 = vld [vmem:[#allocation2 + $0xc0] sm:$0xf]  ;;  %v4467_v12 = vor.u32 %v6078_v10, %v4466_v9  ;;  %v5978_v13 = vld [vmem:[#allocation2 + $0xcc] sm:$0xf0]  ;;  %1623 = vmatpush.bf16.msra.mxu1 %v4211_v7 }
  0x11   :  { %v4194_v14 = vld [vmem:[#allocation2 + $0x1c0] sm:$0xf]  ;;  %v6010_v15 = vld [vmem:[#allocation2 + $0x1cc] sm:$0xf0]  ;;  %1636 = vmatpush.bf16.msra.mxu2 %v4339_v8  ;;  %v4067_v16 = vor.u32 %v5978_v13, %v4066_v11 }
  0x12   :  { %v4195_v17 = vor.u32 %v6010_v15, %v4194_v14  ;;  %v4322_v18 = vld [vmem:[#allocation2 + $0x2c0] sm:$0xf]  ;;  %v6042_v19 = vld [vmem:[#allocation2 + $0x2cc] sm:$0xf0]  ;;  %1649 = vmatpush.bf16.msra.mxu3 %v4467_v12 }
  0x13   :  { %v4450_v20 = vld [vmem:[#allocation2 + $0x3c0] sm:$0xf]  ;;  %v4323_v21 = vor.u32 %v6042_v19, %v4322_v18  ;;  %v6074_v22 = vld [vmem:[#allocation2 + $0x3cc] sm:$0xf0]  ;;  %1611 = vmatpush.bf16.msra.mxu0 %v4067_v16 }
  0x14   :  { %v4050_v23 = vld [vmem:[#allocation2 + $0xa0] sm:$0xf]  ;;  %v5974_v24 = vld [vmem:[#allocation2 + $0xac] sm:$0xf0]  ;;  %v4451_v25 = vor.u32 %v6074_v22, %v4450_v20  ;;  %1624 = vmatpush.bf16.msra.mxu1 %v4195_v17 }
  0x15   :  { %v4178_v26 = vld [vmem:[#allocation2 + $0x1a0] sm:$0xf]  ;;  %v6006_v27 = vld [vmem:[#allocation2 + $0x1ac] sm:$0xf0]  ;;  %v4051_v29 = vor.u32 %v5974_v24, %v4050_v23  ;;  %1637 = vmatpush.bf16.msra.mxu2 %v4323_v21 }
  0x16   :  { %v4306_v28 = vld [vmem:[#allocation2 + $0x2a0] sm:$0xf]  ;;  %v6038_v30 = vld [vmem:[#allocation2 + $0x2ac] sm:$0xf0]  ;;  %v4179_v33 = vor.u32 %v6006_v27, %v4178_v26  ;;  %1650 = vmatpush.bf16.msra.mxu3 %v4451_v25 }
  0x17   :  { %v4434_v31 = vld [vmem:[#allocation2 + $0x3a0] sm:$0xf]  ;;  %v6070_v32 = vld [vmem:[#allocation2 + $0x3ac] sm:$0xf0]  ;;  %v4307_v34 = vor.u32 %v6038_v30, %v4306_v28  ;;  %1612 = vmatpush.bf16.msra.mxu0 %v4051_v29 }
  0x18   :  { %v4034_v35 = vld [vmem:[#allocation2 + $0x80] sm:$0xf]  ;;  %v5970_v36 = vld [vmem:[#allocation2 + $0x8c] sm:$0xf0]  ;;  %v4435_v38 = vor.u32 %v6070_v32, %v4434_v31  ;;  %1625 = vmatpush.bf16.msra.mxu1 %v4179_v33 }
  0x19   :  { %v4162_v37 = vld [vmem:[#allocation2 + $0x180] sm:$0xf]  ;;  %v6002_v39 = vld [vmem:[#allocation2 + $0x18c] sm:$0xf0]  ;;  %v4035_v44 = vor.u32 %v5970_v36, %v4034_v35  ;;  %1638 = vmatpush.bf16.msra.mxu2 %v4307_v34 }
  0x1a   :  { %v4290_v40 = vld [vmem:[#allocation2 + $0x280] sm:$0xf]  ;;  %v6034_v41 = vld [vmem:[#allocation2 + $0x28c] sm:$0xf0]  ;;  %v4163_v45 = vor.u32 %v6002_v39, %v4162_v37  ;;  %1651 = vmatpush.bf16.msra.mxu3 %v4435_v38 }
  0x1b   :  { %v4418_v42 = vld [vmem:[#allocation2 + $0x380] sm:$0xf]  ;;  %v6066_v43 = vld [vmem:[#allocation2 + $0x38c] sm:$0xf0]  ;;  %v4291_v46 = vor.u32 %v6034_v41, %v4290_v40  ;;  %1613 = vmatpush.bf16.msra.mxu0 %v4035_v44 }
  0x1c   :  { %v4018_v47 = vld [vmem:[#allocation2 + $0x60] sm:$0xf]  ;;  %v5966_v48 = vld [vmem:[#allocation2 + $0x6c] sm:$0xf0]  ;;  %v4419_v50 = vor.u32 %v6066_v43, %v4418_v42  ;;  %1626 = vmatpush.bf16.msra.mxu1 %v4163_v45 }
  0x1d   :  { %v4146_v49 = vld [vmem:[#allocation2 + $0x160] sm:$0xf]  ;;  %v5998_v51 = vld [vmem:[#allocation2 + $0x16c] sm:$0xf0]  ;;  %v4019_v56 = vor.u32 %v5966_v48, %v4018_v47  ;;  %1639 = vmatpush.bf16.msra.mxu2 %v4291_v46 }
  0x1e   :  { %v4274_v52 = vld [vmem:[#allocation2 + $0x260] sm:$0xf]  ;;  %v6030_v53 = vld [vmem:[#allocation2 + $0x26c] sm:$0xf0]  ;;  %v4147_v57 = vor.u32 %v5998_v51, %v4146_v49  ;;  %1652 = vmatpush.bf16.msra.mxu3 %v4419_v50 }
  0x1f   :  { %v4402_v54 = vld [vmem:[#allocation2 + $0x360] sm:$0xf]  ;;  %v6062_v55 = vld [vmem:[#allocation2 + $0x36c] sm:$0xf0]  ;;  %v4275_v58 = vor.u32 %v6030_v53, %v4274_v52  ;;  %1614 = vmatpush.bf16.msra.mxu0 %v4019_v56 }
  0x20   :  { %v4002_v59 = vld [vmem:[#allocation2 + $0x40] sm:$0xf]  ;;  %v5962_v60 = vld [vmem:[#allocation2 + $0x4c] sm:$0xf0]  ;;  %v4403_v62 = vor.u32 %v6062_v55, %v4402_v54  ;;  %1627 = vmatpush.bf16.msra.mxu1 %v4147_v57 }
  0x21   :  { %v4130_v61 = vld [vmem:[#allocation2 + $0x140] sm:$0xf]  ;;  %v5994_v63 = vld [vmem:[#allocation2 + $0x14c] sm:$0xf0]  ;;  %v4003_v4 = vor.u32 %v5962_v60, %v4002_v59  ;;  %1640 = vmatpush.bf16.msra.mxu2 %v4275_v58 }
  0x22   :  { %v4258_v0 = vld [vmem:[#allocation2 + $0x240] sm:$0xf]  ;;  %v6026_v1 = vld [vmem:[#allocation2 + $0x24c] sm:$0xf0]  ;;  %v4131_v5 = vor.u32 %v5994_v63, %v4130_v61  ;;  %1653 = vmatpush.bf16.msra.mxu3 %v4403_v62 }
  0x23   :  { %v4386_v2 = vld [vmem:[#allocation2 + $0x340] sm:$0xf]  ;;  %v6058_v3 = vld [vmem:[#allocation2 + $0x34c] sm:$0xf0]  ;;  %v4259_v6 = vor.u32 %v6026_v1, %v4258_v0  ;;  %1615 = vmatpush.bf16.msra.mxu0 %v4003_v4 }
  0x24   :  { %v3986_v7 = vld [vmem:[#allocation2 + $0x20] sm:$0xf]  ;;  %v5958_v8 = vld [vmem:[#allocation2 + $0x2c] sm:$0xf0]  ;;  %v4387_v10 = vor.u32 %v6058_v3, %v4386_v2  ;;  %1628 = vmatpush.bf16.msra.mxu1 %v4131_v5  ;;  %v45_v2 = vld [vmem:[%s6687_s0] sm:$0xff]  ;;  %s6544_s0 = smov [#allocation7]  }
  0x25   :  { %v4114_v9 = vld [vmem:[#allocation2 + $0x120] sm:$0xf]  ;;  %v5990_v11 = vld [vmem:[#allocation2 + $0x12c] sm:$0xf0]  ;;  %v3987_v16 = vor.u32 %v5958_v8, %v3986_v7  ;;  %1641 = vmatpush.bf16.msra.mxu2 %v4259_v6  ;;  %313 = vst [vmem:[#allocation1] ss:$9 sm:$0xff] %v45_v2 }
  0x26   :  { %v4242_v12 = vld [vmem:[#allocation2 + $0x220] sm:$0xf]  ;;  %v6022_v13 = vld [vmem:[#allocation2 + $0x22c] sm:$0xf0]  ;;  %v4115_v19 = vor.u32 %v5990_v11, %v4114_v9  ;;  %1654 = vmatpush.bf16.msra.mxu3 %v4387_v10  ;;  %v4084_v2 = vld [vmem:[#allocation2 + $0xf0] sm:$0xf0] }
  0x27   :  { %v4370_v14 = vld [vmem:[#allocation2 + $0x320] sm:$0xf]  ;;  %v6054_v15 = vld [vmem:[#allocation2 + $0x32c] sm:$0xf0]  ;;  %v4243_v20 = vor.u32 %v6022_v13, %v4242_v12  ;;  %1616 = vmatpush.bf16.msra.mxu0 %v3987_v16  ;;  %s3955_s24 = sshll.u32 %s6544_s0, 4  ;;  %s3956_s24 = int_to_ptr.vmem [resolvable:$true] %s3955_s24 }
  0x28   :  { %v3970_v17 = vld [vmem:[#allocation2] sm:$0xf]  ;;  %v5954_v18 = vld [vmem:[#allocation2 + $0xc] sm:$0xf0]  ;;  %v4371_v24 = vor.u32 %v6054_v15, %v4370_v14  ;;  %1629 = vmatpush.bf16.msra.mxu1 %v4115_v19 }
  0x29   :  { %v4098_v21 = vld [vmem:[#allocation2 + $0x100] sm:$0xf]  ;;  %v5986_v22 = vld [vmem:[#allocation2 + $0x10c] sm:$0xf0]  ;;  %v3971_v31 = vor.u32 %v5954_v18, %v3970_v17  ;;  %1642 = vmatpush.bf16.msra.mxu2 %v4243_v20 }
  0x2a   :  { %v4226_v23 = vld [vmem:[#allocation2 + $0x200] sm:$0xf]  ;;  %v6018_v25 = vld [vmem:[#allocation2 + $0x20c] sm:$0xf0]  ;;  %v4099_v35 = vor.u32 %v5986_v22, %v4098_v21  ;;  %1655 = vmatpush.bf16.msra.mxu3 %v4371_v24 }
  0x2b   :  { %v4354_v26 = vld [vmem:[#allocation2 + $0x300] sm:$0xf]  ;;  %v6050_v27 = vld [vmem:[#allocation2 + $0x30c] sm:$0xf0]  ;;  %v4227_v36 = vor.u32 %v6018_v25, %v4226_v23  ;;  %1617 = vmatpush.bf16.msra.mxu0 %v3971_v31 }
  0x2c   :  { %v4594_v28 = vld [vmem:[#allocation2 + $0x4e0] sm:$0xf]  ;;  %v6110_v29 = vld [vmem:[#allocation2 + $0x4ec] sm:$0xf0]  ;;  %v4355_v39 = vor.u32 %v6050_v27, %v4354_v26  ;;  %1630 = vmatpush.bf16.msra.mxu1 %v4099_v35 }
  0x2d   :  { %v4722_v30 = vld [vmem:[#allocation2 + $0x5e0] sm:$0xf]  ;;  %v6142_v32 = vld [vmem:[#allocation2 + $0x5ec] sm:$0xf0]  ;;  %v4595_v40 = vor.u32 %v6110_v29, %v4594_v28  ;;  %1643 = vmatpush.bf16.msra.mxu2 %v4227_v36  ;;  %v6576_v28 = vld [vmem:[#allocation1] sm:$0xff] }
  0x2e   :  { %v4850_v33 = vld [vmem:[#allocation2 + $0x6e0] sm:$0xf]  ;;  %v6174_v34 = vld [vmem:[#allocation2 + $0x6ec] sm:$0xf0]  ;;  %v4723_v41 = vor.u32 %v6142_v32, %v4722_v30  ;;  %1656 = vmatpush.bf16.msra.mxu3 %v4355_v39  ;;  %1618 = vmatmul.bf16.vlgmr.msra.gmra.mxu0 %v6576_v28 }
  0x2f   :  { %v4978_v37 = vld [vmem:[#allocation2 + $0x7e0] sm:$0xf]  ;;  %v6206_v38 = vld [vmem:[#allocation2 + $0x7ec] sm:$0xf0]  ;;  %v4851_v42 = vor.u32 %v6174_v34, %v4850_v33  ;;  %1662 = vmatpush.bf16.msrb.mxu0 %v4595_v40 }
  0x30   :  { %v4578_v43 = vld [vmem:[#allocation2 + $0x4c0] sm:$0xf]  ;;  %v6106_v44 = vld [vmem:[#allocation2 + $0x4cc] sm:$0xf0]  ;;  %v4979_v46 = vor.u32 %v6206_v38, %v4978_v37  ;;  %1675 = vmatpush.bf16.msrb.mxu1 %v4723_v41 }
  0x31   :  { %v4706_v45 = vld [vmem:[#allocation2 + $0x5c0] sm:$0xf]  ;;  %v6138_v47 = vld [vmem:[#allocation2 + $0x5cc] sm:$0xf0]  ;;  %v4579_v52 = vor.u32 %v6106_v44, %v4578_v43  ;;  %1688 = vmatpush.bf16.msrb.mxu2 %v4851_v42 }
  0x32   :  { %v4834_v48 = vld [vmem:[#allocation2 + $0x6c0] sm:$0xf]  ;;  %v6170_v49 = vld [vmem:[#allocation2 + $0x6cc] sm:$0xf0]  ;;  %v4707_v53 = vor.u32 %v6138_v47, %v4706_v45  ;;  %1701 = vmatpush.bf16.msrb.mxu3 %v4979_v46 }
  0x33   :  { %v4962_v50 = vld [vmem:[#allocation2 + $0x7c0] sm:$0xf]  ;;  %v6202_v51 = vld [vmem:[#allocation2 + $0x7cc] sm:$0xf0]  ;;  %v4835_v54 = vor.u32 %v6170_v49, %v4834_v48  ;;  %1663 = vmatpush.bf16.msrb.mxu0 %v4579_v52 }
  0x34   :  { %v4562_v55 = vld [vmem:[#allocation2 + $0x4a0] sm:$0xf]  ;;  %v6102_v56 = vld [vmem:[#allocation2 + $0x4ac] sm:$0xf0]  ;;  %v4963_v58 = vor.u32 %v6202_v51, %v4962_v50  ;;  %1676 = vmatpush.bf16.msrb.mxu1 %v4707_v53 }
  0x35   :  { %v4690_v57 = vld [vmem:[#allocation2 + $0x5a0] sm:$0xf]  ;;  %v6134_v59 = vld [vmem:[#allocation2 + $0x5ac] sm:$0xf0]  ;;  %v4563_v0 = vor.u32 %v6102_v56, %v4562_v55  ;;  %1689 = vmatpush.bf16.msrb.mxu2 %v4835_v54 }
  0x36   :  { %v4818_v60 = vld [vmem:[#allocation2 + $0x6a0] sm:$0xf]  ;;  %v6166_v61 = vld [vmem:[#allocation2 + $0x6ac] sm:$0xf0]  ;;  %v4691_v3 = vor.u32 %v6134_v59, %v4690_v57  ;;  %1702 = vmatpush.bf16.msrb.mxu3 %v4963_v58 }
  0x37   :  { %v4946_v62 = vld [vmem:[#allocation2 + $0x7a0] sm:$0xf]  ;;  %v6198_v63 = vld [vmem:[#allocation2 + $0x7ac] sm:$0xf0]  ;;  %v4819_v4 = vor.u32 %v6166_v61, %v4818_v60  ;;  %1664 = vmatpush.bf16.msrb.mxu0 %v4563_v0 }
  0x38   :  { %v4546_v1 = vld [vmem:[#allocation2 + $0x480] sm:$0xf]  ;;  %v6098_v5 = vld [vmem:[#allocation2 + $0x48c] sm:$0xf0]  ;;  %v4947_v7 = vor.u32 %v6198_v63, %v4946_v62  ;;  %1677 = vmatpush.bf16.msrb.mxu1 %v4691_v3  ;;  %v6012_v3 = vld [vmem:[#allocation2 + $0x1e4] sm:$0xf] }
  0x39   :  { %v4674_v6 = vld [vmem:[#allocation2 + $0x580] sm:$0xf]  ;;  %v6130_v8 = vld [vmem:[#allocation2 + $0x58c] sm:$0xf0]  ;;  %v4547_v13 = vor.u32 %v6098_v5, %v4546_v1  ;;  %1690 = vmatpush.bf16.msrb.mxu2 %v4819_v4  ;;  %v5980_v1 = vld [vmem:[#allocation2 + $0xe4] sm:$0xf] }
  0x3a   :  { %v4802_v9 = vld [vmem:[#allocation2 + $0x680] sm:$0xf]  ;;  %v6162_v10 = vld [vmem:[#allocation2 + $0x68c] sm:$0xf0]  ;;  %v4675_v14 = vor.u32 %v6130_v8, %v4674_v6  ;;  %1703 = vmatpush.bf16.msrb.mxu3 %v4947_v7  ;;  %v4212_v5 = vld [vmem:[#allocation2 + $0x1f0] sm:$0xf0] }
  0x3b   :  { %v4930_v11 = vld [vmem:[#allocation2 + $0x780] sm:$0xf]  ;;  %v6194_v12 = vld [vmem:[#allocation2 + $0x78c] sm:$0xf0]  ;;  %v4803_v15 = vor.u32 %v6162_v10, %v4802_v9  ;;  %1665 = vmatpush.bf16.msrb.mxu0 %v4547_v13  ;;  %v6044_v6 = vld [vmem:[#allocation2 + $0x2e4] sm:$0xf]  ;;  %v4087_v13 = vor.u32 %v5980_v1, %v4084_v2 }
  0x3c   :  { %v4530_v16 = vld [vmem:[#allocation2 + $0x460] sm:$0xf]  ;;  %v6094_v17 = vld [vmem:[#allocation2 + $0x46c] sm:$0xf0]  ;;  %v4931_v19 = vor.u32 %v6194_v12, %v4930_v11  ;;  %1678 = vmatpush.bf16.msrb.mxu1 %v4675_v14  ;;  %v4340_v7 = vld [vmem:[#allocation2 + $0x2f0] sm:$0xf0]  ;;  %v4215_v14 = vor.u32 %v6012_v3, %v4212_v5 }
  0x3d   :  { %v4658_v18 = vld [vmem:[#allocation2 + $0x560] sm:$0xf]  ;;  %v6126_v20 = vld [vmem:[#allocation2 + $0x56c] sm:$0xf0]  ;;  %v4531_v26 = vor.u32 %v6094_v17, %v4530_v16  ;;  %1691 = vmatpush.bf16.msrb.mxu2 %v4803_v15  ;;  %v6076_v10 = vld [vmem:[#allocation2 + $0x3e4] sm:$0xf]  ;;  %v4343_v15 = vor.u32 %v6044_v6, %v4340_v7 }
  0x3e   :  { %v4786_v21 = vld [vmem:[#allocation2 + $0x660] sm:$0xf]  ;;  %v6158_v22 = vld [vmem:[#allocation2 + $0x66c] sm:$0xf0]  ;;  %v4659_v30 = vor.u32 %v6126_v20, %v4658_v18  ;;  %1704 = vmatpush.bf16.msrb.mxu3 %v4931_v19  ;;  %v4468_v11 = vld [vmem:[#allocation2 + $0x3f0] sm:$0xf0] }
  0x3f   :  { %v4914_v23 = vld [vmem:[#allocation2 + $0x760] sm:$0xf]  ;;  %v6190_v24 = vld [vmem:[#allocation2 + $0x76c] sm:$0xf0]  ;;  %v4787_v31 = vor.u32 %v6158_v22, %v4786_v21  ;;  %1666 = vmatpush.bf16.msrb.mxu0 %v4531_v26  ;;  %v5976_v16 = vld [vmem:[#allocation2 + $0xc4] sm:$0xf]  ;;  %v4471_v19 = vor.u32 %v6076_v10, %v4468_v11 }
  0x40   :  { %v4514_v25 = vld [vmem:[#allocation2 + $0x440] sm:$0xf]  ;;  %v6574_v27 = vld [vmem:[#allocation1 + $0x12] sm:$0xff]  ;;  %v6578_v29 = vld [vmem:[#allocation1 + $0x1b] sm:$0xff]  ;;  %v4915_v35 = vor.u32 %v6190_v24, %v4914_v23  ;;  %1679 = vmatpush.bf16.msrb.mxu1 %v4659_v30 }
  0x41   :  { %v6090_v32 = vld [vmem:[#allocation2 + $0x44c] sm:$0xf0]  ;;  %v4642_v33 = vld [vmem:[#allocation2 + $0x540] sm:$0xf]  ;;  %1644 = vmatmul.bf16.vlgmr.msra.gmra.mxu2 %v6574_v27  ;;  %1657 = vmatmul.bf16.vlgmr.msra.gmra.mxu3 %v6578_v29  ;;  %v4068_v17 = vld [vmem:[#allocation2 + $0xd0] sm:$0xf0] }
  0x42   :  { %v6580_v34 = vld [vmem:[#allocation1 + $0x9] sm:$0xff]  ;;  %v6122_v36 = vld [vmem:[#allocation2 + $0x54c] sm:$0xf0]  ;;  %v4515_v41 = vor.u32 %v6090_v32, %v4514_v25  ;;  %1692 = vmatpush.bf16.msrb.mxu2 %v4787_v31  ;;  %1705 = vmatpush.bf16.msrb.mxu3 %v4915_v35  ;;  %v4196_v20 = vld [vmem:[#allocation2 + $0x1d0] sm:$0xf0]  ;;  %v4071_v26 = vor.u32 %v5976_v16, %v4068_v17 }
  0x43   :  { %v4770_v37 = vld [vmem:[#allocation2 + $0x640] sm:$0xf]  ;;  %v6154_v38 = vld [vmem:[#allocation2 + $0x64c] sm:$0xf0]  ;;  %1631 = vmatmul.bf16.vlgmr.msra.gmra.mxu1 %v6580_v34  ;;  %v4643_v42 = vor.u32 %v6122_v36, %v4642_v33  ;;  %v6008_v18 = vld [vmem:[#allocation2 + $0x1c4] sm:$0xf] }
  0x44   :  { %v4898_v39 = vld [vmem:[#allocation2 + $0x740] sm:$0xf]  ;;  %v6186_v40 = vld [vmem:[#allocation2 + $0x74c] sm:$0xf0]  ;;  %v4771_v43 = vor.u32 %v6154_v38, %v4770_v37  ;;  %1667 = vmatpush.bf16.msrb.mxu0 %v4515_v41  ;;  %v6040_v21 = vld [vmem:[#allocation2 + $0x2c4] sm:$0xf]  ;;  %v4199_v33 = vor.u32 %v6008_v18, %v4196_v20 }
  0x45   :  { %v4498_v44 = vld [vmem:[#allocation2 + $0x420] sm:$0xf]  ;;  %v6086_v45 = vld [vmem:[#allocation2 + $0x42c] sm:$0xf0]  ;;  %v4899_v47 = vor.u32 %v6186_v40, %v4898_v39  ;;  %1680 = vmatpush.bf16.msrb.mxu1 %v4643_v42  ;;  %v4324_v22 = vld [vmem:[#allocation2 + $0x2d0] sm:$0xf0] }
  0x46   :  { %v4626_v46 = vld [vmem:[#allocation2 + $0x520] sm:$0xf]  ;;  %v6118_v48 = vld [vmem:[#allocation2 + $0x52c] sm:$0xf0]  ;;  %v4499_v53 = vor.u32 %v6086_v45, %v4498_v44  ;;  %1693 = vmatpush.bf16.msrb.mxu2 %v4771_v43  ;;  %v6072_v23 = vld [vmem:[#allocation2 + $0x3c4] sm:$0xf]  ;;  %v4327_v35 = vor.u32 %v6040_v21, %v4324_v22 }
  0x47   :  { %v4754_v49 = vld [vmem:[#allocation2 + $0x620] sm:$0xf]  ;;  %v6150_v50 = vld [vmem:[#allocation2 + $0x62c] sm:$0xf0]  ;;  %v4627_v56 = vor.u32 %v6118_v48, %v4626_v46  ;;  %1706 = vmatpush.bf16.msrb.mxu3 %v4899_v47  ;;  %v4452_v24 = vld [vmem:[#allocation2 + $0x3d0] sm:$0xf0] }
  0x48   :  { %v4882_v51 = vld [vmem:[#allocation2 + $0x720] sm:$0xf]  ;;  %v6182_v52 = vld [vmem:[#allocation2 + $0x72c] sm:$0xf0]  ;;  %v4755_v57 = vor.u32 %v6150_v50, %v4754_v49  ;;  %1668 = vmatpush.bf16.msrb.mxu0 %v4499_v53  ;;  %v5972_v30 = vld [vmem:[#allocation2 + $0xa4] sm:$0xf]  ;;  %v4455_v39 = vor.u32 %v6072_v23, %v4452_v24 }
  0x49   :  { %v4482_v54 = vld [vmem:[#allocation2 + $0x400] sm:$0xf]  ;;  %v6082_v55 = vld [vmem:[#allocation2 + $0x40c] sm:$0xf0]  ;;  %v4883_v61 = vor.u32 %v6182_v52, %v4882_v51  ;;  %1681 = vmatpush.bf16.msrb.mxu1 %v4627_v56  ;;  %v6590_v32 = vld [vmem:[#allocation1 + $0x3f] sm:$0xff] }
  0x4a   :  { %v4610_v58 = vld [vmem:[#allocation2 + $0x500] sm:$0xf]  ;;  %v6114_v59 = vld [vmem:[#allocation2 + $0x50c] sm:$0xf0]  ;;  %v4483_v4 = vor.u32 %v6082_v55, %v4482_v54  ;;  %1694 = vmatpush.bf16.msrb.mxu2 %v4755_v57  ;;  %v4052_v36 = vld [vmem:[#allocation2 + $0xb0] sm:$0xf0] }
  0x4b   :  { %v4738_v60 = vld [vmem:[#allocation2 + $0x600] sm:$0xf]  ;;  %v6146_v62 = vld [vmem:[#allocation2 + $0x60c] sm:$0xf0]  ;;  %v4611_v8 = vor.u32 %v6114_v59, %v4610_v58  ;;  %1707 = vmatpush.bf16.msrb.mxu3 %v4883_v61  ;;  %v6004_v37 = vld [vmem:[#allocation2 + $0x1a4] sm:$0xf]  ;;  %v4055_v45 = vor.u32 %v5972_v30, %v4052_v36 }
  0x4c   :  { %v4866_v63 = vld [vmem:[#allocation2 + $0x700] sm:$0xf]  ;;  %v6178_v0 = vld [vmem:[#allocation2 + $0x70c] sm:$0xf0]  ;;  %v4739_v9 = vor.u32 %v6146_v62, %v4738_v60  ;;  %1669 = vmatpush.bf16.msrb.mxu0 %v4483_v4  ;;  %v6592_v38 = vld [vmem:[#allocation1 + $0x2d] sm:$0xff] }
  0x4d   :  { %v4867_v12 = vor.u32 %v6178_v0, %v4866_v63  ;;  %1682 = vmatpush.bf16.msrb.mxu1 %v4611_v8  ;;  %v6586_v25 = vld [vmem:[#allocation1 + $0x36] sm:$0xff]  ;;  %v6588_v31 = vld [vmem:[#allocation1 + $0x24] sm:$0xff]  ;;  %v6036_v41 = vld [vmem:[#allocation2 + $0x2a4] sm:$0xf] }
  0x4e   :  { %1695 = vmatpush.bf16.msrb.mxu2 %v4739_v9  ;;  %v4180_v40 = vld [vmem:[#allocation2 + $0x1b0] sm:$0xf0]  ;;  %v6068_v43 = vld [vmem:[#allocation2 + $0x3a4] sm:$0xf] }
  0x4f   :  { %1708 = vmatpush.bf16.msrb.mxu3 %v4867_v12  ;;  %v4308_v42 = vld [vmem:[#allocation2 + $0x2b0] sm:$0xf0]  ;;  %1670 = vmatmul.bf16.vlgmr.msrb.gmra.mxu0 %v6588_v31  ;;  %v4183_v46 = vor.u32 %v6004_v37, %v4180_v40  ;;  %v5968_v48 = vld [vmem:[#allocation2 + $0x84] sm:$0xf] }
  0x50   :  { %1714 = vmatpush.bf16.msra.mxu0 %v4087_v13  ;;  %v4436_v44 = vld [vmem:[#allocation2 + $0x3b0] sm:$0xf0]  ;;  %v4311_v47 = vor.u32 %v6036_v41, %v4308_v42  ;;  %v6000_v50 = vld [vmem:[#allocation2 + $0x184] sm:$0xf] }
  0x51   :  { %1727 = vmatpush.bf16.msra.mxu1 %v4215_v14  ;;  %1696 = vmatmul.bf16.vlgmr.msrb.gmra.mxu2 %v6586_v25  ;;  %v4036_v49 = vld [vmem:[#allocation2 + $0x90] sm:$0xf0]  ;;  %v4439_v51 = vor.u32 %v6068_v43, %v4436_v44  ;;  %v6032_v53 = vld [vmem:[#allocation2 + $0x284] sm:$0xf] }
  0x52   :  { %1740 = vmatpush.bf16.msra.mxu2 %v4343_v15  ;;  %1709 = vmatmul.bf16.vlgmr.msrb.gmra.mxu3 %v6590_v32  ;;  %v4164_v52 = vld [vmem:[#allocation2 + $0x190] sm:$0xf0]  ;;  %v6064_v55 = vld [vmem:[#allocation2 + $0x384] sm:$0xf]  ;;  %v4039_v57 = vor.u32 %v5968_v48, %v4036_v49 }
  0x53   :  { %1753 = vmatpush.bf16.msra.mxu3 %v4471_v19  ;;  %1683 = vmatmul.bf16.vlgmr.msrb.gmra.mxu1 %v6592_v38  ;;  %v4292_v54 = vld [vmem:[#allocation2 + $0x290] sm:$0xf0]  ;;  %v4167_v58 = vor.u32 %v6000_v50, %v4164_v52  ;;  %v5964_v60 = vld [vmem:[#allocation2 + $0x64] sm:$0xf] }
  0x54   :  { %1715 = vmatpush.bf16.msra.mxu0 %v4071_v26  ;;  %v4420_v56 = vld [vmem:[#allocation2 + $0x390] sm:$0xf0]  ;;  %v4295_v59 = vor.u32 %v6032_v53, %v4292_v54  ;;  %v5996_v62 = vld [vmem:[#allocation2 + $0x164] sm:$0xf] }
  0x55   :  { %1728 = vmatpush.bf16.msra.mxu1 %v4199_v33  ;;  %v4020_v61 = vld [vmem:[#allocation2 + $0x70] sm:$0xf0]  ;;  %v4423_v63 = vor.u32 %v6064_v55, %v4420_v56  ;;  %v6028_v1 = vld [vmem:[#allocation2 + $0x264] sm:$0xf] }
  0x56   :  { %1741 = vmatpush.bf16.msra.mxu2 %v4327_v35  ;;  %v4148_v0 = vld [vmem:[#allocation2 + $0x170] sm:$0xf0]  ;;  %v6060_v3 = vld [vmem:[#allocation2 + $0x364] sm:$0xf]  ;;  %v4023_v5 = vor.u32 %v5964_v60, %v4020_v61 }
  0x57   :  { %1754 = vmatpush.bf16.msra.mxu3 %v4455_v39  ;;  %v4276_v2 = vld [vmem:[#allocation2 + $0x270] sm:$0xf0]  ;;  %v4151_v6 = vor.u32 %v5996_v62, %v4148_v0  ;;  %v5960_v8 = vld [vmem:[#allocation2 + $0x44] sm:$0xf] }
  0x58   :  { %1716 = vmatpush.bf16.msra.mxu0 %v4055_v45  ;;  %v4404_v4 = vld [vmem:[#allocation2 + $0x370] sm:$0xf0]  ;;  %v4279_v7 = vor.u32 %v6028_v1, %v4276_v2  ;;  %v5992_v10 = vld [vmem:[#allocation2 + $0x144] sm:$0xf] }
  0x59   :  { %1729 = vmatpush.bf16.msra.mxu1 %v4183_v46  ;;  %v4004_v9 = vld [vmem:[#allocation2 + $0x50] sm:$0xf0]  ;;  %v4407_v11 = vor.u32 %v6060_v3, %v4404_v4  ;;  %v6024_v13 = vld [vmem:[#allocation2 + $0x244] sm:$0xf] }
  0x5a   :  { %1742 = vmatpush.bf16.msra.mxu2 %v4311_v47  ;;  %v4132_v12 = vld [vmem:[#allocation2 + $0x150] sm:$0xf0]  ;;  %v6056_v15 = vld [vmem:[#allocation2 + $0x344] sm:$0xf]  ;;  %v4007_v17 = vor.u32 %v5960_v8, %v4004_v9 }
  0x5b   :  { %1755 = vmatpush.bf16.msra.mxu3 %v4439_v51  ;;  %v4260_v14 = vld [vmem:[#allocation2 + $0x250] sm:$0xf0]  ;;  %v4135_v18 = vor.u32 %v5992_v10, %v4132_v12  ;;  %v5956_v20 = vld [vmem:[#allocation2 + $0x24] sm:$0xf] }
  0x5c   :  { %1717 = vmatpush.bf16.msra.mxu0 %v4039_v57  ;;  %v4388_v16 = vld [vmem:[#allocation2 + $0x350] sm:$0xf0]  ;;  %v4263_v19 = vor.u32 %v6024_v13, %v4260_v14  ;;  %v5988_v22 = vld [vmem:[#allocation2 + $0x124] sm:$0xf] }
  0x5d   :  { %1730 = vmatpush.bf16.msra.mxu1 %v4167_v58  ;;  %v3988_v21 = vld [vmem:[#allocation2 + $0x30] sm:$0xf0]  ;;  %v4391_v23 = vor.u32 %v6056_v15, %v4388_v16  ;;  %v6020_v26 = vld [vmem:[#allocation2 + $0x224] sm:$0xf] }
  0x5e   :  { %1743 = vmatpush.bf16.msra.mxu2 %v4295_v59  ;;  %v4116_v24 = vld [vmem:[#allocation2 + $0x130] sm:$0xf0]  ;;  %v6052_v33 = vld [vmem:[#allocation2 + $0x324] sm:$0xf]  ;;  %v3991_v36 = vor.u32 %v5956_v20, %v3988_v21 }
  0x5f   :  { %1756 = vmatpush.bf16.msra.mxu3 %v4423_v63  ;;  %v4244_v30 = vld [vmem:[#allocation2 + $0x230] sm:$0xf0]  ;;  %v5952_v37 = vld [vmem:[#allocation2 + $0x4] sm:$0xf]  ;;  %v4119_v40 = vor.u32 %v5988_v22, %v4116_v24 }
  0x60   :  { %1718 = vmatpush.bf16.msra.mxu0 %v4023_v5  ;;  %v4372_v35 = vld [vmem:[#allocation2 + $0x330] sm:$0xf0]  ;;  %v4247_v41 = vor.u32 %v6020_v26, %v4244_v30  ;;  %v5984_v42 = vld [vmem:[#allocation2 + $0x104] sm:$0xf] }
  0x61   :  { %1731 = vmatpush.bf16.msra.mxu1 %v4151_v6  ;;  %v3972_v39 = vld [vmem:[#allocation2 + $0x10] sm:$0xf0]  ;;  %v6016_v44 = vld [vmem:[#allocation2 + $0x204] sm:$0xf]  ;;  %v4375_v45 = vor.u32 %v6052_v33, %v4372_v35 }
  0x62   :  { %1744 = vmatpush.bf16.msra.mxu2 %v4279_v7  ;;  %v4100_v43 = vld [vmem:[#allocation2 + $0x110] sm:$0xf0]  ;;  %v6048_v47 = vld [vmem:[#allocation2 + $0x304] sm:$0xf]  ;;  %v3975_v52 = vor.u32 %v5952_v37, %v3972_v39 }
  0x63   :  { %1757 = vmatpush.bf16.msra.mxu3 %v4407_v11  ;;  %v4228_v46 = vld [vmem:[#allocation2 + $0x210] sm:$0xf0]  ;;  %v6108_v49 = vld [vmem:[#allocation2 + $0x4e4] sm:$0xf]  ;;  %v4103_v56 = vor.u32 %v5984_v42, %v4100_v43 }
  0x64   :  { %1719 = vmatpush.bf16.msra.mxu0 %v4007_v17  ;;  %v4356_v48 = vld [vmem:[#allocation2 + $0x310] sm:$0xf0]  ;;  %v6140_v51 = vld [vmem:[#allocation2 + $0x5e4] sm:$0xf]  ;;  %v4231_v57 = vor.u32 %v6016_v44, %v4228_v46 }
  0x65   :  { %1732 = vmatpush.bf16.msra.mxu1 %v4135_v18  ;;  %v4596_v50 = vld [vmem:[#allocation2 + $0x4f0] sm:$0xf0]  ;;  %v6172_v54 = vld [vmem:[#allocation2 + $0x6e4] sm:$0xf]  ;;  %v4359_v60 = vor.u32 %v6048_v47, %v4356_v48 }
  0x66   :  { %1745 = vmatpush.bf16.msra.mxu2 %v4263_v19  ;;  %v4724_v53 = vld [vmem:[#allocation2 + $0x5f0] sm:$0xf0]  ;;  %v6204_v58 = vld [vmem:[#allocation2 + $0x7e4] sm:$0xf]  ;;  %v4599_v61 = vor.u32 %v6108_v49, %v4596_v50 }
  0x67   :  { %1758 = vmatpush.bf16.msra.mxu3 %v4391_v23  ;;  %v4852_v55 = vld [vmem:[#allocation2 + $0x6f0] sm:$0xf0]  ;;  %v4727_v62 = vor.u32 %v6140_v51, %v4724_v53  ;;  %v6104_v0 = vld [vmem:[#allocation2 + $0x4c4] sm:$0xf] }
  0x68   :  { %1720 = vmatpush.bf16.msra.mxu0 %v3991_v36  ;;  %v4980_v59 = vld [vmem:[#allocation2 + $0x7f0] sm:$0xf0]  ;;  %v4855_v63 = vor.u32 %v6172_v54, %v4852_v55  ;;  %v6136_v2 = vld [vmem:[#allocation2 + $0x5c4] sm:$0xf] }
  0x69   :  { %1733 = vmatpush.bf16.msra.mxu1 %v4119_v40  ;;  %v4580_v1 = vld [vmem:[#allocation2 + $0x4d0] sm:$0xf0]  ;;  %v4983_v3 = vor.u32 %v6204_v58, %v4980_v59  ;;  %v6168_v5 = vld [vmem:[#allocation2 + $0x6c4] sm:$0xf] }
  0x6a   :  { %1746 = vmatpush.bf16.msra.mxu2 %v4247_v41  ;;  %v4708_v4 = vld [vmem:[#allocation2 + $0x5d0] sm:$0xf0]  ;;  %v6200_v7 = vld [vmem:[#allocation2 + $0x7c4] sm:$0xf]  ;;  %v4583_v9 = vor.u32 %v6104_v0, %v4580_v1 }
  0x6b   :  { %1759 = vmatpush.bf16.msra.mxu3 %v4375_v45  ;;  %v4836_v6 = vld [vmem:[#allocation2 + $0x6d0] sm:$0xf0]  ;;  %v4711_v10 = vor.u32 %v6136_v2, %v4708_v4  ;;  %v6100_v12 = vld [vmem:[#allocation2 + $0x4a4] sm:$0xf] }
  0x6c   :  { %1721 = vmatpush.bf16.msra.mxu0 %v3975_v52  ;;  %v4964_v8 = vld [vmem:[#allocation2 + $0x7d0] sm:$0xf0]  ;;  %v4839_v11 = vor.u32 %v6168_v5, %v4836_v6  ;;  %v6132_v14 = vld [vmem:[#allocation2 + $0x5a4] sm:$0xf] }
  0x6d   :  { %1734 = vmatpush.bf16.msra.mxu1 %v4103_v56  ;;  %v4564_v13 = vld [vmem:[#allocation2 + $0x4b0] sm:$0xf0]  ;;  %v4967_v15 = vor.u32 %v6200_v7, %v4964_v8  ;;  %v6164_v17 = vld [vmem:[#allocation2 + $0x6a4] sm:$0xf] }
  0x6e   :  { %1747 = vmatpush.bf16.msra.mxu2 %v4231_v57  ;;  %v4692_v16 = vld [vmem:[#allocation2 + $0x5b0] sm:$0xf0]  ;;  %v6196_v19 = vld [vmem:[#allocation2 + $0x7a4] sm:$0xf]  ;;  %v4567_v21 = vor.u32 %v6100_v12, %v4564_v13 }
  0x6f   :  { %1760 = vmatpush.bf16.msra.mxu3 %v4359_v60  ;;  %v4820_v18 = vld [vmem:[#allocation2 + $0x6b0] sm:$0xf0]  ;;  %1722 = vmatmul.bf16.vlgmr.msra.gmra.mxu0 %v6576_v28  ;;  %v4695_v22 = vor.u32 %v6132_v14, %v4692_v16  ;;  %v6096_v24 = vld [vmem:[#allocation2 + $0x484] sm:$0xf] }
  0x70   :  { %1766 = vmatpush.bf16.msrb.mxu0 %v4599_v61  ;;  %v4948_v20 = vld [vmem:[#allocation2 + $0x7b0] sm:$0xf0]  ;;  %1735 = vmatmul.bf16.vlgmr.msra.gmra.mxu1 %v6580_v34  ;;  %v4823_v23 = vor.u32 %v6164_v17, %v4820_v18  ;;  %v6128_v30 = vld [vmem:[#allocation2 + $0x584] sm:$0xf] }
  0x71   :  { %1779 = vmatpush.bf16.msrb.mxu1 %v4727_v62  ;;  %1748 = vmatmul.bf16.vlgmr.msra.gmra.mxu2 %v6574_v27  ;;  %v4548_v26 = vld [vmem:[#allocation2 + $0x490] sm:$0xf0]  ;;  %v4951_v33 = vor.u32 %v6196_v19, %v4948_v20  ;;  %v6160_v36 = vld [vmem:[#allocation2 + $0x684] sm:$0xf] }
  0x72   :  { %1792 = vmatpush.bf16.msrb.mxu2 %v4855_v63  ;;  %1761 = vmatmul.bf16.vlgmr.msra.gmra.mxu3 %v6578_v29  ;;  %v4676_v35 = vld [vmem:[#allocation2 + $0x590] sm:$0xf0]  ;;  %v6192_v39 = vld [vmem:[#allocation2 + $0x784] sm:$0xf]  ;;  %v4551_v41 = vor.u32 %v6096_v24, %v4548_v26  ;;  %v4090_v26 = vld [vmem:[#allocation2 + $0xe8] sm:$0xf] }
  0x73   :  { %1805 = vmatpush.bf16.msrb.mxu3 %v4983_v3  ;;  %v4804_v37 = vld [vmem:[#allocation2 + $0x690] sm:$0xf0]  ;;  %v4679_v42 = vor.u32 %v6128_v30, %v4676_v35  ;;  %v6092_v44 = vld [vmem:[#allocation2 + $0x464] sm:$0xf]  ;;  %v5983_v30 = vld [vmem:[#allocation2 + $0xf4] sm:$0xf0] }
  0x74   :  { %1767 = vmatpush.bf16.msrb.mxu0 %v4583_v9  ;;  %v4932_v40 = vld [vmem:[#allocation2 + $0x790] sm:$0xf0]  ;;  %v4807_v43 = vor.u32 %v6160_v36, %v4804_v37  ;;  %v6124_v46 = vld [vmem:[#allocation2 + $0x564] sm:$0xf]  ;;  %v6015_v36 = vld [vmem:[#allocation2 + $0x1f4] sm:$0xf0] }
  0x75   :  { %1780 = vmatpush.bf16.msrb.mxu1 %v4711_v10  ;;  %v4532_v45 = vld [vmem:[#allocation2 + $0x470] sm:$0xf0]  ;;  %v4935_v47 = vor.u32 %v6192_v39, %v4932_v40  ;;  %v6156_v49 = vld [vmem:[#allocation2 + $0x664] sm:$0xf]  ;;  %v4346_v37 = vld [vmem:[#allocation2 + $0x2e8] sm:$0xf] }
  0x76   :  { %1793 = vmatpush.bf16.msrb.mxu2 %v4839_v11  ;;  %v4660_v48 = vld [vmem:[#allocation2 + $0x570] sm:$0xf0]  ;;  %v6188_v51 = vld [vmem:[#allocation2 + $0x764] sm:$0xf]  ;;  %v4535_v53 = vor.u32 %v6092_v44, %v4532_v45  ;;  %v6047_v39 = vld [vmem:[#allocation2 + $0x2f4] sm:$0xf0]  ;;  %v4091_v45 = vor.u32 %v5983_v30, %v4090_v26 }
  0x77   :  { %1806 = vmatpush.bf16.msrb.mxu3 %v4967_v15  ;;  %v4788_v50 = vld [vmem:[#allocation2 + $0x670] sm:$0xf0]  ;;  %v4663_v54 = vor.u32 %v6124_v46, %v4660_v48  ;;  %v6088_v56 = vld [vmem:[#allocation2 + $0x444] sm:$0xf]  ;;  %v4074_v48 = vld [vmem:[#allocation2 + $0xc8] sm:$0xf] }
  0x78   :  { %1768 = vmatpush.bf16.msrb.mxu0 %v4567_v21  ;;  %v4916_v52 = vld [vmem:[#allocation2 + $0x770] sm:$0xf0]  ;;  %v4791_v55 = vor.u32 %v6156_v49, %v4788_v50  ;;  %v6120_v58 = vld [vmem:[#allocation2 + $0x544] sm:$0xf]  ;;  %v5979_v49 = vld [vmem:[#allocation2 + $0xd4] sm:$0xf0] }
  0x79   :  { %1781 = vmatpush.bf16.msrb.mxu1 %v4695_v22  ;;  %v4516_v57 = vld [vmem:[#allocation2 + $0x450] sm:$0xf0]  ;;  %v4919_v59 = vor.u32 %v6188_v51, %v4916_v52  ;;  %v6152_v61 = vld [vmem:[#allocation2 + $0x644] sm:$0xf]  ;;  %v4202_v50 = vld [vmem:[#allocation2 + $0x1c8] sm:$0xf] }
  0x7a   :  { %1794 = vmatpush.bf16.msrb.mxu2 %v4823_v23  ;;  %v4644_v60 = vld [vmem:[#allocation2 + $0x550] sm:$0xf0]  ;;  %v6184_v63 = vld [vmem:[#allocation2 + $0x744] sm:$0xf]  ;;  %v4519_v1 = vor.u32 %v6088_v56, %v4516_v57  ;;  %v6011_v52 = vld [vmem:[#allocation2 + $0x1d4] sm:$0xf0]  ;;  %v4075_v57 = vor.u32 %v5979_v49, %v4074_v48 }
  0x7b   :  { %1807 = vmatpush.bf16.msrb.mxu3 %v4951_v33  ;;  %v4772_v62 = vld [vmem:[#allocation2 + $0x650] sm:$0xf0]  ;;  %v4647_v2 = vor.u32 %v6120_v58, %v4644_v60  ;;  %v6084_v4 = vld [vmem:[#allocation2 + $0x424] sm:$0xf]  ;;  %v4218_v33 = vld [vmem:[#allocation2 + $0x1e8] sm:$0xf]  ;;  %v4203_v58 = vor.u32 %v6011_v52, %v4202_v50 }
  0x7c   :  { %1769 = vmatpush.bf16.msrb.mxu0 %v4551_v41  ;;  %v4900_v0 = vld [vmem:[#allocation2 + $0x750] sm:$0xf0]  ;;  %v4775_v3 = vor.u32 %v6152_v61, %v4772_v62  ;;  %v6116_v6 = vld [vmem:[#allocation2 + $0x524] sm:$0xf]  ;;  %v4219_v46 = vor.u32 %v6015_v36, %v4218_v33  ;;  %v6075_v56 = vld [vmem:[#allocation2 + $0x3d4] sm:$0xf0] }
  0x7d   :  { %1782 = vmatpush.bf16.msrb.mxu1 %v4679_v42  ;;  %v4500_v5 = vld [vmem:[#allocation2 + $0x430] sm:$0xf0]  ;;  %v4903_v7 = vor.u32 %v6184_v63, %v4900_v0  ;;  %v6148_v9 = vld [vmem:[#allocation2 + $0x624] sm:$0xf]  ;;  %v4474_v42 = vld [vmem:[#allocation2 + $0x3e8] sm:$0xf] }
  0x7e   :  { %1795 = vmatpush.bf16.msrb.mxu2 %v4807_v43  ;;  %v4628_v8 = vld [vmem:[#allocation2 + $0x530] sm:$0xf0]  ;;  %v6180_v11 = vld [vmem:[#allocation2 + $0x724] sm:$0xf]  ;;  %v4503_v13 = vor.u32 %v6084_v4, %v4500_v5  ;;  %v6079_v43 = vld [vmem:[#allocation2 + $0x3f4] sm:$0xf0] }
  0x7f   :  { %1808 = vmatpush.bf16.msrb.mxu3 %v4935_v47  ;;  %v4756_v10 = vld [vmem:[#allocation2 + $0x630] sm:$0xf0]  ;;  %v6080_v14 = vld [vmem:[#allocation2 + $0x404] sm:$0xf]  ;;  %v4631_v16 = vor.u32 %v6116_v6, %v4628_v8  ;;  %v4347_v47 = vor.u32 %v6047_v39, %v4346_v37  ;;  %v4475_v51 = vor.u32 %v6079_v43, %v4474_v42  ;;  %v4058_v60 = vld [vmem:[#allocation2 + $0xa8] sm:$0xf] }
  0x80   :  { %1770 = vmatpush.bf16.msrb.mxu0 %v4535_v53  ;;  %v4884_v12 = vld [vmem:[#allocation2 + $0x730] sm:$0xf0]  ;;  %v4759_v17 = vor.u32 %v6148_v9, %v4756_v10  ;;  %v6112_v18 = vld [vmem:[#allocation2 + $0x504] sm:$0xf]  ;;  %v4330_v53 = vld [vmem:[#allocation2 + $0x2c8] sm:$0xf] }
  0x81   :  { %1783 = vmatpush.bf16.msrb.mxu1 %v4663_v54  ;;  %v4484_v15 = vld [vmem:[#allocation2 + $0x410] sm:$0xf0]  ;;  %v6144_v20 = vld [vmem:[#allocation2 + $0x604] sm:$0xf]  ;;  %v4887_v21 = vor.u32 %v6180_v11, %v4884_v12  ;;  %v6043_v54 = vld [vmem:[#allocation2 + $0x2d4] sm:$0xf0] }
  0x82   :  { %1796 = vmatpush.bf16.msrb.mxu2 %v4791_v55  ;;  %v4612_v19 = vld [vmem:[#allocation2 + $0x510] sm:$0xf0]  ;;  %v6176_v23 = vld [vmem:[#allocation2 + $0x704] sm:$0xf]  ;;  %v4487_v35 = vor.u32 %v6080_v14, %v4484_v15  ;;  %v4458_v55 = vld [vmem:[#allocation2 + $0x3c8] sm:$0xf] }
  0x83   :  { %1809 = vmatpush.bf16.msrb.mxu3 %v4919_v59  ;;  %v4740_v22 = vld [vmem:[#allocation2 + $0x610] sm:$0xf0]  ;;  %v4615_v40 = vor.u32 %v6112_v18, %v4612_v19  ;;  %v4331_v59 = vor.u32 %v6043_v54, %v4330_v53  ;;  %v5975_v61 = vld [vmem:[#allocation2 + $0xb4] sm:$0xf0]  ;;  %v4186_v62 = vld [vmem:[#allocation2 + $0x1a8] sm:$0xf]  ;;  %v4459_v63 = vor.u32 %v6075_v56, %v4458_v55 }
  0x84   :  { %1771 = vmatpush.bf16.msrb.mxu0 %v4519_v1  ;;  %v4868_v24 = vld [vmem:[#allocation2 + $0x710] sm:$0xf0]  ;;  %v4743_v41 = vor.u32 %v6144_v20, %v4740_v22  ;;  %v6007_v0 = vld [vmem:[#allocation2 + $0x1b4] sm:$0xf0]  ;;  %v4314_v1 = vld [vmem:[#allocation2 + $0x2a8] sm:$0xf]  ;;  %v4059_v5 = vor.u32 %v5975_v61, %v4058_v60 }
  0x85   :  { %1784 = vmatpush.bf16.msrb.mxu1 %v4647_v2  ;;  %v4871_v44 = vor.u32 %v6176_v23, %v4868_v24  ;;  %v6039_v2 = vld [vmem:[#allocation2 + $0x2b4] sm:$0xf0]  ;;  %v4187_v6 = vor.u32 %v6007_v0, %v4186_v62  ;;  %v4042_v8 = vld [vmem:[#allocation2 + $0x88] sm:$0xf] }
  0x86   :  { %1797 = vmatpush.bf16.msrb.mxu2 %v4775_v3  ;;  %v4442_v3 = vld [vmem:[#allocation2 + $0x3a8] sm:$0xf]  ;;  %v6071_v4 = vld [vmem:[#allocation2 + $0x3b4] sm:$0xf0] }
  0x87   :  { %1810 = vmatpush.bf16.msrb.mxu3 %v4903_v7  ;;  %v4315_v7 = vor.u32 %v6039_v2, %v4314_v1  ;;  %v5971_v9 = vld [vmem:[#allocation2 + $0x94] sm:$0xf0]  ;;  %v4443_v10 = vor.u32 %v6071_v4, %v4442_v3  ;;  %v4298_v12 = vld [vmem:[#allocation2 + $0x288] sm:$0xf] }
  0x88   :  { %1772 = vmatpush.bf16.msrb.mxu0 %v4503_v13  ;;  %v6003_v11 = vld [vmem:[#allocation2 + $0x194] sm:$0xf0]  ;;  %v4426_v14 = vld [vmem:[#allocation2 + $0x388] sm:$0xf] }
  0x89   :  { %1785 = vmatpush.bf16.msrb.mxu1 %v4631_v16  ;;  %v6035_v13 = vld [vmem:[#allocation2 + $0x294] sm:$0xf0]  ;;  %v4026_v16 = vld [vmem:[#allocation2 + $0x68] sm:$0xf] }
  0x8a   :  { %1798 = vmatpush.bf16.msrb.mxu2 %v4759_v17  ;;  %v5967_v17 = vld [vmem:[#allocation2 + $0x74] sm:$0xf0]  ;;  %v4154_v18 = vld [vmem:[#allocation2 + $0x168] sm:$0xf] }
  0x8b   :  { %1811 = vmatpush.bf16.msrb.mxu3 %v4887_v21  ;;  %v5999_v20 = vld [vmem:[#allocation2 + $0x174] sm:$0xf0]  ;;  %v4282_v21 = vld [vmem:[#allocation2 + $0x268] sm:$0xf]  ;;  %v4027_v26 = vor.u32 %v5967_v17, %v4026_v16 }
  0x8c   :  { %1773 = vmatpush.bf16.msrb.mxu0 %v4487_v35  ;;  %v6031_v22 = vld [vmem:[#allocation2 + $0x274] sm:$0xf0]  ;;  %v4410_v23 = vld [vmem:[#allocation2 + $0x368] sm:$0xf]  ;;  %v4155_v30 = vor.u32 %v5999_v20, %v4154_v18 }
  0x8d   :  { %1786 = vmatpush.bf16.msrb.mxu1 %v4615_v40  ;;  %v6063_v24 = vld [vmem:[#allocation2 + $0x374] sm:$0xf0]  ;;  %v4283_v33 = vor.u32 %v6031_v22, %v4282_v21  ;;  %v4010_v35 = vld [vmem:[#allocation2 + $0x48] sm:$0xf] }
  0x8e   :  { %1799 = vmatpush.bf16.msrb.mxu2 %v4743_v41  ;;  %v5963_v36 = vld [vmem:[#allocation2 + $0x54] sm:$0xf0]  ;;  %v4138_v37 = vld [vmem:[#allocation2 + $0x148] sm:$0xf]  ;;  %v4411_v39 = vor.u32 %v6063_v24, %v4410_v23 }
  0x8f   :  { %1812 = vmatpush.bf16.msrb.mxu3 %v4871_v44  ;;  %1774 = vmatmul.bf16.vlgmr.msrb.gmra.mxu0 %v6588_v31  ;;  %v6067_v31 = vld [vmem:[#allocation2 + $0x394] sm:$0xf0]  ;;  %v4266_v41 = vld [vmem:[#allocation2 + $0x248] sm:$0xf] }
  0x90   :  { %1818 = vmatpush.bf16.msra.mxu0 %v4091_v45  ;;  %1787 = vmatmul.bf16.vlgmr.msrb.gmra.mxu1 %v6592_v38  ;;  %v4299_v38 = vor.u32 %v6035_v13, %v4298_v12  ;;  %v4427_v19 = vor.u32 %v6067_v31, %v4426_v14  ;;  %v5995_v40 = vld [vmem:[#allocation2 + $0x154] sm:$0xf0]  ;;  %v4394_v43 = vld [vmem:[#allocation2 + $0x348] sm:$0xf]  ;;  %v4011_v45 = vor.u32 %v5963_v36, %v4010_v35 }
  0x91   :  { %1831 = vmatpush.bf16.msra.mxu1 %v4219_v46  ;;  %1800 = vmatmul.bf16.vlgmr.msrb.gmra.mxu2 %v6586_v25  ;;  %v4170_v25 = vld [vmem:[#allocation2 + $0x188] sm:$0xf]  ;;  %v6027_v42 = vld [vmem:[#allocation2 + $0x254] sm:$0xf0]  ;;  %v4139_v46 = vor.u32 %v5995_v40, %v4138_v37 }
  0x92   :  { %1844 = vmatpush.bf16.msra.mxu2 %v4347_v47  ;;  %1813 = vmatmul.bf16.vlgmr.msrb.gmra.mxu3 %v6590_v32  ;;  %v4043_v32 = vor.u32 %v5971_v9, %v4042_v8  ;;  %v4171_v15 = vor.u32 %v6003_v11, %v4170_v25  ;;  %v6059_v44 = vld [vmem:[#allocation2 + $0x354] sm:$0xf0]  ;;  %v4267_v47 = vor.u32 %v6027_v42, %v4266_v41  ;;  %v3994_v48 = vld [vmem:[#allocation2 + $0x28] sm:$0xf] }
  0x93   :  { %1857 = vmatpush.bf16.msra.mxu3 %v4475_v51  ;;  %v5959_v49 = vld [vmem:[#allocation2 + $0x34] sm:$0xf0]  ;;  %v4122_v50 = vld [vmem:[#allocation2 + $0x128] sm:$0xf]  ;;  %v4395_v51 = vor.u32 %v6059_v44, %v4394_v43 }
  0x94   :  { %1819 = vmatpush.bf16.msra.mxu0 %v4075_v57  ;;  %v5991_v52 = vld [vmem:[#allocation2 + $0x134] sm:$0xf0]  ;;  %v4250_v53 = vld [vmem:[#allocation2 + $0x228] sm:$0xf]  ;;  %v3995_v57 = vor.u32 %v5959_v49, %v3994_v48 }
  0x95   :  { %1832 = vmatpush.bf16.msra.mxu1 %v4203_v58  ;;  %v6023_v54 = vld [vmem:[#allocation2 + $0x234] sm:$0xf0]  ;;  %v4378_v55 = vld [vmem:[#allocation2 + $0x328] sm:$0xf]  ;;  %v4123_v60 = vor.u32 %v5991_v52, %v4122_v50 }
  0x96   :  { %1845 = vmatpush.bf16.msra.mxu2 %v4331_v59  ;;  %v6055_v56 = vld [vmem:[#allocation2 + $0x334] sm:$0xf0]  ;;  %v3978_v58 = vld [vmem:[#allocation2 + $0x8] sm:$0xf]  ;;  %v4251_v61 = vor.u32 %v6023_v54, %v4250_v53 }
  0x97   :  { %1858 = vmatpush.bf16.msra.mxu3 %v4459_v63  ;;  %v5955_v59 = vld [vmem:[#allocation2 + $0x14] sm:$0xf0]  ;;  %v4106_v62 = vld [vmem:[#allocation2 + $0x108] sm:$0xf]  ;;  %v4379_v1 = vor.u32 %v6055_v56, %v4378_v55 }
  0x98   :  { %1820 = vmatpush.bf16.msra.mxu0 %v4059_v5  ;;  %v5987_v63 = vld [vmem:[#allocation2 + $0x114] sm:$0xf0]  ;;  %v4234_v0 = vld [vmem:[#allocation2 + $0x208] sm:$0xf]  ;;  %v3979_v8 = vor.u32 %v5955_v59, %v3978_v58 }
  0x99   :  { %1833 = vmatpush.bf16.msra.mxu1 %v4187_v6  ;;  %v6019_v2 = vld [vmem:[#allocation2 + $0x214] sm:$0xf0]  ;;  %v4362_v3 = vld [vmem:[#allocation2 + $0x308] sm:$0xf]  ;;  %v4107_v11 = vor.u32 %v5987_v63, %v4106_v62 }
  0x9a   :  { %1846 = vmatpush.bf16.msra.mxu2 %v4315_v7  ;;  %v6051_v4 = vld [vmem:[#allocation2 + $0x314] sm:$0xf0]  ;;  %v4602_v5 = vld [vmem:[#allocation2 + $0x4e8] sm:$0xf]  ;;  %v4235_v12 = vor.u32 %v6019_v2, %v4234_v0 }
  0x9b   :  { %1859 = vmatpush.bf16.msra.mxu3 %v4443_v10  ;;  %v6111_v6 = vld [vmem:[#allocation2 + $0x4f4] sm:$0xf0]  ;;  %v4730_v7 = vld [vmem:[#allocation2 + $0x5e8] sm:$0xf]  ;;  %v4363_v31 = vor.u32 %v6051_v4, %v4362_v3 }
  0x9c   :  { %1821 = vmatpush.bf16.msra.mxu0 %v4043_v32  ;;  %v6143_v9 = vld [vmem:[#allocation2 + $0x5f4] sm:$0xf0]  ;;  %v4858_v25 = vld [vmem:[#allocation2 + $0x6e8] sm:$0xf]  ;;  %v4603_v32 = vor.u32 %v6111_v6, %v4602_v5 }
  0x9d   :  { %1834 = vmatpush.bf16.msra.mxu1 %v4171_v15  ;;  %v6175_v10 = vld [vmem:[#allocation2 + $0x6f4] sm:$0xf0]  ;;  %v4986_v13 = vld [vmem:[#allocation2 + $0x7e8] sm:$0xf]  ;;  %v4731_v15 = vor.u32 %v6143_v9, %v4730_v7 }
  0x9e   :  { %1847 = vmatpush.bf16.msra.mxu2 %v4299_v38  ;;  %v6207_v14 = vld [vmem:[#allocation2 + $0x7f4] sm:$0xf0]  ;;  %v4859_v38 = vor.u32 %v6175_v10, %v4858_v25  ;;  %v4586_v16 = vld [vmem:[#allocation2 + $0x4c8] sm:$0xf] }
  0x9f   :  { %1860 = vmatpush.bf16.msra.mxu3 %v4427_v19  ;;  %v6107_v17 = vld [vmem:[#allocation2 + $0x4d4] sm:$0xf0]  ;;  %v4714_v18 = vld [vmem:[#allocation2 + $0x5c8] sm:$0xf]  ;;  %v4987_v19 = vor.u32 %v6207_v14, %v4986_v13 }
  0xa0   :  { %1822 = vmatpush.bf16.msra.mxu0 %v4027_v26  ;;  %v6139_v20 = vld [vmem:[#allocation2 + $0x5d4] sm:$0xf0]  ;;  %v4842_v21 = vld [vmem:[#allocation2 + $0x6c8] sm:$0xf]  ;;  %v4587_v26 = vor.u32 %v6107_v17, %v4586_v16 }
  0xa1   :  { %1835 = vmatpush.bf16.msra.mxu1 %v4155_v30  ;;  %v6171_v22 = vld [vmem:[#allocation2 + $0x6d4] sm:$0xf0]  ;;  %v4970_v23 = vld [vmem:[#allocation2 + $0x7c8] sm:$0xf]  ;;  %v4715_v30 = vor.u32 %v6139_v20, %v4714_v18 }
  0xa2   :  { %1848 = vmatpush.bf16.msra.mxu2 %v4283_v33  ;;  %v6203_v24 = vld [vmem:[#allocation2 + $0x7d4] sm:$0xf0]  ;;  %v4843_v33 = vor.u32 %v6171_v22, %v4842_v21  ;;  %v4570_v35 = vld [vmem:[#allocation2 + $0x4a8] sm:$0xf] }
  0xa3   :  { %1861 = vmatpush.bf16.msra.mxu3 %v4411_v39  ;;  %v6103_v36 = vld [vmem:[#allocation2 + $0x4b4] sm:$0xf0]  ;;  %v4698_v37 = vld [vmem:[#allocation2 + $0x5a8] sm:$0xf]  ;;  %v4971_v39 = vor.u32 %v6203_v24, %v4970_v23 }
  0xa4   :  { %1823 = vmatpush.bf16.msra.mxu0 %v4011_v45  ;;  %v6135_v40 = vld [vmem:[#allocation2 + $0x5b4] sm:$0xf0]  ;;  %v4826_v41 = vld [vmem:[#allocation2 + $0x6a8] sm:$0xf]  ;;  %v4571_v45 = vor.u32 %v6103_v36, %v4570_v35 }
  0xa5   :  { %1836 = vmatpush.bf16.msra.mxu1 %v4139_v46  ;;  %v6167_v42 = vld [vmem:[#allocation2 + $0x6b4] sm:$0xf0]  ;;  %v4954_v43 = vld [vmem:[#allocation2 + $0x7a8] sm:$0xf]  ;;  %v4699_v46 = vor.u32 %v6135_v40, %v4698_v37 }
  0xa6   :  { %1849 = vmatpush.bf16.msra.mxu2 %v4267_v47  ;;  %v6199_v44 = vld [vmem:[#allocation2 + $0x7b4] sm:$0xf0]  ;;  %v4827_v47 = vor.u32 %v6167_v42, %v4826_v41  ;;  %v4554_v48 = vld [vmem:[#allocation2 + $0x488] sm:$0xf] }
  0xa7   :  { %1862 = vmatpush.bf16.msra.mxu3 %v4395_v51  ;;  %v6099_v49 = vld [vmem:[#allocation2 + $0x494] sm:$0xf0]  ;;  %v4682_v50 = vld [vmem:[#allocation2 + $0x588] sm:$0xf]  ;;  %v4955_v51 = vor.u32 %v6199_v44, %v4954_v43 }
  0xa8   :  { %1824 = vmatpush.bf16.msra.mxu0 %v3995_v57  ;;  %v4810_v52 = vld [vmem:[#allocation2 + $0x688] sm:$0xf]  ;;  %v6163_v53 = vld [vmem:[#allocation2 + $0x694] sm:$0xf0] }
  0xa9   :  { %1837 = vmatpush.bf16.msra.mxu1 %v4123_v60  ;;  %v4938_v54 = vld [vmem:[#allocation2 + $0x788] sm:$0xf]  ;;  %v6095_v57 = vld [vmem:[#allocation2 + $0x474] sm:$0xf0] }
  0xaa   :  { %1850 = vmatpush.bf16.msra.mxu2 %v4251_v61  ;;  %v4538_v56 = vld [vmem:[#allocation2 + $0x468] sm:$0xf]  ;;  %v6127_v60 = vld [vmem:[#allocation2 + $0x574] sm:$0xf0] }
  0xab   :  { %1863 = vmatpush.bf16.msra.mxu3 %v4379_v1  ;;  %v4666_v58 = vld [vmem:[#allocation2 + $0x568] sm:$0xf]  ;;  %v6159_v62 = vld [vmem:[#allocation2 + $0x674] sm:$0xf0]  ;;  %v4539_v1 = vor.u32 %v6095_v57, %v4538_v56 }
  0xac   :  { %1825 = vmatpush.bf16.msra.mxu0 %v3979_v8  ;;  %v4794_v61 = vld [vmem:[#allocation2 + $0x668] sm:$0xf]  ;;  %v6191_v0 = vld [vmem:[#allocation2 + $0x774] sm:$0xf0]  ;;  %v4667_v4 = vor.u32 %v6127_v60, %v4666_v58 }
  0xad   :  { %1838 = vmatpush.bf16.msra.mxu1 %v4107_v11  ;;  %v4922_v63 = vld [vmem:[#allocation2 + $0x768] sm:$0xf]  ;;  %v6091_v3 = vld [vmem:[#allocation2 + $0x454] sm:$0xf0]  ;;  %v4795_v5 = vor.u32 %v6159_v62, %v4794_v61  ;;  %v5977_v61 = vld [vmem:[#allocation2 + $0xcc] sm:$0xf] }
  0xae   :  { %1851 = vmatpush.bf16.msra.mxu2 %v4235_v12  ;;  %v4522_v2 = vld [vmem:[#allocation2 + $0x448] sm:$0xf]  ;;  %v6123_v7 = vld [vmem:[#allocation2 + $0x554] sm:$0xf0]  ;;  %v4923_v9 = vor.u32 %v6191_v0, %v4922_v63  ;;  %v4076_v62 = vld [vmem:[#allocation2 + $0xd8] sm:$0xf0] }
  0xaf   :  { %1864 = vmatpush.bf16.msra.mxu3 %v4363_v31  ;;  %1826 = vmatmul.bf16.vlgmr.msra.gmra.mxu0 %v6576_v28  ;;  %v6195_v28 = vld [vmem:[#allocation2 + $0x794] sm:$0xf0]  ;;  %v4650_v6 = vld [vmem:[#allocation2 + $0x548] sm:$0xf]  ;;  %v4523_v13 = vor.u32 %v6091_v3, %v4522_v2  ;;  %v6009_v63 = vld [vmem:[#allocation2 + $0x1cc] sm:$0xf] }
  0xb0   :  { %1870 = vmatpush.bf16.msrb.mxu0 %v4603_v32  ;;  %1839 = vmatmul.bf16.vlgmr.msra.gmra.mxu1 %v6580_v34  ;;  %v4811_v34 = vor.u32 %v6163_v53, %v4810_v52  ;;  %v4939_v59 = vor.u32 %v6195_v28, %v4938_v54  ;;  %v4778_v8 = vld [vmem:[#allocation2 + $0x648] sm:$0xf]  ;;  %v6155_v25 = vld [vmem:[#allocation2 + $0x654] sm:$0xf0]  ;;  %v4651_v31 = vor.u32 %v6123_v7, %v4650_v6  ;;  %v4348_v52 = vld [vmem:[#allocation2 + $0x2f8] sm:$0xf0] }
  0xb1   :  { %1883 = vmatpush.bf16.msrb.mxu1 %v4731_v15  ;;  %1852 = vmatmul.bf16.vlgmr.msra.gmra.mxu2 %v6574_v27  ;;  %v6131_v27 = vld [vmem:[#allocation2 + $0x594] sm:$0xf0]  ;;  %v4906_v11 = vld [vmem:[#allocation2 + $0x748] sm:$0xf]  ;;  %v4779_v32 = vor.u32 %v6155_v25, %v4778_v8  ;;  %v6077_v28 = vld [vmem:[#allocation2 + $0x3ec] sm:$0xf] }
  0xb2   :  { %1896 = vmatpush.bf16.msrb.mxu2 %v4859_v38  ;;  %1865 = vmatmul.bf16.vlgmr.msra.gmra.mxu3 %v6578_v29  ;;  %v4555_v29 = vor.u32 %v6099_v49, %v4554_v48  ;;  %v4683_v55 = vor.u32 %v6131_v27, %v4682_v50  ;;  %v6610_v10 = vld [vmem:[#allocation5] ss:$8 sm:$0xf]  ;;  %v6013_v48 = vld [vmem:[#allocation2 + $0x1ec] sm:$0xf] }
  0xb3   :  { %1909 = vmatpush.bf16.msrb.mxu3 %v4987_v19  ;;  %v6187_v12 = vld [vmem:[#allocation2 + $0x754] sm:$0xf0]  ;;  %v4506_v14 = vld [vmem:[#allocation2 + $0x428] sm:$0xf]  ;;  %v304_v16 = vperm.slane %v6610_v10, 0 }
  0xb4   :  { %1871 = vmatpush.bf16.msrb.mxu0 %v4587_v26  ;;  %v6087_v15 = vld [vmem:[#allocation2 + $0x434] sm:$0xf0]  ;;  %v4634_v38 = vld [vmem:[#allocation2 + $0x528] sm:$0xf]  ;;  %v4907_v17 = vor.u32 %v6187_v12, %v4906_v11  ;;  %v6045_v27 = vld [vmem:[#allocation2 + $0x2ec] sm:$0xf] }
  0xb5   :  { %1884 = vmatpush.bf16.msrb.mxu1 %v4715_v30  ;;  %v6119_v18 = vld [vmem:[#allocation2 + $0x534] sm:$0xf0]  ;;  %v4762_v19 = vld [vmem:[#allocation2 + $0x628] sm:$0xf]  ;;  %v4507_v23 = vor.u32 %v6087_v15, %v4506_v14  ;;  %v1619_v30 = vpop.f32.mrf.mxu0  ;;  %v4351_v60 = vor.u32 %v6045_v27, %v4348_v52  ;;  %v6041_v2 = vld [vmem:[#allocation2 + $0x2cc] sm:$0xf] }
  0xb6   :  { %1897 = vmatpush.bf16.msrb.mxu2 %v4843_v33  ;;  %v6151_v20 = vld [vmem:[#allocation2 + $0x634] sm:$0xf0]  ;;  %v4890_v21 = vld [vmem:[#allocation2 + $0x728] sm:$0xf]  ;;  %v4635_v33 = vor.u32 %v6119_v18, %v4634_v38  ;;  %v1620_v40 = vadd.f32 %v1619_v30, %v304_v16  ;;  %v4332_v3 = vld [vmem:[#allocation2 + $0x2d8] sm:$0xf0] }
  0xb7   :  { %1910 = vmatpush.bf16.msrb.mxu3 %v4971_v39  ;;  %v6183_v22 = vld [vmem:[#allocation2 + $0x734] sm:$0xf0]  ;;  %v4490_v24 = vld [vmem:[#allocation2 + $0x408] sm:$0xf]  ;;  %v4763_v35 = vor.u32 %v6151_v20, %v4762_v19  ;;  %v6073_v6 = vld [vmem:[#allocation2 + $0x3cc] sm:$0xf]  ;;  %v4335_v11 = vor.u32 %v6041_v2, %v4332_v3 }
  0xb8   :  { %1872 = vmatpush.bf16.msrb.mxu0 %v4571_v45  ;;  %v6083_v26 = vld [vmem:[#allocation2 + $0x414] sm:$0xf0]  ;;  %v4618_v36 = vld [vmem:[#allocation2 + $0x508] sm:$0xf]  ;;  %v4891_v42 = vor.u32 %v6183_v22, %v4890_v21  ;;  %v4460_v7 = vld [vmem:[#allocation2 + $0x3d8] sm:$0xf0] }
  0xb9   :  { %1885 = vmatpush.bf16.msrb.mxu1 %v4699_v46  ;;  %v6115_v37 = vld [vmem:[#allocation2 + $0x514] sm:$0xf0]  ;;  %v4746_v39 = vld [vmem:[#allocation2 + $0x608] sm:$0xf]  ;;  %v5981_v46 = vld [vmem:[#allocation2 + $0xec] sm:$0xf]  ;;  %v4491_v50 = vor.u32 %v6083_v26, %v4490_v24 }
  0xba   :  { %1898 = vmatpush.bf16.msrb.mxu2 %v4827_v47  ;;  %v6147_v43 = vld [vmem:[#allocation2 + $0x614] sm:$0xf0]  ;;  %v4874_v44 = vld [vmem:[#allocation2 + $0x708] sm:$0xf]  ;;  %v4092_v47 = vld [vmem:[#allocation2 + $0xf8] sm:$0xf0]  ;;  %v4619_v53 = vor.u32 %v6115_v37, %v4618_v36 }
  0xbb   :  { %1911 = vmatpush.bf16.msrb.mxu3 %v4955_v51  ;;  %v6179_v45 = vld [vmem:[#allocation2 + $0x714] sm:$0xf0]  ;;  %v4220_v51 = vld [vmem:[#allocation2 + $0x1f8] sm:$0xf0]  ;;  %v4747_v54 = vor.u32 %v6147_v43, %v4746_v39  ;;  %v4095_v56 = vor.u32 %v5981_v46, %v4092_v47  ;;  %v5973_v12 = vld [vmem:[#allocation2 + $0xac] sm:$0xf] }
  0xbc   :  { %1873 = vmatpush.bf16.msrb.mxu0 %v4555_v29  ;;  %v4476_v29 = vld [vmem:[#allocation2 + $0x3f8] sm:$0xf0]  ;;  %v6005_v14 = vld [vmem:[#allocation2 + $0x1ac] sm:$0xf] }
  0xbd   :  { %1886 = vmatpush.bf16.msrb.mxu1 %v4683_v55  ;;  %v4479_v0 = vor.u32 %v6077_v28, %v4476_v29  ;;  %v4188_v15 = vld [vmem:[#allocation2 + $0x1b8] sm:$0xf0]  ;;  %v6037_v38 = vld [vmem:[#allocation2 + $0x2ac] sm:$0xf] }
  0xbe   :  { %1899 = vmatpush.bf16.msrb.mxu2 %v4811_v34  ;;  %v4875_v34 = vor.u32 %v6179_v45, %v4874_v44  ;;  %v4316_v16 = vld [vmem:[#allocation2 + $0x2b8] sm:$0xf0]  ;;  %v6069_v19 = vld [vmem:[#allocation2 + $0x3ac] sm:$0xf]  ;;  %v4191_v26 = vor.u32 %v6005_v14, %v4188_v15 }
  0xbf   :  { %1912 = vmatpush.bf16.msrb.mxu3 %v4939_v59  ;;  %v4223_v59 = vor.u32 %v6013_v48, %v4220_v51  ;;  %v6619_v18 = vld [vmem:[#allocation1 + $0x3f] sm:$0xff]  ;;  %v6622_v22 = vld [vmem:[#allocation1 + $0x2d] sm:$0xff]  ;;  %v4319_v30 = vor.u32 %v6037_v38, %v4316_v16 }
  0xc0   :  { %1874 = vmatpush.bf16.msrb.mxu0 %v4539_v1  ;;  %v1632_v41 = vpop.f32.mrf.mxu1  ;;  %v4204_v1 = vld [vmem:[#allocation2 + $0x1d8] sm:$0xf0]  ;;  %v6001_v36 = vld [vmem:[#allocation2 + $0x18c] sm:$0xf] }
  0xc1   :  { %1887 = vmatpush.bf16.msrb.mxu1 %v4667_v4  ;;  %v1633_v49 = vadd.f32 %v1632_v41, %v1620_v40  ;;  %v4207_v25 = vor.u32 %v6009_v63, %v4204_v1  ;;  %v4444_v20 = vld [vmem:[#allocation2 + $0x3b8] sm:$0xf0]  ;;  %v6033_v40 = vld [vmem:[#allocation2 + $0x28c] sm:$0xf] }
  0xc2   :  { %1900 = vmatpush.bf16.msrb.mxu2 %v4795_v5  ;;  %v1621_v5 = vpop.f32.mrf.mxu0  ;;  %v4447_v37 = vor.u32 %v6069_v19, %v4444_v20  ;;  %v4172_v39 = vld [vmem:[#allocation2 + $0x198] sm:$0xf0]  ;;  %v5965_v48 = vld [vmem:[#allocation2 + $0x6c] sm:$0xf] }
  0xc3   :  { %1913 = vmatpush.bf16.msrb.mxu3 %v4923_v9  ;;  %v4079_v9 = vor.u32 %v5977_v61, %v4076_v62  ;;  %v4300_v41 = vld [vmem:[#allocation2 + $0x298] sm:$0xf0]  ;;  %v4175_v46 = vor.u32 %v6001_v36, %v4172_v39  ;;  %v6061_v29 = vld [vmem:[#allocation2 + $0x36c] sm:$0xf] }
  0xc4   :  { %1875 = vmatpush.bf16.msrb.mxu0 %v4523_v13  ;;  %v1645_v55 = vpop.f32.mrf.mxu2  ;;  %v1658_v58 = vpop.f32.mrf.mxu3  ;;  %v4060_v13 = vld [vmem:[#allocation2 + $0xb8] sm:$0xf0]  ;;  %v4303_v47 = vor.u32 %v6033_v40, %v4300_v41  ;;  %v5993_v61 = vld [vmem:[#allocation2 + $0x14c] sm:$0xf] }
  0xc5   :  { %1888 = vmatpush.bf16.msrb.mxu1 %v4651_v31  ;;  %v1646_v57 = vadd.f32 %v1645_v55, %v1633_v49  ;;  %v6613_v31 = vld [vmem:[#allocation1 + $0x36] sm:$0xff]  ;;  %v4428_v43 = vld [vmem:[#allocation2 + $0x398] sm:$0xf0] }
  0xc6   :  { %1901 = vmatpush.bf16.msrb.mxu2 %v4779_v32  ;;  %v4463_v32 = vor.u32 %v6073_v6, %v4460_v7  ;;  %v4028_v49 = vld [vmem:[#allocation2 + $0x78] sm:$0xf0]  ;;  %v6025_v1 = vld [vmem:[#allocation2 + $0x24c] sm:$0xf] }
  0xc7   :  { %1914 = vmatpush.bf16.msrb.mxu3 %v4907_v17  ;;  %v1659_v4 = vadd.f32 %v1658_v58, %v1646_v57  ;;  %v6616_v17 = vld [vmem:[#allocation1 + $0x24] sm:$0xff]  ;;  %v6057_v5 = vld [vmem:[#allocation2 + $0x34c] sm:$0xf] }
  0xc8   :  { %1876 = vmatpush.bf16.msrb.mxu0 %v4507_v23  ;;  %v1634_v8 = vpop.f32.mrf.mxu1  ;;  %v4063_v23 = vor.u32 %v5973_v12, %v4060_v13  ;;  %v4284_v28 = vld [vmem:[#allocation2 + $0x278] sm:$0xf0]  ;;  %v5957_v12 = vld [vmem:[#allocation2 + $0x2c] sm:$0xf] }
  0xc9   :  { %1889 = vmatpush.bf16.msrb.mxu1 %v4635_v33  ;;  %v5969_v33 = vld [vmem:[#allocation2 + $0x8c] sm:$0xf]  ;;  %v4412_v55 = vld [vmem:[#allocation2 + $0x378] sm:$0xf0] }
  0xca   :  { %1902 = vmatpush.bf16.msrb.mxu2 %v4763_v35  ;;  %v4044_v35 = vld [vmem:[#allocation2 + $0x98] sm:$0xf0]  ;;  %v4415_v63 = vor.u32 %v6061_v29, %v4412_v55  ;;  %v5989_v14 = vld [vmem:[#allocation2 + $0x12c] sm:$0xf] }
  0xcb   :  { %1915 = vmatpush.bf16.msrb.mxu3 %v4891_v42  ;;  %v6065_v42 = vld [vmem:[#allocation2 + $0x38c] sm:$0xf]  ;;  %v4047_v44 = vor.u32 %v5969_v33, %v4044_v35  ;;  %v4268_v2 = vld [vmem:[#allocation2 + $0x258] sm:$0xf0] }
  0xcc   :  { %1877 = vmatpush.bf16.msrb.mxu0 %v4491_v50  ;;  %v1647_v21 = vpop.f32.mrf.mxu2  ;;  %v1660_v24 = vpop.f32.mrf.mxu3  ;;  %v5997_v50 = vld [vmem:[#allocation2 + $0x16c] sm:$0xf]  ;;  %v4431_v52 = vor.u32 %v6065_v42, %v4428_v43  ;;  %v4396_v6 = vld [vmem:[#allocation2 + $0x358] sm:$0xf0] }
  0xcd   :  { %1890 = vmatpush.bf16.msrb.mxu1 %v4619_v53  ;;  %v1671_v45 = vpop.f32.mrf.mxu0  ;;  %v4156_v53 = vld [vmem:[#allocation2 + $0x178] sm:$0xf0]  ;;  %v4399_v15 = vor.u32 %v6057_v5, %v4396_v6  ;;  %v6021_v16 = vld [vmem:[#allocation2 + $0x22c] sm:$0xf] }
  0xce   :  { %1903 = vmatpush.bf16.msrb.mxu2 %v4747_v54  ;;  %v1672_v51 = vadd.f32 %v1671_v45, %v1659_v4  ;;  %v6029_v54 = vld [vmem:[#allocation2 + $0x26c] sm:$0xf]  ;;  %v4159_v57 = vor.u32 %v5997_v50, %v4156_v53  ;;  %v3996_v13 = vld [vmem:[#allocation2 + $0x38] sm:$0xf0] }
  0xcf   :  { %1916 = vmatpush.bf16.msrb.mxu3 %v4875_v34  ;;  %1878 = vmatmul.bf16.vlgmr.msrb.gmra.mxu0 %v6616_v17  ;;  %v4287_v58 = vor.u32 %v6029_v54, %v4284_v28  ;;  %v4124_v38 = vld [vmem:[#allocation2 + $0x138] sm:$0xf0]  ;;  %v6053_v20 = vld [vmem:[#allocation2 + $0x32c] sm:$0xf] }
  0xd0   :  { %1922 = vmatpush.bf16.msra.mxu0 %v4095_v56  ;;  %1891 = vmatmul.bf16.vlgmr.msrb.gmra.mxu1 %v6622_v22  ;;  %v1684_v27 = vpop.f32.mrf.mxu1  ;;  %v4031_v56 = vor.u32 %v5965_v48, %v4028_v49  ;;  %v4252_v19 = vld [vmem:[#allocation2 + $0x238] sm:$0xf0]  ;;  %v5953_v24 = vld [vmem:[#allocation2 + $0xc] sm:$0xf] }
  0xd1   :  { %1935 = vmatpush.bf16.msra.mxu1 %v4223_v59  ;;  %1904 = vmatmul.bf16.vlgmr.msrb.gmra.mxu2 %v6613_v31  ;;  %v1685_v34 = vadd.f32 %v1684_v27, %v1672_v51  ;;  %v5961_v59 = vld [vmem:[#allocation2 + $0x4c] sm:$0xf]  ;;  %v4380_v21 = vld [vmem:[#allocation2 + $0x338] sm:$0xf0]  ;;  %v4255_v33 = vor.u32 %v6021_v16, %v4252_v19  ;;  %v6460_v16 = vld [vmem:[#allocation1 + $0x9] sm:$0xff] }
  0xd2   :  { %1948 = vmatpush.bf16.msra.mxu2 %v4351_v60  ;;  %1917 = vmatmul.bf16.vlgmr.msrb.gmra.mxu3 %v6619_v18  ;;  %v4012_v60 = vld [vmem:[#allocation2 + $0x58] sm:$0xf0]  ;;  %v5985_v35 = vld [vmem:[#allocation2 + $0x10c] sm:$0xf]  ;;  %v4383_v40 = vor.u32 %v6053_v20, %v4380_v21 }
  0xd3   :  { %1961 = vmatpush.bf16.msra.mxu3 %v4479_v0  ;;  %v4140_v0 = vld [vmem:[#allocation2 + $0x158] sm:$0xf0]  ;;  %v4015_v7 = vor.u32 %v5961_v59, %v4012_v60  ;;  %v6049_v42 = vld [vmem:[#allocation2 + $0x30c] sm:$0xf] }
  0xd4   :  { %1923 = vmatpush.bf16.msra.mxu0 %v4079_v9  ;;  %v1697_v62 = vpop.f32.mrf.mxu2  ;;  %v4108_v36 = vld [vmem:[#allocation2 + $0x118] sm:$0xf0]  ;;  %v6109_v45 = vld [vmem:[#allocation2 + $0x4ec] sm:$0xf] }
  0xd5   :  { %1936 = vmatpush.bf16.msra.mxu1 %v4207_v25  ;;  %v1698_v3 = vadd.f32 %v1697_v62, %v1685_v34  ;;  %v1710_v4 = vpop.f32.mrf.mxu3  ;;  %v1673_v9 = vpop.f32.mrf.mxu0  ;;  %v4143_v25 = vor.u32 %v5993_v61, %v4140_v0  ;;  %v4236_v41 = vld [vmem:[#allocation2 + $0x218] sm:$0xf0]  ;;  %v6173_v50 = vld [vmem:[#allocation2 + $0x6ec] sm:$0xf]  ;;  %v4111_v27 = vor.u32 %v5985_v35, %v4108_v36 }
  0xd6   :  { %1949 = vmatpush.bf16.msra.mxu2 %v4335_v11  ;;  %v4271_v11 = vor.u32 %v6025_v1, %v4268_v2  ;;  %v4364_v43 = vld [vmem:[#allocation2 + $0x318] sm:$0xf0]  ;;  %v6205_v53 = vld [vmem:[#allocation2 + $0x7ec] sm:$0xf] }
  0xd7   :  { %1962 = vmatpush.bf16.msra.mxu3 %v4463_v32  ;;  %v6625_v8 = vadd.f32 %v1710_v4, %v1698_v3  ;;  %v4732_v49 = vld [vmem:[#allocation2 + $0x5f8] sm:$0xf0]  ;;  %v4367_v28 = vor.u32 %v6049_v42, %v4364_v43  ;;  %v6169_v61 = vld [vmem:[#allocation2 + $0x6cc] sm:$0xf] }
  0xd8   :  { %1924 = vmatpush.bf16.msra.mxu0 %v4063_v23  ;;  %v1686_v32 = vpop.f32.mrf.mxu1  ;;  %v3999_v23 = vor.u32 %v5957_v12, %v3996_v13  ;;  %v4860_v51 = vld [vmem:[#allocation2 + $0x6f8] sm:$0xf0]  ;;  %v6101_v4 = vld [vmem:[#allocation2 + $0x4ac] sm:$0xf] }
  0xd9   :  { %1937 = vmatpush.bf16.msra.mxu1 %v4191_v26  ;;  %v3980_v26 = vld [vmem:[#allocation2 + $0x18] sm:$0xf0]  ;;  %v4863_v34 = vor.u32 %v6173_v50, %v4860_v51  ;;  %v6133_v6 = vld [vmem:[#allocation2 + $0x5ac] sm:$0xf] }
  0xda   :  { %1950 = vmatpush.bf16.msra.mxu2 %v4319_v30  ;;  %v4127_v30 = vor.u32 %v5989_v14, %v4124_v38  ;;  %v3983_v48 = vor.u32 %v5953_v24, %v3980_v26  ;;  %v4988_v54 = vld [vmem:[#allocation2 + $0x7f8] sm:$0xf0]  ;;  %v6457_v9 = vld [vmem:[#allocation1 + $0x12] sm:$0xff] }
  0xdb   :  { %1963 = vmatpush.bf16.msra.mxu3 %v4447_v37  ;;  %v6017_v37 = vld [vmem:[#allocation2 + $0x20c] sm:$0xf]  ;;  %v4991_v59 = vor.u32 %v6205_v53, %v4988_v54  ;;  %v4716_v60 = vld [vmem:[#allocation2 + $0x5d8] sm:$0xf0] }
  0xdc   :  { %1925 = vmatpush.bf16.msra.mxu0 %v4047_v44  ;;  %v1699_v39 = vpop.f32.mrf.mxu2  ;;  %v4844_v62 = vld [vmem:[#allocation2 + $0x6d8] sm:$0xf0]  ;;  %v6197_v13 = vld [vmem:[#allocation2 + $0x7ac] sm:$0xf] }
  0xdd   :  { %1938 = vmatpush.bf16.msra.mxu1 %v4175_v46  ;;  %v1712_v44 = vpop.f32.mrf.mxu3  ;;  %v4604_v46 = vld [vmem:[#allocation2 + $0x4f8] sm:$0xf0]  ;;  %v4847_v3 = vor.u32 %v6169_v61, %v4844_v62  ;;  %v6097_v21 = vld [vmem:[#allocation2 + $0x48c] sm:$0xf] }
  0xde   :  { %1951 = vmatpush.bf16.msra.mxu2 %v4303_v47  ;;  %v6141_v47 = vld [vmem:[#allocation2 + $0x5ec] sm:$0xf]  ;;  %v4607_v29 = vor.u32 %v6109_v45, %v4604_v46  ;;  %v4972_v0 = vld [vmem:[#allocation2 + $0x7d8] sm:$0xf0] }
  0xdf   :  { %1964 = vmatpush.bf16.msra.mxu3 %v4431_v52  ;;  %v4239_v52 = vor.u32 %v6017_v37, %v4236_v41  ;;  %v4735_v55 = vor.u32 %v6141_v47, %v4732_v49  ;;  %v4572_v5 = vld [vmem:[#allocation2 + $0x4b8] sm:$0xf0]  ;;  %v6129_v24 = vld [vmem:[#allocation2 + $0x58c] sm:$0xf] }
  0xe0   :  { %1926 = vmatpush.bf16.msra.mxu0 %v4031_v56  ;;  %v6105_v56 = vld [vmem:[#allocation2 + $0x4cc] sm:$0xf]  ;;  %v4828_v12 = vld [vmem:[#allocation2 + $0x6b8] sm:$0xf0]  ;;  %v4575_v38 = vor.u32 %v6101_v4, %v4572_v5 }
  0xe1   :  { %1939 = vmatpush.bf16.msra.mxu1 %v4159_v57  ;;  %v4588_v57 = vld [vmem:[#allocation2 + $0x4d8] sm:$0xf0]  ;;  %v6193_v36 = vld [vmem:[#allocation2 + $0x78c] sm:$0xf] }
  0xe2   :  { %1952 = vmatpush.bf16.msra.mxu2 %v4287_v58  ;;  %v6137_v58 = vld [vmem:[#allocation2 + $0x5cc] sm:$0xf]  ;;  %v4591_v1 = vor.u32 %v6105_v56, %v4588_v57  ;;  %v4956_v14 = vld [vmem:[#allocation2 + $0x7b8] sm:$0xf0] }
  0xe3   :  { %1965 = vmatpush.bf16.msra.mxu3 %v4415_v63  ;;  %v6201_v63 = vld [vmem:[#allocation2 + $0x7cc] sm:$0xf]  ;;  %v4719_v2 = vor.u32 %v6137_v58, %v4716_v60  ;;  %v6458_v32 = vld [vmem:[#allocation1] sm:$0xff]  ;;  %v4959_v26 = vor.u32 %v6197_v13, %v4956_v14  ;;  %v305_v14 = vperm.slane %v6610_v10, 1  ;;  %v6223_v10 = vld [vmem:[#allocation2 + $0x8ec] sm:$0xf0] }
  0xe4   :  { %1927 = vmatpush.bf16.msra.mxu0 %v4015_v7  ;;  %v4975_v7 = vor.u32 %v6201_v63, %v4972_v0  ;;  %v4812_v35 = vld [vmem:[#allocation2 + $0x698] sm:$0xf0]  ;;  %v6093_v43 = vld [vmem:[#allocation2 + $0x46c] sm:$0xf] }
  0xe5   :  { %1940 = vmatpush.bf16.msra.mxu1 %v4143_v25  ;;  %v4700_v25 = vld [vmem:[#allocation2 + $0x5b8] sm:$0xf0]  ;;  %v6125_v45 = vld [vmem:[#allocation2 + $0x56c] sm:$0xf] }
  0xe6   :  { %1953 = vmatpush.bf16.msra.mxu2 %v4271_v11  ;;  %v6165_v11 = vld [vmem:[#allocation2 + $0x6ac] sm:$0xf]  ;;  %v4703_v19 = vor.u32 %v6133_v6, %v4700_v25  ;;  %v4940_v37 = vld [vmem:[#allocation2 + $0x798] sm:$0xf0] }
  0xe7   :  { %1966 = vmatpush.bf16.msra.mxu3 %v4399_v15  ;;  %v6459_v15 = vld [vmem:[#allocation1 + $0x1b] sm:$0xff]  ;;  %v4831_v20 = vor.u32 %v6165_v11, %v4828_v12  ;;  %v4540_v44 = vld [vmem:[#allocation2 + $0x478] sm:$0xf0]  ;;  %v4943_v47 = vor.u32 %v6193_v36, %v4940_v37  ;;  %v6157_v49 = vld [vmem:[#allocation2 + $0x66c] sm:$0xf] }
  0xe8   :  { %1928 = vmatpush.bf16.msra.mxu0 %v3999_v23  ;;  %v4556_v23 = vld [vmem:[#allocation2 + $0x498] sm:$0xf0]  ;;  %v6189_v51 = vld [vmem:[#allocation2 + $0x76c] sm:$0xf]  ;;  %v5050_v37 = vld [vmem:[#allocation2 + $0x8e0] sm:$0xf] }
  0xe9   :  { %1941 = vmatpush.bf16.msra.mxu1 %v4127_v30  ;;  %v4684_v30 = vld [vmem:[#allocation2 + $0x598] sm:$0xf0]  ;;  %v4559_v39 = vor.u32 %v6097_v21, %v4556_v23  ;;  %v6153_v58 = vld [vmem:[#allocation2 + $0x64c] sm:$0xf] }
  0xea   :  { %1954 = vmatpush.bf16.msra.mxu2 %v4255_v33  ;;  %v6161_v33 = vld [vmem:[#allocation2 + $0x68c] sm:$0xf]  ;;  %v4687_v41 = vor.u32 %v6129_v24, %v4684_v30  ;;  %v4796_v50 = vld [vmem:[#allocation2 + $0x678] sm:$0xf0] }
  0xeb   :  { %1967 = vmatpush.bf16.msra.mxu3 %v4383_v40  ;;  %v4815_v42 = vor.u32 %v6161_v33, %v4812_v35  ;;  %v4799_v54 = vor.u32 %v6157_v49, %v4796_v50  ;;  %v4652_v57 = vld [vmem:[#allocation2 + $0x558] sm:$0xf0]  ;;  %v6185_v61 = vld [vmem:[#allocation2 + $0x74c] sm:$0xf] }
  0xec   :  { %1929 = vmatpush.bf16.msra.mxu0 %v3983_v48  ;;  %v6627_v40 = vpop.f32.mrf.mxu0  ;;  %v4668_v48 = vld [vmem:[#allocation2 + $0x578] sm:$0xf0]  ;;  %v6117_v5 = vld [vmem:[#allocation2 + $0x52c] sm:$0xf] }
  0xed   :  { %1942 = vmatpush.bf16.msra.mxu1 %v4111_v27  ;;  %v6629_v46 = vpop.f32.mrf.mxu1  ;;  %v4924_v27 = vld [vmem:[#allocation2 + $0x778] sm:$0xf0]  ;;  %v4671_v53 = vor.u32 %v6125_v45, %v4668_v48  ;;  %v6149_v25 = vld [vmem:[#allocation2 + $0x62c] sm:$0xf]  ;;  %v5051_v48 = vor.u32 %v6223_v10, %v5050_v37  ;;  %v5066_v37 = vld [vmem:[#allocation2 + $0x920] sm:$0xf] }
  0xee   :  { %1955 = vmatpush.bf16.msra.mxu2 %v4239_v52  ;;  %v4543_v52 = vor.u32 %v6093_v43, %v4540_v44  ;;  %v4927_v56 = vor.u32 %v6189_v51, %v4924_v27  ;;  %v4908_v62 = vld [vmem:[#allocation2 + $0x758] sm:$0xf0]  ;;  %v6181_v12 = vld [vmem:[#allocation2 + $0x72c] sm:$0xf]  ;;  %v6239_v43 = vld [vmem:[#allocation2 + $0x9ec] sm:$0xf0] }
  0xef   :  { %1968 = vmatpush.bf16.msra.mxu3 %v4367_v28  ;;  %1930 = vmatmul.bf16.vlgmr.msra.gmra.mxu0 %v6458_v32  ;;  %v6089_v28 = vld [vmem:[#allocation2 + $0x44c] sm:$0xf]  ;;  %v4508_v4 = vld [vmem:[#allocation2 + $0x438] sm:$0xf0]  ;;  %v5042_v51 = vld [vmem:[#allocation2 + $0x8c0] sm:$0xf] }
  0xf0   :  { %1974 = vmatpush.bf16.msrb.mxu0 %v4607_v29  ;;  %1943 = vmatmul.bf16.vlgmr.msra.gmra.mxu1 %v6460_v16  ;;  %v4524_v29 = vld [vmem:[#allocation2 + $0x458] sm:$0xf0]  ;;  %v6177_v33 = vld [vmem:[#allocation2 + $0x70c] sm:$0xf]  ;;  %v6221_v27 = vld [vmem:[#allocation2 + $0x8cc] sm:$0xf0] }
  0xf1   :  { %1987 = vmatpush.bf16.msrb.mxu1 %v4735_v55  ;;  %1956 = vmatmul.bf16.vlgmr.msra.gmra.mxu2 %v6457_v9  ;;  %v6121_v55 = vld [vmem:[#allocation2 + $0x54c] sm:$0xf]  ;;  %v4527_v63 = vor.u32 %v6089_v28, %v4524_v29  ;;  %v4636_v9 = vld [vmem:[#allocation2 + $0x538] sm:$0xf0]  ;;  %v5034_v29 = vld [vmem:[#allocation2 + $0x8a0] sm:$0xf] }
  0xf2   :  { %2000 = vmatpush.bf16.msrb.mxu2 %v4863_v34  ;;  %1969 = vmatmul.bf16.vlgmr.msra.gmra.mxu3 %v6459_v15  ;;  %v4764_v11 = vld [vmem:[#allocation2 + $0x638] sm:$0xf0]  ;;  %v6081_v15 = vld [vmem:[#allocation2 + $0x40c] sm:$0xf] }
  0xf3   :  { %2013 = vmatpush.bf16.msrb.mxu3 %v4991_v59  ;;  %v4780_v59 = vld [vmem:[#allocation2 + $0x658] sm:$0xf0]  ;;  %v4767_v16 = vor.u32 %v6149_v25, %v4764_v11 }
  0xf4   :  { %1975 = vmatpush.bf16.msrb.mxu0 %v4591_v1  ;;  %v6631_v34 = vpop.f32.mrf.mxu2  ;;  %v1725_v0 = vpop.f32.mrf.mxu0  ;;  %v4655_v1 = vor.u32 %v6121_v55, %v4652_v57  ;;  %v4892_v13 = vld [vmem:[#allocation2 + $0x738] sm:$0xf0]  ;;  %v6219_v55 = vld [vmem:[#allocation2 + $0x8ac] sm:$0xf0] }
  0xf5   :  { %1988 = vmatpush.bf16.msrb.mxu1 %v4719_v2  ;;  %v6633_v60 = vpop.f32.mrf.mxu3  ;;  %v4783_v2 = vor.u32 %v6153_v58, %v4780_v59  ;;  %v1738_v6 = vpop.f32.mrf.mxu1  ;;  %v4620_v21 = vld [vmem:[#allocation2 + $0x518] sm:$0xf0]  ;;  %v4895_v24 = vor.u32 %v6181_v12, %v4892_v13  ;;  %v5035_v57 = vor.u32 %v6219_v55, %v5034_v29  ;;  %v6255_v0 = vld [vmem:[#allocation2 + $0xaec] sm:$0xf0]  ;;  %v6238_v29 = vld [vmem:[#allocation2 + $0x9e4] sm:$0xf] }
  0xf6   :  { %2001 = vmatpush.bf16.msrb.mxu2 %v4847_v3  ;;  %v6085_v3 = vld [vmem:[#allocation2 + $0x42c] sm:$0xf]  ;;  %v4748_v30 = vld [vmem:[#allocation2 + $0x618] sm:$0xf0]  ;;  %v5116_v55 = vld [vmem:[#allocation2 + $0x9f0] sm:$0xf0] }
  0xf7   :  { %2014 = vmatpush.bf16.msrb.mxu3 %v4975_v7  ;;  %v4911_v7 = vor.u32 %v6185_v61, %v4908_v62  ;;  %v4511_v32 = vor.u32 %v6085_v3, %v4508_v4  ;;  %v4876_v36 = vld [vmem:[#allocation2 + $0x718] sm:$0xf0]  ;;  %v6217_v61 = vld [vmem:[#allocation2 + $0x88c] sm:$0xf0]  ;;  %v5090_v62 = vld [vmem:[#allocation2 + $0x980] sm:$0xf] }
  0xf8   :  { %1976 = vmatpush.bf16.msrb.mxu0 %v4575_v38  ;;  %v4639_v38 = vor.u32 %v6117_v5, %v4636_v9  ;;  %v5018_v3 = vld [vmem:[#allocation2 + $0x860] sm:$0xf]  ;;  %v6253_v9 = vld [vmem:[#allocation2 + $0xacc] sm:$0xf0] }
  0xf9   :  { %1989 = vmatpush.bf16.msrb.mxu1 %v4703_v19  ;;  %v4492_v19 = vld [vmem:[#allocation2 + $0x418] sm:$0xf0]  ;;  %v5082_v4 = vld [vmem:[#allocation2 + $0x960] sm:$0xf] }
  0xfa   :  { %2002 = vmatpush.bf16.msrb.mxu2 %v4831_v20  ;;  %v6113_v20 = vld [vmem:[#allocation2 + $0x50c] sm:$0xf] }
  0xfb   :  { %2015 = vmatpush.bf16.msrb.mxu3 %v4959_v26  ;;  %v6145_v26 = vld [vmem:[#allocation2 + $0x60c] sm:$0xf]  ;;  %v4623_v44 = vor.u32 %v6113_v20, %v4620_v21  ;;  %v5162_v20 = vld [vmem:[#allocation2 + $0xaa0] sm:$0xf]  ;;  %v6251_v21 = vld [vmem:[#allocation2 + $0xaac] sm:$0xf0] }
  0xfc   :  { %1977 = vmatpush.bf16.msrb.mxu0 %v4559_v39  ;;  %v1751_v23 = vpop.f32.mrf.mxu2  ;;  %v1724_v39 = vadd.f32 %v6627_v40, %v305_v14  ;;  %v4751_v45 = vor.u32 %v6145_v26, %v4748_v30  ;;  %v5043_v40 = vor.u32 %v6221_v27, %v5042_v51  ;;  %v5010_v14 = vld [vmem:[#allocation2 + $0x840] sm:$0xf]  ;;  %v6225_v51 = vld [vmem:[#allocation2 + $0x90c] sm:$0xf0]  ;;  %v6222_v27 = vld [vmem:[#allocation2 + $0x8e4] sm:$0xf] }
  0xfd   :  { %1990 = vmatpush.bf16.msrb.mxu1 %v4687_v41  ;;  %v1764_v35 = vpop.f32.mrf.mxu3  ;;  %v4495_v41 = vor.u32 %v6081_v15, %v4492_v19  ;;  %v5074_v15 = vld [vmem:[#allocation2 + $0x940] sm:$0xf]  ;;  %v5163_v23 = vor.u32 %v6251_v21, %v5162_v20  ;;  %v6232_v20 = vld [vmem:[#allocation2 + $0x984] sm:$0xf]  ;;  %v5092_v21 = vld [vmem:[#allocation2 + $0x990] sm:$0xf0] }
  0xfe   :  { %2003 = vmatpush.bf16.msrb.mxu2 %v4815_v42  ;;  %v5114_v42 = vld [vmem:[#allocation2 + $0x9e0] sm:$0xf]  ;;  %v1737_v50 = vadd.f32 %v6629_v46, %v1724_v39  ;;  %v6227_v39 = vld [vmem:[#allocation2 + $0x92c] sm:$0xf0] }
  0xff   :  { %2016 = vmatpush.bf16.msrb.mxu3 %v4943_v47  ;;  %v4879_v47 = vor.u32 %v6177_v33, %v4876_v36  ;;  %v5115_v49 = vor.u32 %v6239_v43, %v5114_v42  ;;  %v5098_v46 = vld [vmem:[#allocation2 + $0x9a0] sm:$0xf]  ;;  %v6211_v36 = vld [vmem:[#allocation2 + $0x82c] sm:$0xf0] }
 0x100   :  { %1978 = vmatpush.bf16.msrb.mxu0 %v4543_v52  ;;  %v5106_v52 = vld [vmem:[#allocation2 + $0x9c0] sm:$0xf]  ;;  %v1750_v28 = vadd.f32 %v6631_v34, %v1737_v50  ;;  %v6233_v34 = vld [vmem:[#allocation2 + $0x98c] sm:$0xf0] }
 0x101   :  { %1991 = vmatpush.bf16.msrb.mxu1 %v4671_v53  ;;  %v6237_v53 = vld [vmem:[#allocation2 + $0x9cc] sm:$0xf0]  ;;  %v5002_v35 = vld [vmem:[#allocation2 + $0x820] sm:$0xf] }
 0x102   :  { %2004 = vmatpush.bf16.msrb.mxu2 %v4799_v54  ;;  %v5107_v54 = vor.u32 %v6237_v53, %v5106_v52  ;;  %v1763_v58 = vadd.f32 %v6633_v60, %v1750_v28  ;;  %v6231_v60 = vld [vmem:[#allocation2 + $0x96c] sm:$0xf0]  ;;  %v5058_v50 = vld [vmem:[#allocation2 + $0x900] sm:$0xf]  ;;  %v5052_v53 = vld [vmem:[#allocation2 + $0x8f0] sm:$0xf0] }
 0x103   :  { %2017 = vmatpush.bf16.msrb.mxu3 %v4927_v56  ;;  %v6235_v56 = vld [vmem:[#allocation2 + $0x9ac] sm:$0xf0]  ;;  %v5083_v13 = vor.u32 %v6231_v60, %v5082_v4  ;;  %v5036_v60 = vld [vmem:[#allocation2 + $0x8b0] sm:$0xf0] }
 0x104   :  { %1979 = vmatpush.bf16.msrb.mxu0 %v4527_v63  ;;  %v5099_v59 = vor.u32 %v6235_v56, %v5098_v46  ;;  %v5178_v63 = vld [vmem:[#allocation2 + $0xae0] sm:$0xf]  ;;  %v6249_v42 = vld [vmem:[#allocation2 + $0xa8c] sm:$0xf0] }
 0x105   :  { %1992 = vmatpush.bf16.msrb.mxu1 %v4655_v1  ;;  %v5179_v1 = vor.u32 %v6255_v0, %v5178_v63  ;;  %v6247_v28 = vld [vmem:[#allocation2 + $0xa6c] sm:$0xf0]  ;;  %v5138_v63 = vld [vmem:[#allocation2 + $0xa40] sm:$0xf] }
 0x106   :  { %2005 = vmatpush.bf16.msrb.mxu2 %v4783_v2  ;;  %v5091_v2 = vor.u32 %v6233_v34, %v5090_v62  ;;  %v5119_v62 = vor.u32 %v6238_v29, %v5116_v55  ;;  %v5044_v34 = vld [vmem:[#allocation2 + $0x8d0] sm:$0xf0]  ;;  %v6245_v0 = vld [vmem:[#allocation2 + $0xa4c] sm:$0xf0]  ;;  %v6226_v55 = vld [vmem:[#allocation2 + $0x924] sm:$0xf] }
 0x107   :  { %2018 = vmatpush.bf16.msrb.mxu3 %v4911_v7  ;;  %v5170_v7 = vld [vmem:[#allocation2 + $0xac0] sm:$0xf]  ;;  %v6243_v4 = vld [vmem:[#allocation2 + $0xa2c] sm:$0xf0]  ;;  %v5004_v29 = vld [vmem:[#allocation2 + $0x830] sm:$0xf0] }
 0x108   :  { %1980 = vmatpush.bf16.msrb.mxu0 %v4511_v32  ;;  %v5171_v25 = vor.u32 %v6253_v9, %v5170_v7  ;;  %v6213_v32 = vld [vmem:[#allocation2 + $0x84c] sm:$0xf0]  ;;  %v6234_v7 = vld [vmem:[#allocation2 + $0x9a4] sm:$0xf] }
 0x109   :  { %1993 = vmatpush.bf16.msrb.mxu1 %v4639_v38 }
 0x10a   :  { %2006 = vmatpush.bf16.msrb.mxu2 %v4767_v16  ;;  %v6229_v16 = vld [vmem:[#allocation2 + $0x94c] sm:$0xf0] }
 0x10b   :  { %2019 = vmatpush.bf16.msrb.mxu3 %v4895_v24  ;;  %v5011_v24 = vor.u32 %v6213_v32, %v5010_v14  ;;  %v5075_v33 = vor.u32 %v6229_v16, %v5074_v15  ;;  %v5180_v14 = vld [vmem:[#allocation2 + $0xaf0] sm:$0xf0] }
 0x10c   :  { %1981 = vmatpush.bf16.msrb.mxu0 %v4495_v41  ;;  %v5154_v41 = vld [vmem:[#allocation2 + $0xa80] sm:$0xf]  ;;  %v5028_v16 = vld [vmem:[#allocation2 + $0x890] sm:$0xf0] }
 0x10d   :  { %1994 = vmatpush.bf16.msrb.mxu1 %v4623_v44  ;;  %v1788_v6 = vpop.f32.mrf.mxu1  ;;  %v5155_v43 = vor.u32 %v6249_v42, %v5154_v41  ;;  %v5172_v41 = vld [vmem:[#allocation2 + $0xad0] sm:$0xf0] }
 0x10e   :  { %2007 = vmatpush.bf16.msrb.mxu2 %v4751_v45  ;;  %v5003_v45 = vor.u32 %v6211_v36, %v5002_v35  ;;  %v6230_v35 = vld [vmem:[#allocation2 + $0x964] sm:$0xf] }
 0x10f   :  { %2020 = vmatpush.bf16.msrb.mxu3 %v4879_v47  ;;  %1982 = vmatmul.bf16.vlgmr.msrb.gmra.mxu0 %v6616_v17  ;;  %v5026_v17 = vld [vmem:[#allocation2 + $0x880] sm:$0xf] }
 0x110   :  { %2425 = vmatpush.bf16.msra.mxu0 %v5051_v48  ;;  %1995 = vmatmul.bf16.vlgmr.msrb.gmra.mxu1 %v6622_v22  ;;  %v5027_v22 = vor.u32 %v6217_v61, %v5026_v17  ;;  %v4994_v47 = vld [vmem:[#allocation2 + $0x800] sm:$0xf]  ;;  %v6209_v48 = vld [vmem:[#allocation2 + $0x80c] sm:$0xf0]  ;;  %v5055_v17 = vor.u32 %v6222_v27, %v5052_v53  ;;  %v6220_v61 = vld [vmem:[#allocation2 + $0x8c4] sm:$0xf] }
 0x111   :  { %2438 = vmatpush.bf16.msra.mxu1 %v5115_v49  ;;  %2008 = vmatmul.bf16.vlgmr.msrb.gmra.mxu2 %v6613_v31  ;;  %v1775_v31 = vpop.f32.mrf.mxu0  ;;  %v5067_v49 = vor.u32 %v6227_v39, %v5066_v37  ;;  %v5084_v37 = vld [vmem:[#allocation2 + $0x970] sm:$0xf0]  ;;  %v6252_v39 = vld [vmem:[#allocation2 + $0xac4] sm:$0xf] }
 0x112   :  { %2021 = vmatmul.bf16.vlgmr.msrb.gmra.mxu3 %v6619_v18  ;;  %v6215_v18 = vld [vmem:[#allocation2 + $0x86c] sm:$0xf0]  ;;  %v1776_v5 = vadd.f32 %v1775_v31, %v1763_v58  ;;  %2451 = vmatpush.bf16.msra.mxu2 %v5179_v1  ;;  %v2026_v58 = vmax.f32 %v6625_v8, 0.0  ;;  %v6236_v1 = vld [vmem:[#allocation2 + $0x9c4] sm:$0xf]  ;;  %v5139_v31 = vor.u32 %v6245_v0, %v5138_v63  ;;  %v5047_v8 = vor.u32 %v6220_v61, %v5044_v34 }
 0x113   :  { %v5019_v11 = vor.u32 %v6215_v18, %v5018_v3  ;;  %v5130_v18 = vld [vmem:[#allocation2 + $0xa20] sm:$0xf]  ;;  %v5175_v42 = vor.u32 %v6252_v39, %v5172_v41  ;;  %v5164_v27 = vld [vmem:[#allocation2 + $0xab0] sm:$0xf0]  ;;  %v6208_v63 = vld [vmem:[#allocation2 + $0x804] sm:$0xf] }
 0x114   :  { %2426 = vmatpush.bf16.msra.mxu0 %v5043_v40  ;;  %v1789_v12 = vadd.f32 %v1788_v6, %v1776_v5  ;;  %v1801_v38 = vpop.f32.mrf.mxu2  ;;  %v6647_v3 = vpack.c.bf16 %v2026_v58, %v2026_v58  ;;  %v6218_v6 = vld [vmem:[#allocation2 + $0x8a4] sm:$0xf]  ;;  %v5131_v9 = vor.u32 %v6243_v4, %v5130_v18  ;;  %v5060_v18 = vld [vmem:[#allocation2 + $0x910] sm:$0xf0] }
 0x115   :  { %2439 = vmatpush.bf16.msra.mxu1 %v5107_v54  ;;  %v1814_v19 = vpop.f32.mrf.mxu3  ;;  %v1790_v10 = vpop.f32.mrf.mxu1  ;;  %v5146_v54 = vld [vmem:[#allocation2 + $0xa60] sm:$0xf]  ;;  %v5039_v32 = vor.u32 %v6218_v6, %v5036_v60  ;;  %v6248_v58 = vld [vmem:[#allocation2 + $0xa84] sm:$0xf] }
 0x116   :  { %2452 = vmatpush.bf16.msra.mxu2 %v5171_v25  ;;  %v1802_v26 = vadd.f32 %v1801_v38, %v1789_v12  ;;  %v5147_v46 = vor.u32 %v6247_v28, %v5146_v54  ;;  %v5100_v25 = vld [vmem:[#allocation2 + $0x9b0] sm:$0xf0]  ;;  %v6241_v12 = vld [vmem:[#allocation2 + $0xa0c] sm:$0xf0]  ;;  %v6216_v38 = vld [vmem:[#allocation2 + $0x884] sm:$0xf] }
 0x117   :  { %v5103_v15 = vor.u32 %v6234_v7, %v5100_v25  ;;  %v6210_v28 = vld [vmem:[#allocation2 + $0x824] sm:$0xf]  ;;  %v5140_v7 = vld [vmem:[#allocation2 + $0xa50] sm:$0xf0] }
 0x118   :  { %2427 = vmatpush.bf16.msra.mxu0 %v5035_v57  ;;  %v1815_v44 = vadd.f32 %v1814_v19, %v1802_v26  ;;  %v4995_v57 = vor.u32 %v6209_v48, %v4994_v47  ;;  %v5095_v26 = vor.u32 %v6232_v20, %v5092_v21  ;;  %v5012_v47 = vld [vmem:[#allocation2 + $0x850] sm:$0xf0]  ;;  %v6228_v48 = vld [vmem:[#allocation2 + $0x944] sm:$0xf]  ;;  %v5007_v61 = vor.u32 %v6210_v28, %v5004_v29  ;;  %v6261_v28 = vld [vmem:[#allocation2 + $0xb4c] sm:$0xf0] }
 0x119   :  { %2440 = vmatpush.bf16.msra.mxu1 %v5099_v59  ;;  %v1777_v30 = vpop.f32.mrf.mxu0  ;;  %v5059_v59 = vor.u32 %v6225_v51, %v5058_v50  ;;  %v6250_v51 = vld [vmem:[#allocation2 + $0xaa4] sm:$0xf]  ;;  %v5124_v21 = vld [vmem:[#allocation2 + $0xa10] sm:$0xf0] }
 0x11a   :  { %2453 = vmatpush.bf16.msra.mxu2 %v5163_v23  ;;  %v2027_v56 = vmax.f32 %v1815_v44, 0.0  ;;  %v6214_v30 = vld [vmem:[#allocation2 + $0x864] sm:$0xf]  ;;  %v5087_v44 = vor.u32 %v6230_v35, %v5084_v37  ;;  %v5167_v53 = vor.u32 %v6250_v51, %v5164_v27  ;;  %v6267_v37 = vld [vmem:[#allocation2 + $0xbac] sm:$0xf0] }
 0x11b   :  { %v6244_v60 = vld [vmem:[#allocation2 + $0xa44] sm:$0xf] }
 0x11c   :  { %2428 = vmatpush.bf16.msra.mxu0 %v5027_v22  ;;  %v1803_v52 = vpop.f32.mrf.mxu2  ;;  %v5108_v22 = vld [vmem:[#allocation2 + $0x9d0] sm:$0xf0]  ;;  %v6240_v20 = vld [vmem:[#allocation2 + $0xa04] sm:$0xf] }
 0x11d   :  { %2441 = vmatpush.bf16.msra.mxu1 %v5091_v2  ;;  %v1816_v40 = vpop.f32.mrf.mxu3  ;;  %v6645_v2 = vpack.c.bf16 %v2027_v56, %v2027_v56  ;;  %v5111_v5 = vor.u32 %v6236_v1, %v5108_v22  ;;  %v5068_v56 = vld [vmem:[#allocation2 + $0x930] sm:$0xf0]  ;;  %v6246_v22 = vld [vmem:[#allocation2 + $0xa64] sm:$0xf] }
 0x11e   :  { %2454 = vmatpush.bf16.msra.mxu2 %v5155_v43  ;;  %v5071_v0 = vor.u32 %v6226_v55, %v5068_v56  ;;  %v4996_v1 = vld [vmem:[#allocation2 + $0x810] sm:$0xf0] }
 0x120   :  { %2429 = vmatpush.bf16.msra.mxu0 %v5019_v11  ;;  %v5122_v11 = vld [vmem:[#allocation2 + $0xa00] sm:$0xf] }
 0x121   :  { %2442 = vmatpush.bf16.msra.mxu1 %v5083_v13  ;;  %v6254_v13 = vld [vmem:[#allocation2 + $0xae4] sm:$0xf]  ;;  %v5123_v19 = vor.u32 %v6241_v12, %v5122_v11  ;;  %v4999_v11 = vor.u32 %v6208_v63, %v4996_v1  ;;  %v6271_v12 = vld [vmem:[#allocation2 + $0xbec] sm:$0xf0] }
 0x122   :  { %2455 = vmatpush.bf16.msra.mxu2 %v5147_v46  ;;  %v5183_v23 = vor.u32 %v6254_v13, %v5180_v14  ;;  %v6270_v63 = vld [vmem:[#allocation2 + $0xbe4] sm:$0xf] }
 0x124   :  { %2430 = vmatpush.bf16.msra.mxu0 %v5011_v24  ;;  %v5031_v24 = vor.u32 %v6216_v38, %v5028_v16  ;;  %v5132_v38 = vld [vmem:[#allocation2 + $0xa30] sm:$0xf0] }
 0x125   :  { %2443 = vmatpush.bf16.msra.mxu1 %v5075_v33  ;;  %v5020_v33 = vld [vmem:[#allocation2 + $0x870] sm:$0xf0] }
 0x126   :  { %2456 = vmatpush.bf16.msra.mxu2 %v5139_v31  ;;  %v5023_v43 = vor.u32 %v6214_v30, %v5020_v33  ;;  %v5148_v31 = vld [vmem:[#allocation2 + $0xa70] sm:$0xf0]  ;;  %v5234_v30 = vld [vmem:[#allocation2 + $0xbc0] sm:$0xf]  ;;  %v6269_v33 = vld [vmem:[#allocation2 + $0xbcc] sm:$0xf0] }
 0x127   :  { %v5235_v35 = vor.u32 %v6269_v33, %v5234_v30  ;;  %v5196_v30 = vld [vmem:[#allocation2 + $0xb30] sm:$0xf0] }
 0x128   :  { %2431 = vmatpush.bf16.msra.mxu0 %v5003_v45  ;;  %v6212_v45 = vld [vmem:[#allocation2 + $0x844] sm:$0xf] }
 0x129   :  { %2444 = vmatpush.bf16.msra.mxu1 %v5067_v49  ;;  %v5076_v49 = vld [vmem:[#allocation2 + $0x950] sm:$0xf0]  ;;  %v5015_v40 = vor.u32 %v6212_v45, %v5012_v47 }
 0x12a   :  { %2457 = vmatpush.bf16.msra.mxu2 %v5131_v9  ;;  %v5079_v54 = vor.u32 %v6228_v48, %v5076_v49  ;;  %v5242_v9 = vld [vmem:[#allocation2 + $0xbe0] sm:$0xf] }
 0x12b   :  { %v5243_v14 = vor.u32 %v6271_v12, %v5242_v9  ;;  %v5210_v49 = vld [vmem:[#allocation2 + $0xb60] sm:$0xf] }
 0x12c   :  { %2432 = vmatpush.bf16.msra.mxu0 %v4995_v57  ;;  %v1827_v36 = vpop.f32.mrf.mxu0 }
 0x12d   :  { %2445 = vmatpush.bf16.msra.mxu1 %v5059_v59  ;;  %v6651_v10 = vpop.f32.mrf.mxu1  ;;  %v5156_v59 = vld [vmem:[#allocation2 + $0xa90] sm:$0xf0]  ;;  %2464 = vmatpush.bf16.msra.mxu3 %v5243_v14 }
 0x12e   :  { %2458 = vmatpush.bf16.msra.mxu2 %v5123_v19 }
 0x12f   :  { %2433 = vmatmul.bf16.vlgmr.msra.gmra.mxu0 %v6647_v3 }
 0x130   :  { %2477 = vmatpush.bf16.msrb.mxu0 %v5055_v17  ;;  %2446 = vmatmul.bf16.vlgmr.msra.gmra.mxu1 %v6645_v2  ;;  %v5159_v17 = vor.u32 %v6248_v58, %v5156_v59  ;;  %v6259_v58 = vld [vmem:[#allocation2 + $0xb2c] sm:$0xf0] }
 0x131   :  { %2490 = vmatpush.bf16.msrb.mxu1 %v5119_v62  ;;  %v6653_v62 = vld [vmem:[#allocation5] ss:$8 sm:$0xf]  ;;  %2465 = vmatpush.bf16.msra.mxu3 %v5235_v35 }
 0x132   :  { %2503 = vmatpush.bf16.msrb.mxu2 %v5183_v23  ;;  %v306_v34 = vperm.slane %v6653_v62, 2 }
 0x134   :  { %2478 = vmatpush.bf16.msrb.mxu0 %v5047_v8  ;;  %v1853_v50 = vpop.f32.mrf.mxu2  ;;  %v1829_v46 = vpop.f32.mrf.mxu0  ;;  %v6224_v8 = vld [vmem:[#allocation2 + $0x904] sm:$0xf]  ;;  %v1828_v25 = vadd.f32 %v1827_v36, %v306_v34  ;;  %v5226_v36 = vld [vmem:[#allocation2 + $0xba0] sm:$0xf] }
 0x135   :  { %2491 = vmatpush.bf16.msrb.mxu1 %v5111_v5  ;;  %v1866_v52 = vpop.f32.mrf.mxu3  ;;  %v1842_v57 = vpop.f32.mrf.mxu1  ;;  %v5151_v5 = vor.u32 %v6246_v22, %v5148_v31  ;;  %v5063_v13 = vor.u32 %v6224_v8, %v5060_v18  ;;  %v6268_v22 = vld [vmem:[#allocation2 + $0xbc4] sm:$0xf]  ;;  %v5236_v31 = vld [vmem:[#allocation2 + $0xbd0] sm:$0xf0] }
 0x136   :  { %2504 = vmatpush.bf16.msrb.mxu2 %v5175_v42  ;;  %v1841_v16 = vadd.f32 %v6651_v10, %v1828_v25  ;;  %v5227_v42 = vor.u32 %v6267_v37, %v5226_v36  ;;  %v5194_v57 = vld [vmem:[#allocation2 + $0xb20] sm:$0xf]  ;;  %v5239_v18 = vor.u32 %v6268_v22, %v5236_v31  ;;  %v6264_v25 = vld [vmem:[#allocation2 + $0xb84] sm:$0xf]  ;;  %v5188_v37 = vld [vmem:[#allocation2 + $0xb10] sm:$0xf0] }
 0x137   :  { %v5195_v59 = vor.u32 %v6259_v58, %v5194_v57  ;;  %v6256_v36 = vld [vmem:[#allocation2 + $0xb04] sm:$0xf]  ;;  %v6287_v22 = vld [vmem:[#allocation2 + $0xcec] sm:$0xf0] }
 0x138   :  { %2479 = vmatpush.bf16.msrb.mxu0 %v5039_v32  ;;  %v5143_v32 = vor.u32 %v6244_v60, %v5140_v7  ;;  %v1854_v23 = vadd.f32 %v1853_v50, %v1841_v16  ;;  %2466 = vmatpush.bf16.msra.mxu3 %v5227_v42  ;;  %v6263_v50 = vld [vmem:[#allocation2 + $0xb6c] sm:$0xf0]  ;;  %v6286_v31 = vld [vmem:[#allocation2 + $0xce4] sm:$0xf] }
 0x139   :  { %2492 = vmatpush.bf16.msrb.mxu1 %v5103_v15  ;;  %v6242_v15 = vld [vmem:[#allocation2 + $0xa24] sm:$0xf] }
 0x13a   :  { %2505 = vmatpush.bf16.msrb.mxu2 %v5167_v53  ;;  %v5135_v19 = vor.u32 %v6242_v15, %v5132_v38  ;;  %v5211_v53 = vor.u32 %v6263_v50, %v5210_v49  ;;  %v5212_v15 = vld [vmem:[#allocation2 + $0xb70] sm:$0xf0]  ;;  %v307_v38 = vperm.slane %v6653_v62, 3 }
 0x13c   :  { %2480 = vmatpush.bf16.msrb.mxu0 %v5031_v24  ;;  %v1855_v4 = vpop.f32.mrf.mxu2  ;;  %v5127_v24 = vor.u32 %v6240_v20, %v5124_v21  ;;  %v5204_v20 = vld [vmem:[#allocation2 + $0xb50] sm:$0xf0] }
 0x13d   :  { %2493 = vmatpush.bf16.msrb.mxu1 %v5095_v26  ;;  %v1868_v6 = vpop.f32.mrf.mxu3  ;;  %v1867_v26 = vadd.f32 %v1866_v52, %v1854_v23 }
 0x13e   :  { %2506 = vmatpush.bf16.msrb.mxu2 %v5159_v17  ;;  %v5186_v17 = vld [vmem:[#allocation2 + $0xb00] sm:$0xf]  ;;  %v5228_v6 = vld [vmem:[#allocation2 + $0xbb0] sm:$0xf0] }
 0x140   :  { %2481 = vmatpush.bf16.msrb.mxu0 %v5023_v43  ;;  %v5218_v43 = vld [vmem:[#allocation2 + $0xb80] sm:$0xf] }
 0x141   :  { %2494 = vmatpush.bf16.msrb.mxu1 %v5087_v44  ;;  %v6265_v44 = vld [vmem:[#allocation2 + $0xb8c] sm:$0xf0] }
 0x142   :  { %2507 = vmatpush.bf16.msrb.mxu2 %v5151_v5  ;;  %v6266_v5 = vld [vmem:[#allocation2 + $0xba4] sm:$0xf] }
 0x143   :  { %v5231_v60 = vor.u32 %v6266_v5, %v5228_v6  ;;  %v6285_v5 = vld [vmem:[#allocation2 + $0xccc] sm:$0xf0] }
 0x144   :  { %2482 = vmatpush.bf16.msrb.mxu0 %v5015_v40 }
 0x145   :  { %2495 = vmatpush.bf16.msrb.mxu1 %v5079_v54  ;;  %v5202_v54 = vld [vmem:[#allocation2 + $0xb40] sm:$0xf] }
 0x146   :  { %2508 = vmatpush.bf16.msrb.mxu2 %v5143_v32  ;;  %v5203_v46 = vor.u32 %v6261_v28, %v5202_v54  ;;  %v6262_v32 = vld [vmem:[#allocation2 + $0xb64] sm:$0xf] }
 0x147   :  { %v5215_v16 = vor.u32 %v6262_v32, %v5212_v15  ;;  %v5370_v32 = vld [vmem:[#allocation2 + $0xde0] sm:$0xf]  ;;  %v6303_v15 = vld [vmem:[#allocation2 + $0xdec] sm:$0xf0] }
 0x148   :  { %2483 = vmatpush.bf16.msrb.mxu0 %v5007_v61  ;;  %v6257_v61 = vld [vmem:[#allocation2 + $0xb0c] sm:$0xf0] }
 0x149   :  { %2496 = vmatpush.bf16.msrb.mxu1 %v5071_v0  ;;  %v5187_v34 = vor.u32 %v6257_v61, %v5186_v17  ;;  %v5244_v0 = vld [vmem:[#allocation2 + $0xbf0] sm:$0xf0] }
 0x14a   :  { %2509 = vmatpush.bf16.msrb.mxu2 %v5135_v19  ;;  %v5247_v1 = vor.u32 %v6270_v63, %v5244_v0  ;;  %v6260_v19 = vld [vmem:[#allocation2 + $0xb44] sm:$0xf] }
 0x14c   :  { %2484 = vmatpush.bf16.msrb.mxu0 %v4999_v11  ;;  %v1879_v10 = vpop.f32.mrf.mxu0  ;;  %v5220_v11 = vld [vmem:[#allocation2 + $0xb90] sm:$0xf0] }
 0x14d   :  { %2497 = vmatpush.bf16.msrb.mxu1 %v5063_v13  ;;  %v1880_v39 = vadd.f32 %v1879_v10, %v1867_v26  ;;  %v1892_v41 = vpop.f32.mrf.mxu1  ;;  %v5223_v13 = vor.u32 %v6264_v25, %v5220_v11  ;;  %v6258_v26 = vld [vmem:[#allocation2 + $0xb24] sm:$0xf]  ;;  %v5290_v11 = vld [vmem:[#allocation2 + $0xca0] sm:$0xf] }
 0x14e   :  { %2510 = vmatpush.bf16.msrb.mxu2 %v5127_v24  ;;  %v5207_v24 = vor.u32 %v6260_v19, %v5204_v20  ;;  %v5199_v35 = vor.u32 %v6258_v26, %v5196_v30  ;;  %v6302_v19 = vld [vmem:[#allocation2 + $0xde4] sm:$0xf]  ;;  %v5372_v20 = vld [vmem:[#allocation2 + $0xdf0] sm:$0xf0]  ;;  %v6281_v26 = vld [vmem:[#allocation2 + $0xc8c] sm:$0xf0] }
 0x14f   :  { %2485 = vmatmul.bf16.vlgmr.msrb.gmra.mxu0 %v6647_v3  ;;  %v1893_v3 = vadd.f32 %v1892_v41, %v1880_v39  ;;  %v5191_v39 = vor.u32 %v6256_v36, %v5188_v37  ;;  %v5375_v30 = vor.u32 %v6302_v19, %v5372_v20  ;;  %v5284_v36 = vld [vmem:[#allocation2 + $0xc90] sm:$0xf0]  ;;  %v6301_v37 = vld [vmem:[#allocation2 + $0xdcc] sm:$0xf0]  ;;  %v5330_v19 = vld [vmem:[#allocation2 + $0xd40] sm:$0xf] }
 0x150   :  { %2498 = vmatmul.bf16.vlgmr.msrb.gmra.mxu1 %v6645_v2  ;;  %v5219_v2 = vor.u32 %v6265_v44, %v5218_v43  ;;  %v6293_v20 = vld [vmem:[#allocation2 + $0xd4c] sm:$0xf0] }
 0x152   :  { %2467 = vmatpush.bf16.msra.mxu3 %v5219_v2 }
 0x154   :  { %v1905_v45 = vpop.f32.mrf.mxu2  ;;  %v1881_v27 = vpop.f32.mrf.mxu0 }
 0x155   :  { %v1906_v47 = vadd.f32 %v1905_v45, %v1893_v3  ;;  %v1918_v48 = vpop.f32.mrf.mxu3  ;;  %v1894_v52 = vpop.f32.mrf.mxu1 }
 0x156   :  { %2468 = vmatpush.bf16.msra.mxu3 %v5211_v53 }
 0x157   :  { %v1919_v51 = vadd.f32 %v1918_v48, %v1906_v47 }
 0x159   :  { %v2028_v40 = vmax.f32 %v1919_v51, 0.0 }
 0x15a   :  { %2469 = vmatpush.bf16.msra.mxu3 %v5203_v46 }
 0x15b   :  { %v2032_v29 = vpack.c.bf16 %v2028_v40, %v2028_v40  ;;  %v2099_v40 = vld [vmem:[#allocation5 + $0x1] ss:$8 sm:$0x3] }
 0x15c   :  { %v1907_v55 = vpop.f32.mrf.mxu2  ;;  %v2101_v54 = vperm.slane %v2099_v40, 0  ;;  %v2102_v58 = vperm.slane %v2099_v40, 1 }
 0x15d   :  { %2459 = vmatmul.bf16.vlgmr.msra.gmra.mxu2 %v2032_v29  ;;  %v1920_v56 = vpop.f32.mrf.mxu3 }
 0x15e   :  { %2470 = vmatpush.bf16.msra.mxu3 %v5195_v59 }
 0x162   :  { %2471 = vmatpush.bf16.msra.mxu3 %v5187_v34 }
 0x166   :  { %2516 = vmatpush.bf16.msrb.mxu3 %v5247_v1  ;;  %v5306_v1 = vld [vmem:[#allocation2 + $0xce0] sm:$0xf] }
 0x16a   :  { %2517 = vmatpush.bf16.msrb.mxu3 %v5239_v18  ;;  %v5308_v18 = vld [vmem:[#allocation2 + $0xcf0] sm:$0xf0] }
 0x16b   :  { %v5311_v6 = vor.u32 %v6286_v31, %v5308_v18  ;;  %v5250_v31 = vld [vmem:[#allocation2 + $0xc00] sm:$0xf] }
 0x16c   :  { %v1931_v8 = vpop.f32.mrf.mxu0  ;;  %v5346_v18 = vld [vmem:[#allocation2 + $0xd80] sm:$0xf] }
 0x16d   :  { %2511 = vmatmul.bf16.vlgmr.msrb.gmra.mxu2 %v2032_v29  ;;  %v1944_v4 = vpop.f32.mrf.mxu1  ;;  %v1932_v33 = vadd.f32 %v1931_v8, %v307_v38  ;;  %v5307_v8 = vor.u32 %v6287_v22, %v5306_v1  ;;  %v5356_v1 = vld [vmem:[#allocation2 + $0xdb0] sm:$0xf0] }
 0x16e   :  { %2518 = vmatpush.bf16.msrb.mxu3 %v5231_v60  ;;  %v6284_v60 = vld [vmem:[#allocation2 + $0xcc4] sm:$0xf]  ;;  %2758 = vmatpush.bf16.msra.mxu2 %v5311_v6 }
 0x16f   :  { %v1945_v10 = vadd.f32 %v1944_v4, %v1932_v33  ;;  %v5298_v4 = vld [vmem:[#allocation2 + $0xcc0] sm:$0xf]  ;;  %2732 = vmatpush.bf16.msra.mxu0 %v5307_v8  ;;  %v6273_v8 = vld [vmem:[#allocation2 + $0xc0c] sm:$0xf0]  ;;  %v6272_v6 = vld [vmem:[#allocation2 + $0xc04] sm:$0xf] }
 0x170   :  { %v5362_v33 = vld [vmem:[#allocation2 + $0xdc0] sm:$0xf] }
 0x172   :  { %2519 = vmatpush.bf16.msrb.mxu3 %v5223_v13  ;;  %v6282_v13 = vld [vmem:[#allocation2 + $0xca4] sm:$0xf] }
 0x174   :  { %v1957_v7 = vpop.f32.mrf.mxu2  ;;  %v1933_v12 = vpop.f32.mrf.mxu0 }
 0x175   :  { %v1970_v9 = vpop.f32.mrf.mxu3  ;;  %v1946_v14 = vpop.f32.mrf.mxu1  ;;  %v1958_v41 = vadd.f32 %v1957_v7, %v1945_v10  ;;  %v5300_v7 = vld [vmem:[#allocation2 + $0xcd0] sm:$0xf0]  ;;  %v6283_v12 = vld [vmem:[#allocation2 + $0xcac] sm:$0xf0]  ;;  %v5363_v10 = vor.u32 %v6301_v37, %v5362_v33  ;;  %v5322_v33 = vld [vmem:[#allocation2 + $0xd20] sm:$0xf] }
 0x176   :  { %2520 = vmatpush.bf16.msrb.mxu3 %v5215_v16  ;;  %v5303_v25 = vor.u32 %v6284_v60, %v5300_v7  ;;  %v5292_v14 = vld [vmem:[#allocation2 + $0xcb0] sm:$0xf0]  ;;  %v5291_v38 = vor.u32 %v6283_v12, %v5290_v11  ;;  %v5371_v16 = vor.u32 %v6303_v15, %v5370_v32  ;;  %v6294_v32 = vld [vmem:[#allocation2 + $0xd64] sm:$0xf] }
 0x177   :  { %v1971_v62 = vadd.f32 %v1970_v9, %v1958_v41  ;;  %v5299_v9 = vor.u32 %v6285_v5, %v5298_v4  ;;  %v5364_v41 = vld [vmem:[#allocation2 + $0xdd0] sm:$0xf0]  ;;  %v5251_v4 = vor.u32 %v6273_v8, %v5250_v31  ;;  %v6297_v5 = vld [vmem:[#allocation2 + $0xd8c] sm:$0xf0]  ;;  %v6360_v8 = vld [vmem:[#allocation2 + $0xfc4] sm:$0xf] }
 0x178   :  { %2759 = vmatpush.bf16.msra.mxu2 %v5303_v25  ;;  %2745 = vmatpush.bf16.msra.mxu1 %v5371_v16  ;;  %v5252_v60 = vld [vmem:[#allocation2 + $0xc10] sm:$0xf0]  ;;  %v5347_v7 = vor.u32 %v6297_v5, %v5346_v18  ;;  %v6296_v25 = vld [vmem:[#allocation2 + $0xd84] sm:$0xf] }
 0x179   :  { %2733 = vmatpush.bf16.msra.mxu0 %v5299_v9  ;;  %v5255_v9 = vor.u32 %v6272_v6, %v5252_v60  ;;  %v5348_v11 = vld [vmem:[#allocation2 + $0xd90] sm:$0xf0]  ;;  %v5442_v60 = vld [vmem:[#allocation2 + $0xe80] sm:$0xf] }
 0x17a   :  { %2521 = vmatpush.bf16.msrb.mxu3 %v5207_v24  ;;  %v5282_v24 = vld [vmem:[#allocation2 + $0xc80] sm:$0xf]  ;;  %v5351_v12 = vor.u32 %v6296_v25, %v5348_v11  ;;  %v5604_v18 = vld [vmem:[#allocation2 + $0xfd0] sm:$0xf0] }
 0x17b   :  { %v5607_v6 = vor.u32 %v6360_v8, %v5604_v18  ;;  %v5586_v11 = vld [vmem:[#allocation2 + $0xfa0] sm:$0xf] }
 0x17c   :  { %v1959_v21 = vpop.f32.mrf.mxu2  ;;  %2746 = vmatpush.bf16.msra.mxu1 %v5363_v10  ;;  %v5324_v10 = vld [vmem:[#allocation2 + $0xd30] sm:$0xf0]  ;;  %v5378_v18 = vld [vmem:[#allocation2 + $0xe00] sm:$0xf] }
 0x17d   :  { %v1972_v23 = vpop.f32.mrf.mxu3  ;;  %2734 = vmatpush.bf16.msra.mxu0 %v5291_v38  ;;  %v5340_v38 = vld [vmem:[#allocation2 + $0xd70] sm:$0xf0] }
 0x17e   :  { %2522 = vmatpush.bf16.msrb.mxu3 %v5199_v35  ;;  %v5295_v23 = vor.u32 %v6282_v13, %v5292_v14  ;;  %v6280_v35 = vld [vmem:[#allocation2 + $0xc84] sm:$0xf]  ;;  %v5338_v13 = vld [vmem:[#allocation2 + $0xd60] sm:$0xf]  ;;  %v6295_v14 = vld [vmem:[#allocation2 + $0xd6c] sm:$0xf0]  ;;  %v5343_v16 = vor.u32 %v6294_v32, %v5340_v38 }
 0x17f   :  { %v5339_v15 = vor.u32 %v6295_v14, %v5338_v13  ;;  %v6356_v13 = vld [vmem:[#allocation2 + $0xfa4] sm:$0xf]  ;;  %v5588_v38 = vld [vmem:[#allocation2 + $0xfb0] sm:$0xf0] }
 0x180   :  { %2760 = vmatpush.bf16.msra.mxu2 %v5295_v23  ;;  %v6292_v23 = vld [vmem:[#allocation2 + $0xd44] sm:$0xf] }
 0x181   :  { %v6320_v32 = vld [vmem:[#allocation2 + $0xe84] sm:$0xf] }
 0x182   :  { %2523 = vmatpush.bf16.msrb.mxu3 %v5191_v39  ;;  %v6300_v39 = vld [vmem:[#allocation2 + $0xdc4] sm:$0xf] }
 0x18c   :  { %v1983_v42 = vpop.f32.mrf.mxu0 }
 0x18d   :  { %v1996_v3 = vpop.f32.mrf.mxu1  ;;  %v1984_v43 = vadd.f32 %v1983_v42, %v1971_v62  ;;  %v5283_v62 = vor.u32 %v6281_v26, %v5282_v24  ;;  %v5367_v42 = vor.u32 %v6300_v39, %v5364_v41  ;;  %v5332_v24 = vld [vmem:[#allocation2 + $0xd50] sm:$0xf0]  ;;  %v5331_v26 = vor.u32 %v6293_v20, %v5330_v19  ;;  %v5314_v41 = vld [vmem:[#allocation2 + $0xd00] sm:$0xf]  ;;  %v6354_v20 = vld [vmem:[#allocation2 + $0xf8c] sm:$0xf0] }
 0x18e   :  { %v5591_v19 = vor.u32 %v6356_v13, %v5588_v38  ;;  %v5500_v13 = vld [vmem:[#allocation2 + $0xef8] sm:$0xf0]  ;;  %v6340_v38 = vld [vmem:[#allocation2 + $0xf24] sm:$0xf] }
 0x18f   :  { %v1997_v44 = vadd.f32 %v1996_v3, %v1984_v43  ;;  %v5287_v3 = vor.u32 %v6280_v35, %v5284_v36  ;;  %v5274_v43 = vld [vmem:[#allocation2 + $0xc60] sm:$0xf]  ;;  %2735 = vmatpush.bf16.msra.mxu0 %v5283_v62  ;;  %v6291_v35 = vld [vmem:[#allocation2 + $0xd2c] sm:$0xf0]  ;;  %v6290_v36 = vld [vmem:[#allocation2 + $0xd24] sm:$0xf] }
 0x190   :  { %v5323_v37 = vor.u32 %v6291_v35, %v5322_v33  ;;  %v5327_v39 = vor.u32 %v6290_v36, %v5324_v10  ;;  %v6289_v62 = vld [vmem:[#allocation2 + $0xd0c] sm:$0xf0]  ;;  %v5572_v33 = vld [vmem:[#allocation2 + $0xf90] sm:$0xf0] }
 0x191   :  { %2761 = vmatpush.bf16.msra.mxu2 %v5287_v3  ;;  %v5315_v3 = vor.u32 %v6289_v62, %v5314_v41  ;;  %v6318_v36 = vld [vmem:[#allocation2 + $0xe6c] sm:$0xf0]  ;;  %v5428_v10 = vld [vmem:[#allocation2 + $0xe70] sm:$0xf0] }
 0x194   :  { %v2009_v45 = vpop.f32.mrf.mxu2  ;;  %v1985_v48 = vpop.f32.mrf.mxu0 }
 0x195   :  { %v2010_v2 = vadd.f32 %v2009_v45, %v1997_v44  ;;  %v2022_v47 = vpop.f32.mrf.mxu3  ;;  %v1998_v49 = vpop.f32.mrf.mxu1  ;;  %v6279_v44 = vld [vmem:[#allocation2 + $0xc6c] sm:$0xf0]  ;;  %v6278_v45 = vld [vmem:[#allocation2 + $0xc64] sm:$0xf] }
 0x197   :  { %v2023_v50 = vadd.f32 %v2022_v47, %v2010_v2  ;;  %v5276_v2 = vld [vmem:[#allocation2 + $0xc70] sm:$0xf0]  ;;  %v5275_v47 = vor.u32 %v6279_v44, %v5274_v43 }
 0x198   :  { %v5279_v49 = vor.u32 %v6278_v45, %v5276_v2  ;;  %v5316_v43 = vld [vmem:[#allocation2 + $0xd10] sm:$0xf0]  ;;  %v5490_v45 = vld [vmem:[#allocation2 + $0xee0] sm:$0xf]  ;;  %v6334_v2 = vld [vmem:[#allocation2 + $0xeec] sm:$0xf0] }
 0x199   :  { %v2029_v51 = vmax.f32 %v2023_v50, 0.0  ;;  %v5266_v50 = vld [vmem:[#allocation2 + $0xc40] sm:$0xf]  ;;  %2736 = vmatpush.bf16.msra.mxu0 %v5275_v47  ;;  %v6332_v47 = vld [vmem:[#allocation2 + $0xee4] sm:$0xf] }
 0x19a   :  { %2762 = vmatpush.bf16.msra.mxu2 %v5279_v49  ;;  %v5492_v49 = vld [vmem:[#allocation2 + $0xef0] sm:$0xf0] }
 0x19b   :  { %v2033_v27 = vpack.c.bf16 %v2029_v51, %v2029_v51  ;;  %v6277_v51 = vld [vmem:[#allocation2 + $0xc4c] sm:$0xf0] }
 0x19c   :  { %v2011_v52 = vpop.f32.mrf.mxu2 }
 0x19d   :  { %v2024_v53 = vpop.f32.mrf.mxu3  ;;  %2472 = vmatmul.bf16.vlgmr.msra.gmra.mxu3 %v2033_v27  ;;  %v5268_v52 = vld [vmem:[#allocation2 + $0xc50] sm:$0xf0] }
 0x19e   :  { %2771 = vmatpush.bf16.msra.mxu3 %v5375_v30  ;;  %v5267_v53 = vor.u32 %v6277_v51, %v5266_v50  ;;  %v5335_v30 = vor.u32 %v6292_v23, %v5332_v24  ;;  %v5474_v50 = vld [vmem:[#allocation2 + $0xec0] sm:$0xf]  ;;  %v6330_v51 = vld [vmem:[#allocation2 + $0xecc] sm:$0xf0]  ;;  %v6352_v23 = vld [vmem:[#allocation2 + $0xf84] sm:$0xf] }
 0x19f   :  { %v5575_v41 = vor.u32 %v6352_v23, %v5572_v33  ;;  %v6329_v23 = vld [vmem:[#allocation2 + $0xecc] sm:$0xf]  ;;  %v6338_v33 = vld [vmem:[#allocation2 + $0xf0c] sm:$0xf0] }
 0x1a0   :  { %2737 = vmatpush.bf16.msra.mxu0 %v5267_v53  ;;  %v5476_v53 = vld [vmem:[#allocation2 + $0xed0] sm:$0xf0] }
 0x1a2   :  { %2772 = vmatpush.bf16.msra.mxu3 %v5367_v42  ;;  %v6288_v42 = vld [vmem:[#allocation2 + $0xd04] sm:$0xf] }
 0x1a3   :  { %v5319_v44 = vor.u32 %v6288_v42, %v5316_v43  ;;  %v5410_v43 = vld [vmem:[#allocation2 + $0xe40] sm:$0xf] }
 0x1ac   :  { %v2434_v28 = vpop.f32.mrf.mxu0 }
 0x1ad   :  { %v2435_v29 = vadd.f32 %v2434_v28, %v2101_v54  ;;  %v2447_v55 = vpop.f32.mrf.mxu1  ;;  %2524 = vmatmul.bf16.vlgmr.msrb.gmra.mxu3 %v2033_v27  ;;  %v6276_v27 = vld [vmem:[#allocation2 + $0xc44] sm:$0xf] }
 0x1ae   :  { %v5271_v40 = vor.u32 %v6276_v27, %v5268_v52  ;;  %v5495_v27 = vor.u32 %v6332_v47, %v5492_v49  ;;  %v6328_v52 = vld [vmem:[#allocation2 + $0xec4] sm:$0xf] }
 0x1af   :  { %v6660_v46 = vadd.f32 %v2447_v55, %v2435_v29  ;;  %v5258_v29 = vld [vmem:[#allocation2 + $0xc20] sm:$0xf]  ;;  %v6275_v55 = vld [vmem:[#allocation2 + $0xc2c] sm:$0xf0] }
 0x1b0   :  { %2763 = vmatpush.bf16.msra.mxu2 %v5271_v40  ;;  %v5618_v40 = vld [vmem:[#allocation2 + $0xfe0] sm:$0xf] }
 0x1b4   :  { %v2436_v56 = vpop.f32.mrf.mxu0 }
 0x1b5   :  { %v2449_v57 = vpop.f32.mrf.mxu1  ;;  %v5354_v56 = vld [vmem:[#allocation2 + $0xda0] sm:$0xf] }
 0x1b6   :  { %v5259_v57 = vor.u32 %v6275_v55, %v5258_v29  ;;  %v6366_v29 = vld [vmem:[#allocation2 + $0xfec] sm:$0xf0]  ;;  %v6364_v55 = vld [vmem:[#allocation2 + $0xfe4] sm:$0xf] }
 0x1b8   :  { %2738 = vmatpush.bf16.msra.mxu0 %v5259_v57  ;;  %v5479_v57 = vor.u32 %v6328_v52, %v5476_v53 }
 0x1bc   :  { %2739 = vmatpush.bf16.msra.mxu0 %v5251_v4 }
 0x1cc   :  { %v2486_v59 = vpop.f32.mrf.mxu0 }
 0x1cd   :  { %v2487_v17 = vadd.f32 %v2486_v59, %v2102_v58  ;;  %v2499_v61 = vpop.f32.mrf.mxu1  ;;  %v6299_v58 = vld [vmem:[#allocation2 + $0xdac] sm:$0xf0]  ;;  %v6274_v59 = vld [vmem:[#allocation2 + $0xc24] sm:$0xf] }
 0x1cf   :  { %v6662_v34 = vadd.f32 %v2499_v61, %v2487_v17  ;;  %v5260_v17 = vld [vmem:[#allocation2 + $0xc30] sm:$0xf0]  ;;  %v5355_v61 = vor.u32 %v6299_v58, %v5354_v56  ;;  %v5619_v58 = vor.u32 %v6366_v29, %v5618_v40  ;;  %v5554_v40 = vld [vmem:[#allocation2 + $0xf60] sm:$0xf]  ;;  %v6348_v29 = vld [vmem:[#allocation2 + $0xf64] sm:$0xf] }
 0x1d0   :  { %v5620_v56 = vld [vmem:[#allocation2 + $0xff0] sm:$0xf0] }
 0x1d1   :  { %2747 = vmatpush.bf16.msra.mxu1 %v5355_v61  ;;  %v6326_v61 = vld [vmem:[#allocation2 + $0xeac] sm:$0xf0] }
 0x1d4   :  { %v2488_v63 = vpop.f32.mrf.mxu0 }
 0x1d5   :  { %v2501_v0 = vpop.f32.mrf.mxu1  ;;  %v5263_v63 = vor.u32 %v6274_v59, %v5260_v17  ;;  %2748 = vmatpush.bf16.msra.mxu1 %v5347_v7  ;;  %v5623_v59 = vor.u32 %v6364_v55, %v5620_v56  ;;  %v5458_v17 = vld [vmem:[#allocation2 + $0xea0] sm:$0xf]  ;;  %v6322_v7 = vld [vmem:[#allocation2 + $0xe8c] sm:$0xf0]  ;;  %v5556_v56 = vld [vmem:[#allocation2 + $0xf70] sm:$0xf0] }
 0x1d6   :  { %v6298_v0 = vld [vmem:[#allocation2 + $0xda4] sm:$0xf]  ;;  %v5459_v5 = vor.u32 %v6326_v61, %v5458_v17  ;;  %v5443_v24 = vor.u32 %v6322_v7, %v5442_v60  ;;  %v5538_v61 = vld [vmem:[#allocation2 + $0xf40] sm:$0xf]  ;;  %v5380_v60 = vld [vmem:[#allocation2 + $0xe10] sm:$0xf0] }
 0x1d7   :  { %v5359_v22 = vor.u32 %v6298_v0, %v5356_v1  ;;  %2764 = vmatpush.bf16.msra.mxu2 %v5263_v63  ;;  %v6324_v63 = vld [vmem:[#allocation2 + $0xea4] sm:$0xf]  ;;  %v5460_v0 = vld [vmem:[#allocation2 + $0xeb0] sm:$0xf0]  ;;  %v5602_v1 = vld [vmem:[#allocation2 + $0xfc0] sm:$0xf] }
 0x1d8   :  { %v5463_v25 = vor.u32 %v6324_v63, %v5460_v0  ;;  %v6308_v17 = vld [vmem:[#allocation2 + $0xe24] sm:$0xf]  ;;  %v6346_v63 = vld [vmem:[#allocation2 + $0xf4c] sm:$0xf0]  ;;  %v5498_v7 = vld [vmem:[#allocation2 + $0xee8] sm:$0xf] }
 0x1d9   :  { %2773 = vmatpush.bf16.msra.mxu3 %v5359_v22  ;;  %2749 = vmatpush.bf16.msra.mxu1 %v5339_v15  ;;  %v6362_v22 = vld [vmem:[#allocation2 + $0xfcc] sm:$0xf0]  ;;  %v5444_v15 = vld [vmem:[#allocation2 + $0xe90] sm:$0xf0] }
 0x1da   :  { %v5603_v31 = vor.u32 %v6362_v22, %v5602_v1  ;;  %v5539_v1 = vor.u32 %v6346_v63, %v5538_v61  ;;  %v6344_v22 = vld [vmem:[#allocation2 + $0xf44] sm:$0xf]  ;;  %v5596_v63 = vld [vmem:[#allocation2 + $0xfb8] sm:$0xf0] }
 0x1db   :  { %2765 = vmatpush.bf16.msra.mxu2 %v5255_v9 }
 0x1dd   :  { %2774 = vmatpush.bf16.msra.mxu3 %v5351_v12  ;;  %2750 = vmatpush.bf16.msra.mxu1 %v5331_v26  ;;  %v6358_v12 = vld [vmem:[#allocation2 + $0xfac] sm:$0xf0]  ;;  %v5447_v26 = vor.u32 %v6320_v32, %v5444_v15 }
 0x1de   :  { %v6342_v15 = vld [vmem:[#allocation2 + $0xf2c] sm:$0xf0] }
 0x1df   :  { %3209 = vmatpush.bf16.msrb.mxu2 %v5495_v27 }
 0x1e0   :  { %v6664_v21 = vpop.f32.mrf.mxu2 }
 0x1e1   :  { %2775 = vmatpush.bf16.msra.mxu3 %v5343_v16  ;;  %2751 = vmatpush.bf16.msra.mxu1 %v5323_v37  ;;  %v2461_v4 = vadd.f32 %v6664_v21, %v6660_v46  ;;  %v5587_v16 = vor.u32 %v6358_v12, %v5586_v11  ;;  %v5570_v46 = vld [vmem:[#allocation2 + $0xf80] sm:$0xf]  ;;  %v6316_v37 = vld [vmem:[#allocation2 + $0xe64] sm:$0xf]  ;;  %v6333_v12 = vld [vmem:[#allocation2 + $0xeec] sm:$0xf] }
 0x1e2   :  { %v5503_v32 = vor.u32 %v6333_v12, %v5500_v13  ;;  %v6315_v12 = vld [vmem:[#allocation2 + $0xe54] sm:$0xf0]  ;;  %v6313_v13 = vld [vmem:[#allocation2 + $0xe4c] sm:$0xf] }
 0x1e3   :  { %3210 = vmatpush.bf16.msrb.mxu2 %v5479_v57  ;;  %v5559_v57 = vor.u32 %v6348_v29, %v5556_v56  ;;  %v5450_v29 = vld [vmem:[#allocation2 + $0xe88] sm:$0xf]  ;;  %v6321_v56 = vld [vmem:[#allocation2 + $0xe8c] sm:$0xf] }
 0x1e5   :  { %2776 = vmatpush.bf16.msra.mxu3 %v5335_v30  ;;  %2752 = vmatpush.bf16.msra.mxu1 %v5315_v3  ;;  %v5426_v30 = vld [vmem:[#allocation2 + $0xe60] sm:$0xf]  ;;  %v5431_v3 = vor.u32 %v6316_v37, %v5428_v10  ;;  %v6336_v37 = vld [vmem:[#allocation2 + $0xf04] sm:$0xf]  ;;  %v5508_v10 = vld [vmem:[#allocation2 + $0xf10] sm:$0xf0] }
 0x1e6   :  { %v5427_v42 = vor.u32 %v6318_v36, %v5426_v30  ;;  %v5506_v30 = vld [vmem:[#allocation2 + $0xf00] sm:$0xf] }
 0x1e7   :  { %3211 = vmatpush.bf16.msrb.mxu2 %v5463_v25  ;;  %v5507_v36 = vor.u32 %v6338_v33, %v5506_v30  ;;  %v5404_v33 = vld [vmem:[#allocation2 + $0xe38] sm:$0xf0] }
 0x1e8   :  { %v2462_v48 = vpop.f32.mrf.mxu2 }
 0x1e9   :  { %2777 = vmatpush.bf16.msra.mxu3 %v5327_v39  ;;  %v5491_v48 = vor.u32 %v6334_v2, %v5490_v45  ;;  %3196 = vmatpush.bf16.msrb.mxu1 %v5619_v58  ;;  %v5571_v39 = vor.u32 %v6354_v20, %v5570_v46  ;;  %v6312_v45 = vld [vmem:[#allocation2 + $0xe44] sm:$0xf]  ;;  %v5412_v2 = vld [vmem:[#allocation2 + $0xe50] sm:$0xf0]  ;;  %v5394_v58 = vld [vmem:[#allocation2 + $0xe20] sm:$0xf] }
 0x1ea   :  { %v6331_v20 = vld [vmem:[#allocation2 + $0xed4] sm:$0xf0] }
 0x1eb   :  { %3183 = vmatpush.bf16.msrb.mxu0 %v5491_v48  ;;  %3212 = vmatpush.bf16.msrb.mxu2 %v5447_v26  ;;  %v5415_v48 = vor.u32 %v6312_v45, %v5412_v2  ;;  %v5484_v26 = vld [vmem:[#allocation2 + $0xed8] sm:$0xf0]  ;;  %v5466_v45 = vld [vmem:[#allocation2 + $0xea8] sm:$0xf]  ;;  %v6327_v2 = vld [vmem:[#allocation2 + $0xeb4] sm:$0xf0] }
 0x1ed   :  { %2778 = vmatpush.bf16.msra.mxu3 %v5319_v44  ;;  %3197 = vmatpush.bf16.msrb.mxu1 %v5603_v31  ;;  %v6314_v44 = vld [vmem:[#allocation2 + $0xe4c] sm:$0xf0]  ;;  %v5540_v31 = vld [vmem:[#allocation2 + $0xf50] sm:$0xf0] }
 0x1ee   :  { %v5411_v47 = vor.u32 %v6314_v44, %v5410_v43  ;;  %v5543_v8 = vor.u32 %v6344_v22, %v5540_v31  ;;  %v5628_v43 = vld [vmem:[#allocation2 + $0xff8] sm:$0xf0]  ;;  %v6319_v22 = vld [vmem:[#allocation2 + $0xe74] sm:$0xf0]  ;;  %v6317_v31 = vld [vmem:[#allocation2 + $0xe6c] sm:$0xf] }
 0x1ef   :  { %3213 = vmatpush.bf16.msrb.mxu2 %v5431_v3 }
 0x1f0   :  { %v6666_v54 = vpop.f32.mrf.mxu2 }
 0x1f1   :  { %3222 = vmatpush.bf16.msrb.mxu3 %v5623_v59  ;;  %3198 = vmatpush.bf16.msrb.mxu1 %v5587_v16  ;;  %v2513_v49 = vadd.f32 %v6666_v54, %v6662_v34  ;;  %v6310_v59 = vld [vmem:[#allocation2 + $0xe2c] sm:$0xf0]  ;;  %v5396_v54 = vld [vmem:[#allocation2 + $0xe30] sm:$0xf0] }
 0x1f2   :  { %v5395_v34 = vor.u32 %v6310_v59, %v5394_v58  ;;  %v5399_v0 = vor.u32 %v6308_v17, %v5396_v54  ;;  %v5524_v16 = vld [vmem:[#allocation2 + $0xf30] sm:$0xf0]  ;;  %v5452_v58 = vld [vmem:[#allocation2 + $0xe98] sm:$0xf0]  ;;  %v5594_v17 = vld [vmem:[#allocation2 + $0xfa8] sm:$0xf] }
 0x1f3   :  { %3214 = vmatpush.bf16.msrb.mxu2 %v5415_v48  ;;  %v5527_v46 = vor.u32 %v6340_v38, %v5524_v16  ;;  %v5467_v48 = vor.u32 %v6327_v2, %v5466_v45  ;;  %v5455_v59 = vor.u32 %v6321_v56, %v5452_v58  ;;  %v6357_v54 = vld [vmem:[#allocation2 + $0xfac] sm:$0xf]  ;;  %v5562_v38 = vld [vmem:[#allocation2 + $0xf68] sm:$0xf]  ;;  %v6351_v16 = vld [vmem:[#allocation2 + $0xf74] sm:$0xf0] }
 0x1f4   :  { %v5388_v45 = vld [vmem:[#allocation2 + $0xe18] sm:$0xf0] }
 0x1f5   :  { %3223 = vmatpush.bf16.msrb.mxu3 %v5607_v6  ;;  %3199 = vmatpush.bf16.msrb.mxu1 %v5571_v39  ;;  %v5511_v39 = vor.u32 %v6336_v37, %v5508_v10  ;;  %v5516_v58 = vld [vmem:[#allocation2 + $0xf18] sm:$0xf0] }
 0x1f7   :  { %3215 = vmatpush.bf16.msrb.mxu2 %v5399_v0  ;;  %v5599_v0 = vor.u32 %v6357_v54, %v5596_v63 }
 0x1f8   :  { %v2514_v28 = vpop.f32.mrf.mxu2 }
 0x1f9   :  { %v5475_v28 = vor.u32 %v6330_v51, %v5474_v50  ;;  %3224 = vmatpush.bf16.msrb.mxu3 %v5591_v19 }
 0x1fb   :  { %3184 = vmatpush.bf16.msrb.mxu0 %v5475_v28  ;;  %v6350_v28 = vld [vmem:[#allocation2 + $0xf6c] sm:$0xf0] }
 0x1fc   :  { %v5555_v55 = vor.u32 %v6350_v28, %v5554_v40  ;;  %v5612_v40 = vld [vmem:[#allocation2 + $0xfd8] sm:$0xf0] }
 0x1fd   :  { %3225 = vmatpush.bf16.msrb.mxu3 %v5575_v41  ;;  %v5626_v41 = vld [vmem:[#allocation2 + $0xfe8] sm:$0xf] }
 0x1fe   :  { %3200 = vmatpush.bf16.msrb.mxu1 %v5555_v55  ;;  %v6323_v55 = vld [vmem:[#allocation2 + $0xe94] sm:$0xf0] }
 0x1ff   :  { %3185 = vmatpush.bf16.msrb.mxu0 %v5459_v5  ;;  %v6304_v5 = vld [vmem:[#allocation2 + $0xe04] sm:$0xf] }
 0x200   :  { %v5383_v25 = vor.u32 %v6304_v5, %v5380_v60  ;;  %v5578_v5 = vld [vmem:[#allocation2 + $0xf88] sm:$0xf]  ;;  %v6353_v60 = vld [vmem:[#allocation2 + $0xf8c] sm:$0xf] }
 0x201   :  { %3226 = vmatpush.bf16.msrb.mxu3 %v5559_v57  ;;  %v5451_v57 = vor.u32 %v6323_v55, %v5450_v29  ;;  %v6337_v29 = vld [vmem:[#allocation2 + $0xf0c] sm:$0xf]  ;;  %v2566_v55 = vld [vmem:[#allocation5 + $0x2] ss:$8 sm:$0x3] }
 0x202   :  { %3201 = vmatpush.bf16.msrb.mxu1 %v5539_v1  ;;  %3216 = vmatpush.bf16.msrb.mxu2 %v5383_v25  ;;  %v5434_v1 = vld [vmem:[#allocation2 + $0xe68] sm:$0xf]  ;;  %v2569_v63 = vperm.slane %v2566_v55, 1 }
 0x203   :  { %3186 = vmatpush.bf16.msrb.mxu0 %v5443_v24 }
 0x205   :  { %3227 = vmatpush.bf16.msrb.mxu3 %v5543_v8  ;;  %v5435_v8 = vor.u32 %v6319_v22, %v5434_v1  ;;  %v5690_v1 = vld [vmem:[#allocation2 + $0x10e0] sm:$0xf]  ;;  %v6383_v22 = vld [vmem:[#allocation2 + $0x10ec] sm:$0xf0] }
 0x207   :  { %3187 = vmatpush.bf16.msrb.mxu0 %v5427_v42  ;;  %v6365_v42 = vld [vmem:[#allocation2 + $0xfec] sm:$0xf] }
 0x208   :  { %v5631_v44 = vor.u32 %v6365_v42, %v5628_v43  ;;  %v5386_v42 = vld [vmem:[#allocation2 + $0xe08] sm:$0xf]  ;;  %v6307_v43 = vld [vmem:[#allocation2 + $0xe14] sm:$0xf0] }
 0x209   :  { %3228 = vmatpush.bf16.msrb.mxu3 %v5527_v46  ;;  %v5563_v46 = vor.u32 %v6351_v16, %v5562_v38  ;;  %v5387_v2 = vor.u32 %v6307_v43, %v5386_v42  ;;  %v6431_v38 = vld [vmem:[#allocation2 + $0x13ec] sm:$0xf0]  ;;  %v5794_v43 = vld [vmem:[#allocation2 + $0x1280] sm:$0xf] }
 0x20b   :  { %3188 = vmatpush.bf16.msrb.mxu0 %v5411_v47  ;;  %v6325_v47 = vld [vmem:[#allocation2 + $0xeac] sm:$0xf] }
 0x20d   :  { %3229 = vmatpush.bf16.msrb.mxu3 %v5511_v39 }
 0x20f   :  { %3189 = vmatpush.bf16.msrb.mxu0 %v5395_v34  ;;  %v6359_v34 = vld [vmem:[#allocation2 + $0xfb4] sm:$0xf0] }
 0x210   :  { %v5595_v61 = vor.u32 %v6359_v34, %v5594_v17  ;;  %v2568_v17 = vperm.slane %v2566_v55, 0  ;;  %v5730_v55 = vld [vmem:[#allocation2 + $0x1180] sm:$0xf] }
 0x220   :  { %v2473_v9 = vpop.f32.mrf.mxu3 }
 0x221   :  { %v2474_v14 = vadd.f32 %v2473_v9, %v2461_v4  ;;  %v6306_v4 = vld [vmem:[#allocation2 + $0xe0c] sm:$0xf0]  ;;  %v6335_v9 = vld [vmem:[#allocation2 + $0xef4] sm:$0xf0] }
 0x222   :  { %v5379_v6 = vor.u32 %v6306_v4, %v5378_v18  ;;  %v5499_v11 = vor.u32 %v6335_v9, %v5498_v7  ;;  %v5436_v18 = vld [vmem:[#allocation2 + $0xe78] sm:$0xf0] }
 0x223   :  { %v2529_v21 = vmax.f32 %v2474_v14, 0.0  ;;  %v5522_v14 = vld [vmem:[#allocation2 + $0xf20] sm:$0xf]  ;;  %v5439_v4 = vor.u32 %v6317_v31, %v5436_v18  ;;  %v5580_v9 = vld [vmem:[#allocation2 + $0xf98] sm:$0xf0] }
 0x224   :  { %3190 = vmatpush.bf16.msrb.mxu0 %v5379_v6  ;;  %v5523_v19 = vor.u32 %v6342_v15, %v5522_v14  ;;  %v6355_v6 = vld [vmem:[#allocation2 + $0xf94] sm:$0xf0]  ;;  %v5583_v25 = vor.u32 %v6353_v60, %v5580_v9  ;;  %v5818_v31 = vld [vmem:[#allocation2 + $0x12e0] sm:$0xf]  ;;  %v6381_v9 = vld [vmem:[#allocation2 + $0x10cc] sm:$0xf0] }
 0x225   :  { %v2531_v35 = vpack.c.bf16 %v2529_v21, %v2529_v21  ;;  %v5482_v21 = vld [vmem:[#allocation2 + $0xec8] sm:$0xf]  ;;  %v5579_v7 = vor.u32 %v6355_v6, %v5578_v5  ;;  %v5682_v5 = vld [vmem:[#allocation2 + $0x10c0] sm:$0xf] }
 0x226   :  { %v5483_v24 = vor.u32 %v6331_v20, %v5482_v21  ;;  %3202 = vmatpush.bf16.msrb.mxu1 %v5523_v19  ;;  %v6349_v19 = vld [vmem:[#allocation2 + $0xf6c] sm:$0xf]  ;;  %v5564_v21 = vld [vmem:[#allocation2 + $0xf78] sm:$0xf0] }
 0x227   :  { %2740 = vmatmul.bf16.vlgmr.msra.gmra.mxu0 %v2531_v35  ;;  %2766 = vmatmul.bf16.vlgmr.msra.gmra.mxu2 %v2531_v35  ;;  %v5487_v35 = vor.u32 %v6329_v23, %v5484_v26  ;;  %v5567_v20 = vor.u32 %v6349_v19, %v5564_v21  ;;  %v5402_v23 = vld [vmem:[#allocation2 + $0xe28] sm:$0xf]  ;;  %v6309_v26 = vld [vmem:[#allocation2 + $0xe2c] sm:$0xf]  ;;  %v5683_v19 = vor.u32 %v6381_v9, %v5682_v5  ;;  %v6379_v21 = vld [vmem:[#allocation2 + $0x10ac] sm:$0xf0] }
 0x228   :  { %v2475_v62 = vpop.f32.mrf.mxu3  ;;  %3235 = vmatpush.bf16.msra.mxu0 %v5499_v11  ;;  %3261 = vmatpush.bf16.msra.mxu2 %v5503_v32  ;;  %v5418_v11 = vld [vmem:[#allocation2 + $0xe48] sm:$0xf]  ;;  %v5420_v32 = vld [vmem:[#allocation2 + $0xe58] sm:$0xf0]  ;;  %v5407_v10 = vor.u32 %v6309_v26, %v5404_v33  ;;  %v6411_v26 = vld [vmem:[#allocation2 + $0x12ac] sm:$0xf0] }
 0x229   :  { %v6367_v62 = vld [vmem:[#allocation2 + $0xff4] sm:$0xf0]  ;;  %v5419_v14 = vor.u32 %v6315_v12, %v5418_v11  ;;  %v5423_v15 = vor.u32 %v6313_v13, %v5420_v32  ;;  %v6413_v11 = vld [vmem:[#allocation2 + $0x12cc] sm:$0xf0]  ;;  %v5754_v13 = vld [vmem:[#allocation2 + $0x11e0] sm:$0xf] }
 0x22a   :  { %v5627_v3 = vor.u32 %v6367_v62, %v5626_v41  ;;  %3203 = vmatpush.bf16.msrb.mxu1 %v5507_v36  ;;  %v6347_v36 = vld [vmem:[#allocation2 + $0xf54] sm:$0xf0]  ;;  %v6345_v41 = vld [vmem:[#allocation2 + $0xf4c] sm:$0xf]  ;;  %v5548_v62 = vld [vmem:[#allocation2 + $0xf58] sm:$0xf0] }
 0x22b   :  { %v6399_v32 = vld [vmem:[#allocation2 + $0x11ec] sm:$0xf0]  ;;  %v5746_v33 = vld [vmem:[#allocation2 + $0x11c0] sm:$0xf] }
 0x22c   :  { %3236 = vmatpush.bf16.msra.mxu0 %v5483_v24  ;;  %3262 = vmatpush.bf16.msra.mxu2 %v5487_v35  ;;  %v6311_v24 = vld [vmem:[#allocation2 + $0xe34] sm:$0xf0]  ;;  %v5546_v35 = vld [vmem:[#allocation2 + $0xf48] sm:$0xf]  ;;  %v6387_v9 = vld [vmem:[#allocation2 + $0x112c] sm:$0xf0] }
 0x22d   :  { %v5403_v30 = vor.u32 %v6311_v24, %v5402_v23  ;;  %v5547_v39 = vor.u32 %v6347_v36, %v5546_v35  ;;  %v5802_v24 = vld [vmem:[#allocation2 + $0x12a0] sm:$0xf] }
 0x22e   :  { %v5803_v42 = vor.u32 %v6411_v26, %v5802_v24  ;;  %v6398_v24 = vld [vmem:[#allocation2 + $0x11e4] sm:$0xf]  ;;  %v5756_v26 = vld [vmem:[#allocation2 + $0x11f0] sm:$0xf0] }
 0x230   :  { %v2525_v50 = vpop.f32.mrf.mxu3  ;;  %3237 = vmatpush.bf16.msra.mxu0 %v5467_v48  ;;  %v5530_v48 = vld [vmem:[#allocation2 + $0xf28] sm:$0xf] }
 0x231   :  { %v2526_v51 = vadd.f32 %v2525_v50, %v2513_v49  ;;  %v5468_v49 = vld [vmem:[#allocation2 + $0xeb8] sm:$0xf0] }
 0x232   :  { %v5471_v50 = vor.u32 %v6325_v47, %v5468_v49  ;;  %v6343_v49 = vld [vmem:[#allocation2 + $0xf34] sm:$0xf0] }
 0x233   :  { %v2530_v27 = vmax.f32 %v2526_v51, 0.0  ;;  %v5610_v51 = vld [vmem:[#allocation2 + $0xfc8] sm:$0xf] }
 0x234   :  { %3263 = vmatpush.bf16.msra.mxu2 %v5471_v50  ;;  %3238 = vmatpush.bf16.msra.mxu0 %v5451_v57  ;;  %v6341_v50 = vld [vmem:[#allocation2 + $0xf2c] sm:$0xf] }
 0x235   :  { %v2532_v52 = vpack.c.bf16 %v2530_v27, %v2530_v27  ;;  %v6363_v27 = vld [vmem:[#allocation2 + $0xfd4] sm:$0xf0] }
 0x237   :  { %2753 = vmatmul.bf16.vlgmr.msra.gmra.mxu1 %v2532_v52  ;;  %2779 = vmatmul.bf16.vlgmr.msra.gmra.mxu3 %v2532_v52  ;;  %v6361_v52 = vld [vmem:[#allocation2 + $0xfcc] sm:$0xf] }
 0x238   :  { %v2527_v53 = vpop.f32.mrf.mxu3  ;;  %3248 = vmatpush.bf16.msra.mxu1 %v5627_v3  ;;  %3274 = vmatpush.bf16.msra.mxu3 %v5631_v44  ;;  %v5615_v28 = vor.u32 %v6361_v52, %v5612_v40  ;;  %v5551_v3 = vor.u32 %v6345_v41, %v5548_v62  ;;  %v6305_v44 = vld [vmem:[#allocation2 + $0xe0c] sm:$0xf]  ;;  %v5514_v40 = vld [vmem:[#allocation2 + $0xf08] sm:$0xf]  ;;  %v5666_v62 = vld [vmem:[#allocation2 + $0x1080] sm:$0xf] }
 0x239   :  { %v5611_v53 = vor.u32 %v6363_v27, %v5610_v51  ;;  %3264 = vmatpush.bf16.msra.mxu2 %v5455_v59  ;;  %3239 = vmatpush.bf16.msra.mxu0 %v5435_v8  ;;  %v5391_v47 = vor.u32 %v6305_v44, %v5388_v45  ;;  %v5532_v51 = vld [vmem:[#allocation2 + $0xf38] sm:$0xf0]  ;;  %v5531_v27 = vor.u32 %v6343_v49, %v5530_v48  ;;  %v6415_v8 = vld [vmem:[#allocation2 + $0x12ec] sm:$0xf0] }
 0x23a   :  { %v5535_v52 = vor.u32 %v6341_v50, %v5532_v51  ;;  %v5519_v59 = vor.u32 %v6337_v29, %v5516_v58  ;;  %v5819_v6 = vor.u32 %v6415_v8, %v5818_v31  ;;  %v6409_v44 = vld [vmem:[#allocation2 + $0x128c] sm:$0xf0]  ;;  %v5866_v50 = vld [vmem:[#allocation2 + $0x13a0] sm:$0xf] }
 0x23b   :  { %v6395_v49 = vld [vmem:[#allocation2 + $0x11ac] sm:$0xf0]  ;;  %v5650_v58 = vld [vmem:[#allocation2 + $0x1040] sm:$0xf] }
 0x23c   :  { %3249 = vmatpush.bf16.msra.mxu1 %v5611_v53  ;;  %3275 = vmatpush.bf16.msra.mxu3 %v5615_v28  ;;  %v6339_v28 = vld [vmem:[#allocation2 + $0xf14] sm:$0xf0]  ;;  %v6427_v51 = vld [vmem:[#allocation2 + $0x13ac] sm:$0xf0] }
 0x23d   :  { %3265 = vmatpush.bf16.msra.mxu2 %v5439_v4  ;;  %3240 = vmatpush.bf16.msra.mxu0 %v5419_v14  ;;  %v5515_v57 = vor.u32 %v6339_v28, %v5514_v40  ;;  %v5691_v4 = vor.u32 %v6383_v22, %v5690_v1  ;;  %v6375_v40 = vld [vmem:[#allocation2 + $0x106c] sm:$0xf0]  ;;  %v5867_v29 = vor.u32 %v6427_v51, %v5866_v50  ;;  %v5714_v22 = vld [vmem:[#allocation2 + $0x1140] sm:$0xf]  ;;  %v5668_v50 = vld [vmem:[#allocation2 + $0x1090] sm:$0xf0] }
 0x23e   :  { %v6389_v31 = vld [vmem:[#allocation2 + $0x114c] sm:$0xf0] }
 0x23f   :  { %v5715_v5 = vor.u32 %v6389_v31, %v5714_v22  ;;  %v6392_v22 = vld [vmem:[#allocation2 + $0x1184] sm:$0xf]  ;;  %v5732_v31 = vld [vmem:[#allocation2 + $0x1190] sm:$0xf0] }
 0x240   :  { %3250 = vmatpush.bf16.msra.mxu1 %v5595_v61  ;;  %3276 = vmatpush.bf16.msra.mxu3 %v5599_v0 }
 0x241   :  { %3266 = vmatpush.bf16.msra.mxu2 %v5423_v15  ;;  %3241 = vmatpush.bf16.msra.mxu0 %v5403_v30  ;;  %v5882_v15 = vld [vmem:[#allocation2 + $0x13e0] sm:$0xf]  ;;  %v5755_v30 = vor.u32 %v6399_v32, %v5754_v13 }
 0x242   :  { %v5883_v35 = vor.u32 %v6431_v38, %v5882_v15  ;;  %v5786_v13 = vld [vmem:[#allocation2 + $0x1260] sm:$0xf]  ;;  %v6380_v15 = vld [vmem:[#allocation2 + $0x10c4] sm:$0xf]  ;;  %v5684_v38 = vld [vmem:[#allocation2 + $0x10d0] sm:$0xf0] }
 0x244   :  { %3251 = vmatpush.bf16.msra.mxu1 %v5579_v7  ;;  %3277 = vmatpush.bf16.msra.mxu3 %v5583_v25  ;;  %v5810_v25 = vld [vmem:[#allocation2 + $0x12c0] sm:$0xf] }
 0x245   :  { %3267 = vmatpush.bf16.msra.mxu2 %v5407_v10  ;;  %3242 = vmatpush.bf16.msra.mxu0 %v5387_v2  ;;  %v5874_v10 = vld [vmem:[#allocation2 + $0x13c0] sm:$0xf] }
 0x248   :  { %3252 = vmatpush.bf16.msra.mxu1 %v5563_v46  ;;  %3278 = vmatpush.bf16.msra.mxu3 %v5567_v20  ;;  %v5674_v46 = vld [vmem:[#allocation2 + $0x10a0] sm:$0xf]  ;;  %v5811_v20 = vor.u32 %v6413_v11, %v5810_v25 }
 0x249   :  { %3268 = vmatpush.bf16.msra.mxu2 %v5391_v47  ;;  %v5675_v41 = vor.u32 %v6379_v21, %v5674_v46  ;;  %v5738_v47 = vld [vmem:[#allocation2 + $0x11a0] sm:$0xf]  ;;  %v6385_v46 = vld [vmem:[#allocation2 + $0x110c] sm:$0xf0] }
 0x24a   :  { %v5739_v28 = vor.u32 %v6395_v49, %v5738_v47  ;;  %v5858_v21 = vld [vmem:[#allocation2 + $0x1380] sm:$0xf]  ;;  %v6403_v47 = vld [vmem:[#allocation2 + $0x122c] sm:$0xf0]  ;;  %v6376_v49 = vld [vmem:[#allocation2 + $0x1084] sm:$0xf] }
 0x24b   :  { %v5671_v51 = vor.u32 %v6376_v49, %v5668_v50  ;;  %v5788_v49 = vld [vmem:[#allocation2 + $0x1270] sm:$0xf0]  ;;  %v6678_v50 = vld [vmem:[#allocation5 + $0x3] ss:$8 sm:$0xf] }
 0x24c   :  { %3253 = vmatpush.bf16.msra.mxu1 %v5547_v39  ;;  %3279 = vmatpush.bf16.msra.mxu3 %v5551_v3  ;;  %v6429_v39 = vld [vmem:[#allocation2 + $0x13cc] sm:$0xf0] }
 0x24d   :  { %v6377_v3 = vld [vmem:[#allocation2 + $0x108c] sm:$0xf0]  ;;  %v5875_v48 = vor.u32 %v6429_v39, %v5874_v10  ;;  %v6378_v10 = vld [vmem:[#allocation2 + $0x10a4] sm:$0xf]  ;;  %v5676_v39 = vld [vmem:[#allocation2 + $0x10b0] sm:$0xf0] }
 0x250   :  { %3254 = vmatpush.bf16.msra.mxu1 %v5531_v27  ;;  %3280 = vmatpush.bf16.msra.mxu3 %v5535_v52  ;;  %v5667_v27 = vor.u32 %v6377_v3, %v5666_v62  ;;  %v5795_v52 = vor.u32 %v6409_v44, %v5794_v43  ;;  %v5850_v62 = vld [vmem:[#allocation2 + $0x1360] sm:$0xf]  ;;  %v6396_v43 = vld [vmem:[#allocation2 + $0x11c4] sm:$0xf]  ;;  %v5748_v44 = vld [vmem:[#allocation2 + $0x11d0] sm:$0xf0] }
 0x254   :  { %3255 = vmatpush.bf16.msra.mxu1 %v5515_v57  ;;  %3281 = vmatpush.bf16.msra.mxu3 %v5519_v59  ;;  %v6373_v59 = vld [vmem:[#allocation2 + $0x104c] sm:$0xf0] }
 0x2a4   :  { %v2741_v37 = vpop.f32.mrf.mxu0 }
 0x2a5   :  { %v2742_v54 = vadd.f32 %v2741_v37, %v2568_v17  ;;  %v6397_v37 = vld [vmem:[#allocation2 + $0x11cc] sm:$0xf0] }
 0x2a6   :  { %v5747_v2 = vor.u32 %v6397_v37, %v5746_v33  ;;  %v5759_v33 = vor.u32 %v6398_v24, %v5756_v26  ;;  %v6388_v24 = vld [vmem:[#allocation2 + $0x1144] sm:$0xf]  ;;  %v5716_v26 = vld [vmem:[#allocation2 + $0x1150] sm:$0xf0] }
 0x2aa   :  { %v2767_v53 = vpop.f32.mrf.mxu2 }
 0x2ab   :  { %v2768_v60 = vadd.f32 %v2767_v53, %v2569_v63  ;;  %v5658_v53 = vld [vmem:[#allocation2 + $0x1060] sm:$0xf] }
 0x2ac   :  { %v2743_v56 = vpop.f32.mrf.mxu0  ;;  %v5659_v57 = vor.u32 %v6375_v40, %v5658_v53  ;;  %v5642_v63 = vld [vmem:[#allocation2 + $0x1020] sm:$0xf]  ;;  %v6394_v40 = vld [vmem:[#allocation2 + $0x11a4] sm:$0xf] }
 0x2ad   :  { %v6393_v56 = vld [vmem:[#allocation2 + $0x118c] sm:$0xf0] }
 0x2ae   :  { %v5731_v17 = vor.u32 %v6393_v56, %v5730_v55  ;;  %v5762_v55 = vld [vmem:[#allocation2 + $0x1200] sm:$0xf]  ;;  %v6401_v56 = vld [vmem:[#allocation2 + $0x120c] sm:$0xf0] }
 0x2b2   :  { %v2769_v34 = vpop.f32.mrf.mxu2 }
 0x2b3   :  { %v5722_v34 = vld [vmem:[#allocation2 + $0x1160] sm:$0xf] }
 0x2b4   :  { %v2754_v61 = vpop.f32.mrf.mxu1 }
 0x2b5   :  { %v2755_v0 = vadd.f32 %v2754_v61, %v2742_v54  ;;  %v6391_v54 = vld [vmem:[#allocation2 + $0x116c] sm:$0xf0]  ;;  %v5651_v61 = vor.u32 %v6373_v59, %v5650_v58  ;;  %v6374_v58 = vld [vmem:[#allocation2 + $0x1064] sm:$0xf]  ;;  %v5660_v59 = vld [vmem:[#allocation2 + $0x1070] sm:$0xf0] }
 0x2b6   :  { %v5723_v1 = vor.u32 %v6391_v54, %v5722_v34  ;;  %v5663_v34 = vor.u32 %v6374_v58, %v5660_v59  ;;  %v5820_v54 = vld [vmem:[#allocation2 + $0x12f0] sm:$0xf0]  ;;  %v2855_v58 = vperm.slane %v6678_v50, 0 }
 0x2b7   :  { %v2784_v18 = vmax.f32 %v2755_v0, 0.0  ;;  %v6371_v0 = vld [vmem:[#allocation2 + $0x102c] sm:$0xf0] }
 0x2b8   :  { %v5643_v8 = vor.u32 %v6371_v0, %v5642_v63  ;;  %v6419_v63 = vld [vmem:[#allocation2 + $0x132c] sm:$0xf0] }
 0x2b9   :  { %v6672_v7 = vpack.c.bf16 %v2784_v18, %v2784_v18  ;;  %v5634_v18 = vld [vmem:[#allocation2 + $0x1000] sm:$0xf] }
 0x2ba   :  { %v2780_v12 = vpop.f32.mrf.mxu3 }
 0x2bb   :  { %v2781_v14 = vadd.f32 %v2780_v12, %v2768_v60  ;;  %3191 = vmatmul.bf16.vlgmr.msrb.gmra.mxu0 %v6672_v7  ;;  %3217 = vmatmul.bf16.vlgmr.msrb.gmra.mxu2 %v6672_v7  ;;  %v5692_v60 = vld [vmem:[#allocation2 + $0x10f0] sm:$0xf0] }
 0x2bc   :  { %v2756_v16 = vpop.f32.mrf.mxu1  ;;  %3686 = vmatpush.bf16.msrb.mxu0 %v5691_v4  ;;  %3712 = vmatpush.bf16.msrb.mxu2 %v5819_v6  ;;  %v6369_v4 = vld [vmem:[#allocation2 + $0x100c] sm:$0xf0]  ;;  %v6382_v6 = vld [vmem:[#allocation2 + $0x10e4] sm:$0xf] }
 0x2bd   :  { %v2785_v23 = vmax.f32 %v2781_v14, 0.0  ;;  %v5635_v25 = vor.u32 %v6369_v4, %v5634_v18  ;;  %v5695_v11 = vor.u32 %v6382_v6, %v5692_v60  ;;  %v6407_v14 = vld [vmem:[#allocation2 + $0x126c] sm:$0xf0]  ;;  %v5687_v16 = vor.u32 %v6380_v15, %v5684_v38  ;;  %v6372_v18 = vld [vmem:[#allocation2 + $0x1044] sm:$0xf] }
 0x2be   :  { %v5787_v32 = vor.u32 %v6407_v14, %v5786_v13  ;;  %v5652_v4 = vld [vmem:[#allocation2 + $0x1050] sm:$0xf0]  ;;  %v6412_v6 = vld [vmem:[#allocation2 + $0x12c4] sm:$0xf] }
 0x2bf   :  { %v2787_v36 = vpack.c.bf16 %v2785_v23, %v2785_v23  ;;  %v6425_v23 = vld [vmem:[#allocation2 + $0x138c] sm:$0xf0]  ;;  %v5812_v60 = vld [vmem:[#allocation2 + $0x12d0] sm:$0xf0] }
 0x2c0   :  { %3687 = vmatpush.bf16.msrb.mxu0 %v5683_v19  ;;  %3713 = vmatpush.bf16.msrb.mxu2 %v5811_v20  ;;  %v5698_v19 = vld [vmem:[#allocation2 + $0x1100] sm:$0xf]  ;;  %v5884_v15 = vld [vmem:[#allocation2 + $0x13f0] sm:$0xf0] }
 0x2c1   :  { %3204 = vmatmul.bf16.vlgmr.msrb.gmra.mxu1 %v2787_v36  ;;  %3230 = vmatmul.bf16.vlgmr.msrb.gmra.mxu3 %v2787_v36  ;;  %v5699_v20 = vor.u32 %v6385_v46, %v5698_v19  ;;  %v5644_v19 = vld [vmem:[#allocation2 + $0x1030] sm:$0xf0]  ;;  %v6410_v46 = vld [vmem:[#allocation2 + $0x12a4] sm:$0xf] }
 0x2c2   :  { %v2782_v45 = vpop.f32.mrf.mxu3  ;;  %3699 = vmatpush.bf16.msrb.mxu1 %v5755_v30  ;;  %3725 = vmatpush.bf16.msrb.mxu3 %v5883_v35  ;;  %v5859_v30 = vor.u32 %v6425_v23, %v5858_v21  ;;  %v5778_v35 = vld [vmem:[#allocation2 + $0x1240] sm:$0xf] }
 0x2c3   :  { %v5751_v45 = vor.u32 %v6396_v43, %v5748_v44  ;;  %v5708_v43 = vld [vmem:[#allocation2 + $0x1130] sm:$0xf0]  ;;  %v6426_v44 = vld [vmem:[#allocation2 + $0x13a4] sm:$0xf] }
 0x2c4   :  { %3688 = vmatpush.bf16.msrb.mxu0 %v5675_v41  ;;  %3714 = vmatpush.bf16.msrb.mxu2 %v5803_v42  ;;  %v5679_v41 = vor.u32 %v6378_v10, %v5676_v39  ;;  %v6423_v42 = vld [vmem:[#allocation2 + $0x136c] sm:$0xf0]  ;;  %v5636_v10 = vld [vmem:[#allocation2 + $0x1010] sm:$0xf0]  ;;  %v6408_v39 = vld [vmem:[#allocation2 + $0x1284] sm:$0xf] }
 0x2c5   :  { %v5851_v3 = vor.u32 %v6423_v42, %v5850_v62  ;;  %v5796_v62 = vld [vmem:[#allocation2 + $0x1290] sm:$0xf0] }
 0x2c6   :  { %3700 = vmatpush.bf16.msrb.mxu1 %v5747_v2  ;;  %3726 = vmatpush.bf16.msrb.mxu3 %v5875_v48  ;;  %v5770_v2 = vld [vmem:[#allocation2 + $0x1220] sm:$0xf]  ;;  %v5799_v42 = vor.u32 %v6408_v39, %v5796_v62 }
 0x2c7   :  { %v5771_v48 = vor.u32 %v6403_v47, %v5770_v2  ;;  %v5868_v2 = vld [vmem:[#allocation2 + $0x13b0] sm:$0xf0] }
 0x2c8   :  { %3689 = vmatpush.bf16.msrb.mxu0 %v5667_v27  ;;  %3715 = vmatpush.bf16.msrb.mxu2 %v5795_v52  ;;  %v5842_v27 = vld [vmem:[#allocation2 + $0x1340] sm:$0xf]  ;;  %v6421_v52 = vld [vmem:[#allocation2 + $0x134c] sm:$0xf0]  ;;  %v5871_v47 = vor.u32 %v6426_v44, %v5868_v2 }
 0x2c9   :  { %v5843_v53 = vor.u32 %v6421_v52, %v5842_v27  ;;  %v6384_v27 = vld [vmem:[#allocation2 + $0x1104] sm:$0xf]  ;;  %v5700_v52 = vld [vmem:[#allocation2 + $0x1110] sm:$0xf0] }
 0x2ca   :  { %3701 = vmatpush.bf16.msrb.mxu1 %v5739_v28  ;;  %3727 = vmatpush.bf16.msrb.mxu3 %v5867_v29  ;;  %v5740_v28 = vld [vmem:[#allocation2 + $0x11b0] sm:$0xf0] }
 0x2cb   :  { %3243 = vmatmul.bf16.vlgmr.msra.gmra.mxu0 %v6672_v7  ;;  %3269 = vmatmul.bf16.vlgmr.msra.gmra.mxu2 %v6672_v7  ;;  %v5706_v7 = vld [vmem:[#allocation2 + $0x1120] sm:$0xf]  ;;  %v5743_v29 = vor.u32 %v6394_v40, %v5740_v28  ;;  %v5703_v40 = vor.u32 %v6384_v27, %v5700_v52  ;;  %v5860_v28 = vld [vmem:[#allocation2 + $0x1390] sm:$0xf0]  ;;  %v6439_v52 = vld [vmem:[#allocation2 + $0x14ec] sm:$0xf0] }
 0x2cc   :  { %3690 = vmatpush.bf16.msrb.mxu0 %v5659_v57  ;;  %v5707_v12 = vor.u32 %v6387_v9, %v5706_v7  ;;  %3716 = vmatpush.bf16.msrb.mxu2 %v5787_v32  ;;  %v5763_v57 = vor.u32 %v6401_v56, %v5762_v55  ;;  %v5826_v7 = vld [vmem:[#allocation2 + $0x1300] sm:$0xf]  ;;  %v5815_v9 = vor.u32 %v6412_v6, %v5812_v60  ;;  %v6430_v32 = vld [vmem:[#allocation2 + $0x13e4] sm:$0xf] }
 0x2cd   :  { %v5887_v38 = vor.u32 %v6430_v32, %v5884_v15  ;;  %v6404_v56 = vld [vmem:[#allocation2 + $0x1244] sm:$0xf]  ;;  %v5918_v27 = vld [vmem:[#allocation2 + $0x14e0] sm:$0xf] }
 0x2ce   :  { %3702 = vmatpush.bf16.msrb.mxu1 %v5731_v17  ;;  %3728 = vmatpush.bf16.msrb.mxu3 %v5859_v30  ;;  %v6414_v17 = vld [vmem:[#allocation2 + $0x12e4] sm:$0xf]  ;;  %v5719_v30 = vor.u32 %v6388_v24, %v5716_v26 }
 0x2cf   :  { %v5823_v0 = vor.u32 %v6414_v17, %v5820_v54  ;;  %v6422_v17 = vld [vmem:[#allocation2 + $0x1364] sm:$0xf] }
 0x2d0   :  { %3691 = vmatpush.bf16.msrb.mxu0 %v5651_v61  ;;  %v5834_v61 = vld [vmem:[#allocation2 + $0x1320] sm:$0xf] }
 0x2d1   :  { %3256 = vmatmul.bf16.vlgmr.msra.gmra.mxu1 %v2787_v36  ;;  %3282 = vmatmul.bf16.vlgmr.msra.gmra.mxu3 %v2787_v36  ;;  %v6405_v36 = vld [vmem:[#allocation2 + $0x124c] sm:$0xf0] }
 0x2d2   :  { %3703 = vmatpush.bf16.msrb.mxu1 %v5723_v1  ;;  %v5779_v37 = vor.u32 %v6405_v36, %v5778_v35  ;;  %3729 = vmatpush.bf16.msrb.mxu3 %v5851_v3  ;;  %v5835_v1 = vor.u32 %v6419_v63, %v5834_v61  ;;  %v5876_v35 = vld [vmem:[#allocation2 + $0x13d0] sm:$0xf0]  ;;  %v6386_v3 = vld [vmem:[#allocation2 + $0x1124] sm:$0xf] }
 0x2d3   :  { %v6402_v61 = vld [vmem:[#allocation2 + $0x1224] sm:$0xf]  ;;  %v5772_v63 = vld [vmem:[#allocation2 + $0x1230] sm:$0xf0] }
 0x2d4   :  { %3692 = vmatpush.bf16.msrb.mxu0 %v5643_v8  ;;  %3717 = vmatpush.bf16.msrb.mxu2 %v5779_v37  ;;  %v5735_v8 = vor.u32 %v6392_v22, %v5732_v31  ;;  %v6368_v37 = vld [vmem:[#allocation2 + $0x1004] sm:$0xf]  ;;  %v5775_v22 = vor.u32 %v6402_v61, %v5772_v63  ;;  %v5844_v31 = vld [vmem:[#allocation2 + $0x1350] sm:$0xf0]  ;;  %v6447_v63 = vld [vmem:[#allocation2 + $0x15ec] sm:$0xf0] }
 0x2d6   :  { %3704 = vmatpush.bf16.msrb.mxu1 %v5715_v5  ;;  %3730 = vmatpush.bf16.msrb.mxu3 %v5843_v53  ;;  %v5655_v5 = vor.u32 %v6372_v18, %v5652_v4  ;;  %v6424_v53 = vld [vmem:[#allocation2 + $0x1384] sm:$0xf]  ;;  %v5764_v18 = vld [vmem:[#allocation2 + $0x1210] sm:$0xf0] }
 0x2d7   :  { %v5863_v55 = vor.u32 %v6424_v53, %v5860_v28  ;;  %v5914_v53 = vld [vmem:[#allocation2 + $0x14c0] sm:$0xf] }
 0x2d8   :  { %3693 = vmatpush.bf16.msrb.mxu0 %v5635_v25  ;;  %3718 = vmatpush.bf16.msrb.mxu2 %v5771_v48  ;;  %v6417_v25 = vld [vmem:[#allocation2 + $0x130c] sm:$0xf0]  ;;  %v6406_v48 = vld [vmem:[#allocation2 + $0x1264] sm:$0xf] }
 0x2d9   :  { %v5827_v13 = vor.u32 %v6417_v25, %v5826_v7  ;;  %v2856_v7 = vperm.slane %v6678_v50, 1  ;;  %v5836_v25 = vld [vmem:[#allocation2 + $0x1330] sm:$0xf0] }
 0x2da   :  { %3705 = vmatpush.bf16.msrb.mxu1 %v5707_v12  ;;  %3731 = vmatpush.bf16.msrb.mxu3 %v5835_v1  ;;  %v5724_v12 = vld [vmem:[#allocation2 + $0x1170] sm:$0xf0] }
 0x2dc   :  { %3738 = vmatpush.bf16.msra.mxu0 %v5695_v11  ;;  %3719 = vmatpush.bf16.msrb.mxu2 %v5763_v57  ;;  %v6390_v11 = vld [vmem:[#allocation2 + $0x1164] sm:$0xf]  ;;  %v5780_v57 = vld [vmem:[#allocation2 + $0x1250] sm:$0xf0] }
 0x2dd   :  { %v5727_v14 = vor.u32 %v6390_v11, %v5724_v12  ;;  %v5783_v59 = vor.u32 %v6404_v56, %v5780_v57  ;;  %v5906_v57 = vld [vmem:[#allocation2 + $0x1480] sm:$0xf] }
 0x2de   :  { %3706 = vmatpush.bf16.msrb.mxu1 %v5699_v20  ;;  %3732 = vmatpush.bf16.msrb.mxu3 %v5827_v13  ;;  %v5804_v20 = vld [vmem:[#allocation2 + $0x12b0] sm:$0xf0] }
 0x2df   :  { %v5807_v23 = vor.u32 %v6410_v46, %v5804_v20  ;;  %v5828_v46 = vld [vmem:[#allocation2 + $0x1310] sm:$0xf0] }
 0x2e0   :  { %3739 = vmatpush.bf16.msra.mxu0 %v5687_v16  ;;  %3764 = vmatpush.bf16.msra.mxu2 %v5823_v0  ;;  %v6370_v16 = vld [vmem:[#allocation2 + $0x1024] sm:$0xf] }
 0x2e1   :  { %v5647_v21 = vor.u32 %v6370_v16, %v5644_v19  ;;  %v6420_v0 = vld [vmem:[#allocation2 + $0x1344] sm:$0xf] }
 0x2e2   :  { %3751 = vmatpush.bf16.msra.mxu1 %v5759_v33  ;;  %3777 = vmatpush.bf16.msra.mxu3 %v5887_v38  ;;  %v6428_v33 = vld [vmem:[#allocation2 + $0x13c4] sm:$0xf]  ;;  %v5847_v6 = vor.u32 %v6420_v0, %v5844_v31  ;;  %v5946_v31 = vld [vmem:[#allocation2 + $0x15c0] sm:$0xf] }
 0x2e3   :  { %v5879_v36 = vor.u32 %v6428_v33, %v5876_v35  ;;  %v6416_v19 = vld [vmem:[#allocation2 + $0x1304] sm:$0xf]  ;;  %v2857_v33 = vperm.slane %v6678_v50, 2 }
 0x2e4   :  { %3740 = vmatpush.bf16.msra.mxu0 %v5679_v41  ;;  %3765 = vmatpush.bf16.msra.mxu2 %v5815_v9  ;;  %v5639_v41 = vor.u32 %v6368_v37, %v5636_v10  ;;  %v6418_v9 = vld [vmem:[#allocation2 + $0x1324] sm:$0xf] }
 0x2e6   :  { %3752 = vmatpush.bf16.msra.mxu1 %v5751_v45  ;;  %3778 = vmatpush.bf16.msra.mxu3 %v5879_v36  ;;  %v5711_v45 = vor.u32 %v6386_v3, %v5708_v43 }
 0x2e8   :  { %3741 = vmatpush.bf16.msra.mxu0 %v5671_v51  ;;  %3766 = vmatpush.bf16.msra.mxu2 %v5807_v23  ;;  %v5791_v51 = vor.u32 %v6406_v48, %v5788_v49  ;;  %v5831_v23 = vor.u32 %v6416_v19, %v5828_v46  ;;  %v6443_v19 = vld [vmem:[#allocation2 + $0x156c] sm:$0xf0] }
 0x2ea   :  { %3753 = vmatpush.bf16.msra.mxu1 %v5743_v29  ;;  %3779 = vmatpush.bf16.msra.mxu3 %v5871_v47 }
 0x2ec   :  { %3742 = vmatpush.bf16.msra.mxu0 %v5663_v34  ;;  %3767 = vmatpush.bf16.msra.mxu2 %v5799_v42  ;;  %v5852_v34 = vld [vmem:[#allocation2 + $0x1370] sm:$0xf0] }
 0x2ed   :  { %v5855_v54 = vor.u32 %v6422_v17, %v5852_v34  ;;  %v5902_v17 = vld [vmem:[#allocation2 + $0x1460] sm:$0xf]  ;;  %v6435_v34 = vld [vmem:[#allocation2 + $0x146c] sm:$0xf0] }
 0x2ee   :  { %3754 = vmatpush.bf16.msra.mxu1 %v5735_v8  ;;  %3780 = vmatpush.bf16.msra.mxu3 %v5863_v55  ;;  %v6400_v8 = vld [vmem:[#allocation2 + $0x1204] sm:$0xf]  ;;  %v6437_v55 = vld [vmem:[#allocation2 + $0x14ac] sm:$0xf0]  ;;  %v5903_v61 = vor.u32 %v6435_v34, %v5902_v17 }
 0x2ef   :  { %v5767_v12 = vor.u32 %v6400_v8, %v5764_v18  ;;  %v6446_v18 = vld [vmem:[#allocation2 + $0x15cc] sm:$0xf0] }
 0x2f0   :  { %3743 = vmatpush.bf16.msra.mxu0 %v5655_v5  ;;  %3768 = vmatpush.bf16.msra.mxu2 %v5791_v51 }
 0x2f2   :  { %3755 = vmatpush.bf16.msra.mxu1 %v5727_v14  ;;  %3781 = vmatpush.bf16.msra.mxu3 %v5855_v54  ;;  %v5839_v14 = vor.u32 %v6418_v9, %v5836_v25  ;;  %v5950_v54 = vld [vmem:[#allocation2 + $0x15e0] sm:$0xf]  ;;  %v6445_v9 = vld [vmem:[#allocation2 + $0x15ac] sm:$0xf0] }
 0x2f3   :  { %v5951_v0 = vor.u32 %v6447_v63, %v5950_v54 }
 0x2f4   :  { %3744 = vmatpush.bf16.msra.mxu0 %v5647_v21  ;;  %3769 = vmatpush.bf16.msra.mxu2 %v5783_v59 }
 0x2f6   :  { %3756 = vmatpush.bf16.msra.mxu1 %v5719_v30  ;;  %3782 = vmatpush.bf16.msra.mxu3 %v5847_v6  ;;  %v6433_v6 = vld [vmem:[#allocation2 + $0x142c] sm:$0xf0] }
 0x2f8   :  { %3745 = vmatpush.bf16.msra.mxu0 %v5639_v41  ;;  %3770 = vmatpush.bf16.msra.mxu2 %v5775_v22  ;;  %v2858_v41 = vperm.slane %v6678_v50, 3  ;;  %v5919_v50 = vor.u32 %v6439_v52, %v5918_v27  ;;  %v6434_v22 = vld [vmem:[#allocation2 + $0x144c] sm:$0xf0] }
 0x2fa   :  { %3757 = vmatpush.bf16.msra.mxu1 %v5711_v45  ;;  %3783 = vmatpush.bf16.msra.mxu3 %v5839_v14 }
 0x2fc   :  { %3771 = vmatpush.bf16.msra.mxu2 %v5767_v12  ;;  %v6432_v12 = vld [vmem:[#allocation2 + $0x140c] sm:$0xf0] }
 0x2fe   :  { %3758 = vmatpush.bf16.msra.mxu1 %v5703_v40  ;;  %3784 = vmatpush.bf16.msra.mxu3 %v5831_v23  ;;  %v6438_v40 = vld [vmem:[#allocation2 + $0x14cc] sm:$0xf0] }
 0x2ff   :  { %v5915_v28 = vor.u32 %v6438_v40, %v5914_v53  ;;  %v6442_v23 = vld [vmem:[#allocation2 + $0x154c] sm:$0xf0] }
 0x338   :  { %v3192_v29 = vpop.f32.mrf.mxu0 }
 0x339   :  { %v3193_v1 = vadd.f32 %v3192_v29, %v2855_v58  ;;  %v5910_v29 = vld [vmem:[#allocation2 + $0x14a0] sm:$0xf]  ;;  %v6436_v58 = vld [vmem:[#allocation2 + $0x148c] sm:$0xf0] }
 0x33a   :  { %v5911_v56 = vor.u32 %v6437_v55, %v5910_v29  ;;  %v5907_v59 = vor.u32 %v6436_v58, %v5906_v57 }
 0x33e   :  { %v3205_v4 = vpop.f32.mrf.mxu1  ;;  %v3218_v5 = vpop.f32.mrf.mxu2 }
 0x33f   :  { %v3206_v60 = vadd.f32 %v3205_v4, %v3193_v1  ;;  %v3219_v15 = vadd.f32 %v3218_v5, %v2856_v7  ;;  %v5898_v1 = vld [vmem:[#allocation2 + $0x1440] sm:$0xf]  ;;  %v5947_v4 = vor.u32 %v6446_v18, %v5946_v31 }
 0x340   :  { %v3194_v11 = vpop.f32.mrf.mxu0  ;;  %v5899_v8 = vor.u32 %v6434_v22, %v5898_v1  ;;  %v5894_v5 = vld [vmem:[#allocation2 + $0x1420] sm:$0xf] }
 0x341   :  { %v3287_v13 = vmax.f32 %v3206_v60, 0.0  ;;  %v5942_v60 = vld [vmem:[#allocation2 + $0x15a0] sm:$0xf]  ;;  %v5895_v7 = vor.u32 %v6433_v6, %v5894_v5 }
 0x342   :  { %v5943_v25 = vor.u32 %v6445_v9, %v5942_v60  ;;  %v5890_v11 = vld [vmem:[#allocation2 + $0x1400] sm:$0xf] }
 0x343   :  { %v3291_v32 = vpack.c.bf16 %v3287_v13, %v3287_v13  ;;  %v5938_v13 = vld [vmem:[#allocation2 + $0x1580] sm:$0xf]  ;;  %v5891_v14 = vor.u32 %v6432_v12, %v5890_v11 }
 0x344   :  { %v3231_v38 = vpop.f32.mrf.mxu3 }
 0x345   :  { %v3232_v16 = vadd.f32 %v3231_v38, %v3219_v15  ;;  %3694 = vmatmul.bf16.vlgmr.msrb.gmra.mxu0 %v3291_v32 }
 0x346   :  { %v3207_v21 = vpop.f32.mrf.mxu1  ;;  %v3220_v20 = vpop.f32.mrf.mxu2  ;;  %3923 = vmatpush.bf16.msrb.mxu0 %v5919_v50 }
 0x347   :  { %v3288_v24 = vmax.f32 %v3232_v16, 0.0  ;;  %v5934_v16 = vld [vmem:[#allocation2 + $0x1560] sm:$0xf] }
 0x348   :  { %v3244_v26 = vpop.f32.mrf.mxu0  ;;  %v5935_v46 = vor.u32 %v6443_v19, %v5934_v16  ;;  %v5930_v20 = vld [vmem:[#allocation2 + $0x1540] sm:$0xf] }
 0x349   :  { %v3292_v30 = vpack.c.bf16 %v3288_v24, %v3288_v24  ;;  %v3245_v36 = vadd.f32 %v3244_v26, %v2857_v33  ;;  %v5931_v24 = vor.u32 %v6442_v23, %v5930_v20  ;;  %v6441_v33 = vld [vmem:[#allocation2 + $0x152c] sm:$0xf0] }
 0x34a   :  { %3924 = vmatpush.bf16.msrb.mxu0 %v5915_v28 }
 0x34b   :  { %3707 = vmatmul.bf16.vlgmr.msrb.gmra.mxu1 %v3292_v30 }
 0x34c   :  { %v3233_v35 = vpop.f32.mrf.mxu3  ;;  %3936 = vmatpush.bf16.msrb.mxu1 %v5951_v0  ;;  %v3826_v0 = vld [vmem:[#allocation5 + $0x5] ss:$0 sm:$0xff] }
 0x34e   :  { %v3257_v37 = vpop.f32.mrf.mxu1  ;;  %v3270_v10 = vpop.f32.mrf.mxu2  ;;  %3925 = vmatpush.bf16.msrb.mxu0 %v5911_v56 }
 0x34f   :  { %v3258_v39 = vadd.f32 %v3257_v37, %v3245_v36  ;;  %v3271_v43 = vadd.f32 %v3270_v10, %v2858_v41  ;;  %v5922_v37 = vld [vmem:[#allocation2 + $0x1500] sm:$0xf]  ;;  %v6440_v10 = vld [vmem:[#allocation2 + $0x150c] sm:$0xf0] }
 0x350   :  { %v3246_v62 = vpop.f32.mrf.mxu0  ;;  %3937 = vmatpush.bf16.msrb.mxu1 %v5947_v4  ;;  %v3360_v41 = vld [vmem:[#allocation5 + $0x4] ss:$8 sm:$0x3] }
 0x351   :  { %v3289_v42 = vmax.f32 %v3258_v39, 0.0  ;;  %v5923_v39 = vor.u32 %v6440_v10, %v5922_v37  ;;  %v3363_v53 = vperm.slane %v3360_v41, 1 }
 0x352   :  { %3926 = vmatpush.bf16.msrb.mxu0 %v5907_v59 }
 0x353   :  { %v3293_v3 = vpack.c.bf16 %v3289_v42, %v3289_v42  ;;  %v3362_v42 = vperm.slane %v3360_v41, 0 }
 0x354   :  { %v3283_v44 = vpop.f32.mrf.mxu3  ;;  %3938 = vmatpush.bf16.msrb.mxu1 %v5943_v25 }
 0x355   :  { %v3284_v45 = vadd.f32 %v3283_v44, %v3271_v43  ;;  %3720 = vmatmul.bf16.vlgmr.msrb.gmra.mxu2 %v3293_v3  ;;  %3746 = vmatmul.bf16.vlgmr.msra.gmra.mxu0 %v3291_v32  ;;  %v6444_v32 = vld [vmem:[#allocation2 + $0x158c] sm:$0xf0] }
 0x356   :  { %v3259_v2 = vpop.f32.mrf.mxu1  ;;  %v3272_v47 = vpop.f32.mrf.mxu2  ;;  %3927 = vmatpush.bf16.msrb.mxu0 %v5903_v61  ;;  %v5939_v38 = vor.u32 %v6444_v32, %v5938_v13 }
 0x357   :  { %v3290_v48 = vmax.f32 %v3284_v45, 0.0 }
 0x358   :  { %3939 = vmatpush.bf16.msrb.mxu1 %v5939_v38 }
 0x359   :  { %v3294_v49 = vpack.c.bf16 %v3290_v48, %v3290_v48 }
 0x35a   :  { %3928 = vmatpush.bf16.msrb.mxu0 %v5899_v8 }
 0x35b   :  { %3733 = vmatmul.bf16.vlgmr.msrb.gmra.mxu3 %v3294_v49  ;;  %3759 = vmatmul.bf16.vlgmr.msra.gmra.mxu1 %v3292_v30  ;;  %v5926_v30 = vld [vmem:[#allocation2 + $0x1520] sm:$0xf] }
 0x35c   :  { %v3285_v51 = vpop.f32.mrf.mxu3  ;;  %3940 = vmatpush.bf16.msrb.mxu1 %v5935_v46  ;;  %v5927_v35 = vor.u32 %v6441_v33, %v5926_v30 }
 0x35e   :  { %3929 = vmatpush.bf16.msrb.mxu0 %v5895_v7 }
 0x360   :  { %3941 = vmatpush.bf16.msrb.mxu1 %v5931_v24 }
 0x362   :  { %3930 = vmatpush.bf16.msrb.mxu0 %v5891_v14 }
 0x364   :  { %3942 = vmatpush.bf16.msrb.mxu1 %v5927_v35 }
 0x365   :  { %3772 = vmatmul.bf16.vlgmr.msra.gmra.mxu2 %v3293_v3 }
 0x368   :  { %3943 = vmatpush.bf16.msrb.mxu1 %v5923_v39 }
 0x36b   :  { %3785 = vmatmul.bf16.vlgmr.msra.gmra.mxu3 %v3294_v49 }
 0x3c2   :  { %v3695_v15 = vpop.f32.mrf.mxu0 }
 0x3c3   :  { %v3696_v44 = vadd.f32 %v3695_v15, %v3362_v42 }
 0x3c8   :  { %v3708_v21 = vpop.f32.mrf.mxu1 }
 0x3c9   :  { %v3709_v2 = vadd.f32 %v3708_v21, %v3696_v44 }
 0x3ca   :  { %v3697_v26 = vpop.f32.mrf.mxu0 }
 0x3d0   :  { %v3710_v36 = vpop.f32.mrf.mxu1 }
 0x3d2   :  { %v3747_v62 = vpop.f32.mrf.mxu0 }
 0x3d3   :  { %v3748_v29 = vadd.f32 %v3747_v62, %v3363_v53 }
 0x3d8   :  { %v3721_v3 = vpop.f32.mrf.mxu2  ;;  %v3760_v43 = vpop.f32.mrf.mxu1 }
 0x3d9   :  { %v3722_v47 = vadd.f32 %v3721_v3, %v3709_v2  ;;  %v3761_v55 = vadd.f32 %v3760_v43, %v3748_v29 }
 0x3da   :  { %v3749_v45 = vpop.f32.mrf.mxu0 }
 0x3de   :  { %v3734_v48 = vpop.f32.mrf.mxu3 }
 0x3df   :  { %v3735_v49 = vadd.f32 %v3734_v48, %v3722_v47 }
 0x3e0   :  { %v3723_v51 = vpop.f32.mrf.mxu2  ;;  %v3762_v27 = vpop.f32.mrf.mxu1 }
 0x3e1   :  { %v3790_v52 = vmax.f32 %v3735_v49, 0.0 }
 0x3e3   :  { %v3792_v50 = vpack.c.bf16 %v3790_v52, %v3790_v52 }
 0x3e5   :  { %3931 = vmatmul.bf16.vlgmr.msrb.gmra.mxu0 %v3792_v50 }
 0x3e6   :  { %v3736_v40 = vpop.f32.mrf.mxu3 }
 0x3e8   :  { %v3773_v28 = vpop.f32.mrf.mxu2 }
 0x3e9   :  { %v3774_v56 = vadd.f32 %v3773_v28, %v3761_v55 }
 0x3ee   :  { %v3786_v57 = vpop.f32.mrf.mxu3 }
 0x3ef   :  { %v3787_v58 = vadd.f32 %v3786_v57, %v3774_v56 }
 0x3f0   :  { %v3775_v59 = vpop.f32.mrf.mxu2 }
 0x3f1   :  { %v3791_v17 = vmax.f32 %v3787_v58, 0.0 }
 0x3f3   :  { %v3793_v34 = vpack.c.bf16 %v3791_v17, %v3791_v17 }
 0x3f5   :  { %3944 = vmatmul.bf16.vlgmr.msrb.gmra.mxu1 %v3793_v34 }
 0x3f6   :  { %v3788_v54 = vpop.f32.mrf.mxu3 }
 0x462   :  { %v3932_v61 = vpop.f32.mrf.mxu0 }
 0x463   :  { %v3933_v1 = vadd.f32 %v3932_v61, %v3826_v0 }
 0x46a   :  { %v3934_v63 = vpop.f32.mrf.mxu0 }
 0x472   :  { %v3945_v22 = vpop.f32.mrf.mxu1 }
 0x473   :  { %v3946_v31 = vadd.f32 %v3945_v22, %v3933_v1 }
 0x475   :  { %3949 = vst [vmem:[#allocation7] sm:$0x3] %v3946_v31 }
 0x476   :  { %3960 = dma.vmem_to_hbm [thread:$0]  %s3956_s24, 32, %s3958_s27, [#allocation4]  }
 0x47a   :  { %v3947_v8 = vpop.f32.mrf.mxu1 }
 0x47b   :  { %6538 = dma.done.wait [#allocation4], 32  }
 0x47c   :  { %6539 = vsyncadd [#allocation4], 4294967264 }
 0x47d   :  { %3965 = vsyncpa [#allocation3], 1 }
 0x47e   :  { %3966 = vsyncpa [#allocation6], 1 }
 0x47f   :  { %3967 = vsyncpa [#allocation4], 1 }

</bundles_post_ra>
